<compile_context>
chip_gen: v5e
topology: v5e:2x2
jax: 0.10.0
libtpu: 0.0.40
codegen_flags: <defaults>
</compile_context>

<pallas_src>
import functools

import jax
import jax.numpy as jnp
import numpy as np
from jax import lax
from jax.experimental import pallas as pl
from jax.experimental.pallas import tpu as pltpu


def _round_up(x, m):
    return ((x + m - 1) // m) * m


def _sublane_tile(dtype):
    # Native sublane tile of the second-to-last dim: 8 for 4-byte, 16 for 2-byte, 32 for 1-byte.
    return max(8, 32 // jnp.dtype(dtype).itemsize)


def _img2feat_kernel(x_ref, o_ref, *, p2, C, Hn, Wn, precision):
    """Space-to-depth gather for one grid step.

    x_ref: (Nb, C*Hn, p1b, W)      x_ref[n, c*Hn+h, i1, ww]       == x[b, c, h*p1 + i1g, ww]
    o_ref: (Nb, p1b, p2*C*Hn, Wn)  o_ref[n, i1, (i2*C+c)*Hn+h, w] == out[b, (i1g*p2+i2)*C+c, h, w]
    (i1 is local to this grid step's p1 block; the BlockSpec index maps add the global offset.)
    """
    Nb, _, p1b, W = x_ref.shape
    rows = C * Hn
    dtype = x_ref.dtype

    # Lane-0-aligned one-hot column selectors (review item 6), built once per grid step from
    # iota: sel[i2][ww, w] = 1 iff ww == w*p2 + i2, so (g @ sel[i2])[:, w] == g[:, w*p2 + i2]
    # exactly, with the result already starting at lane 0 (no misaligned lane slices).
    src = lax.broadcasted_iota(jnp.int32, (W, Wn), 0)
    dst = lax.broadcasted_iota(jnp.int32, (W, Wn), 1) * p2
    sel = [(src == dst + i2).astype(dtype) for i2 in range(p2)]

    for n in range(Nb):                 # static & small (images per step)
        for i1 in range(p1b):           # static & small (patch rows handled this step)
            # Row gather: a plain static sublane pick, no FLOPs, each element read once.
            g = x_ref[n, :, i1, :]      # (C*Hn, W)
            for i2 in range(p2):        # static & small (patch cols)
                r = jnp.dot(g, sel[i2],
                            preferred_element_type=jnp.float32,
                            precision=precision)
                # r[c*Hn+h, w] == x[b, c, h*p1 + i1g, w*p2 + i2]; store starts at lane 0.
                o_ref[n, i1, pl.ds(i2 * rows, rows), :] = r.astype(o_ref.dtype)


def img2feat_map(x, patch_size):
    """Pallas implementation of Img2Feat_map.forward.

    x: (N, C, H, W)  ->  (N, p1*p2*C, H//p1, W//p2), dtype preserved.
    """
    p1, p2 = patch_size
    N, C, H, W = x.shape
    assert H % p1 == 0 and W % p2 == 0
    Hn, Wn = H // p1, W // p2
    dtype = x.dtype
    isz = jnp.dtype(dtype).itemsize
    subl = _sublane_tile(dtype)

    # Exact permutation also for f32: never let the MXU round operands through bf16 (item 7).
    precision = jax.lax.Precision.HIGHEST if jnp.issubdtype(dtype, jnp.floating) else None

    # ---- VMEM accounting: trailing two dims pad to the (sublane, 128-lane) tile (item 3) ----
    def in_block_bytes(nb, p1b):
        return nb * (C * Hn) * _round_up(p1b, subl) * _round_up(W, 128) * isz

    def out_block_bytes(nb, p1b):
        # NOTE: Wn < 128 pads the out block's lane dim; see the item-(1) TODO at the top.
        return nb * p1b * _round_up(p2 * C * Hn, subl) * _round_up(Wn, 128) * isz

    def blocks_db_bytes(nb, p1b):       # the Pallas pipeline double-buffers both blocks
        return 2 * (in_block_bytes(nb, p1b) + out_block_bytes(nb, p1b))

    sel_bytes = p2 * _round_up(W, subl) * _round_up(Wn, 128) * isz  # item-9 guard: counted

    # Keep pipelined blocks around <= 16 MiB: big enough to amortize the ~0.35us per-step
    # overhead, small enough to leave plenty of headroom under v7x's 64 MiB physical VMEM.
    budget = 16 * 1024 * 1024

    # (2) images per grid step: largest divisor of N (<= 8) whose blocks fit the budget.
    divisors = [d for d in range(1, min(N, 8) + 1) if N % d == 0]
    fitting = [d for d in divisors if blocks_db_bytes(d, p1) <= budget]
    Nb = max(fitting) if fitting else 1

    # (4) p1-split options: p1b must stay a multiple of the sublane tile (or be the full p1).
    split_opts = [1] + [s for s in (2, 4, 8, 16)
                        if p1 % s == 0 and (p1 // s) % subl == 0]

    # Prefer >= 2 grid steps so both v7x TensorCores get work and the pipeline warms up.
    if N // Nb == 1 and N > 1 and len(split_opts) == 1:
        smaller = [d for d in fitting if N // d >= 2]
        if smaller:
            Nb = max(smaller)

    need_split = (N // Nb == 1) and len(split_opts) > 1
    splits = None
    for s in split_opts:
        if need_split and s == 1:
            continue
        if blocks_db_bytes(Nb, p1 // s) <= budget:
            splits = s
            break
    if splits is None:
        splits = split_opts[-1]          # best effort for very large images
    p1b = p1 // splits

    # (3) computed VMEM cap (+ margin for compiler scratch), not a blanket 48 MiB.
    need = blocks_db_bytes(Nb, p1b) + sel_bytes + 8 * 1024 * 1024
    vmem_limit = int(min(max(need, 32 * 1024 * 1024), 128 * 1024 * 1024))

    # Free row-major views; no copy, no dtype change.
    x4 = x.reshape(N, C * Hn, p1, W)

    kernel = functools.partial(_img2feat_kernel, p2=p2, C=C, Hn=Hn, Wn=Wn,
                               precision=precision)

    out4 = pl.pallas_call(
        kernel,
        out_shape=jax.ShapeDtypeStruct((N, p1, p2 * C * Hn, Wn), dtype),
        grid=(N // Nb, splits),
        in_specs=[
            # Trailing block dims (p1b, W): W is the full extent; p1b is either the full p1 or
            # a multiple of the sublane tile.
            pl.BlockSpec((Nb, C * Hn, p1b, W), lambda b, s: (b, 0, s, 0)),
        ],
        # Trailing block dims (p2*C*Hn, Wn) are full extent, so the per-step HBM writeback
        # region is one contiguous slab of the final output.
        out_specs=pl.BlockSpec((Nb, p1b, p2 * C * Hn, Wn), lambda b, s: (b, s, 0, 0)),
        compiler_params=pltpu.CompilerParams(
            dimension_semantics=("parallel", "parallel"),
            vmem_limit_bytes=vmem_limit,
        ),
    )(x4)

    # Free row-major reshape back to the module's output layout.
    return out4.reshape(N, p1 * p2 * C, Hn, Wn)


def _reference(x, patch_size):
    # Pure-JAX reference for 'b c (h p1) (w p2) -> b (p1 p2 c) h w'
    p1, p2 = patch_size
    N, C, H, W = x.shape
    Hn, Wn = H // p1, W // p2
    x6 = x.reshape(N, C, Hn, p1, Wn, p2)
    y = jnp.transpose(x6, (0, 3, 5, 1, 2, 4))   # b, p1, p2, c, h, w
    return y.reshape(N, p1 * p2 * C, Hn, Wn)


if __name__ == "__main__":
    key = jax.random.PRNGKey(0)

    # (a) multi-image blocking path: Nb=2 images per grid step, grid=(2, 1).
    xa = jax.random.normal(key, (4, 4, 16, 16), dtype=jnp.float32)
    pa = (4, 4)
    oa = jax.block_until_ready(img2feat_map(xa, pa))
    assert oa.shape == (4, pa[0] * pa[1] * 4, 16 // pa[0], 16 // pa[1])
    assert oa.dtype == xa.dtype
    np.testing.assert_array_equal(np.asarray(oa), np.asarray(_reference(xa, pa)))

    # (b) single-image path: p1 split across two parallel grid steps, grid=(1, 2).
    xb = jax.random.normal(jax.random.PRNGKey(0), (1, 3, 32, 32), dtype=jnp.float32)
    pb = (16, 16)
    ob = jax.block_until_ready(img2feat_map(xb, pb))
    assert ob.shape == (1, pb[0] * pb[1] * 3, 32 // pb[0], 32 // pb[1])
    assert ob.dtype == xb.dtype
    np.testing.assert_array_equal(np.asarray(ob), np.asarray(_reference(xb, pb)))

    print("KERNEL_OK")
</pallas_src>

<mosaic_0001>
module attributes {stable_mosaic.version = 11 : i64} {
  func.func @_img2feat_kernel(%arg0: i32, %arg1: i32, %arg2: memref<2x16x4x16xf32, #tpu.memory_space<vmem>>, %arg3: memref<2x4x64x4xf32, #tpu.memory_space<vmem>>) attributes {dimension_semantics = [#tpu.dimension_semantics<parallel>, #tpu.dimension_semantics<parallel>], iteration_bounds = array<i64: 2, 1>, scalar_prefetch = 0 : i64, scratch_operands = 0 : i64, tpu.core_type = #tpu.core_type<tc>, window_params = [{transform_indices = @transform_0, window_bounds = array<i64: 2, 16, 4, 16>}, {transform_indices = @transform_1, window_bounds = array<i64: 2, 4, 64, 4>}]} {
    %0 = tpu.iota {dimensions = array<i32: 0>} : vector<16x4xi32>
    %1 = tpu.iota {dimensions = array<i32: 1>} : vector<16x4xi32>
    %c4_i32 = arith.constant 4 : i32
    %2 = vector.broadcast %c4_i32 : i32 to vector<16x4xi32>
    %3 = arith.muli %1, %2 : vector<16x4xi32>
    %c0_i32 = arith.constant 0 : i32
    %4 = vector.broadcast %c0_i32 : i32 to vector<16x4xi32>
    %5 = arith.addi %3, %4 : vector<16x4xi32>
    %6 = arith.cmpi eq, %0, %5 : vector<16x4xi32>
    %7 = arith.extui %6 : vector<16x4xi1> to vector<16x4xi32>
    %8 = arith.sitofp %7 : vector<16x4xi32> to vector<16x4xf32>
    %c1_i32 = arith.constant 1 : i32
    %9 = vector.broadcast %c1_i32 : i32 to vector<16x4xi32>
    %10 = arith.addi %3, %9 : vector<16x4xi32>
    %11 = arith.cmpi eq, %0, %10 : vector<16x4xi32>
    %12 = arith.extui %11 : vector<16x4xi1> to vector<16x4xi32>
    %13 = arith.sitofp %12 : vector<16x4xi32> to vector<16x4xf32>
    %c2_i32 = arith.constant 2 : i32
    %14 = vector.broadcast %c2_i32 : i32 to vector<16x4xi32>
    %15 = arith.addi %3, %14 : vector<16x4xi32>
    %16 = arith.cmpi eq, %0, %15 : vector<16x4xi32>
    %17 = arith.extui %16 : vector<16x4xi1> to vector<16x4xi32>
    %18 = arith.sitofp %17 : vector<16x4xi32> to vector<16x4xf32>
    %c3_i32 = arith.constant 3 : i32
    %19 = vector.broadcast %c3_i32 : i32 to vector<16x4xi32>
    %20 = arith.addi %3, %19 : vector<16x4xi32>
    %21 = arith.cmpi eq, %0, %20 : vector<16x4xi32>
    %22 = arith.extui %21 : vector<16x4xi1> to vector<16x4xi32>
    %23 = arith.sitofp %22 : vector<16x4xi32> to vector<16x4xf32>
    %c0 = arith.constant 0 : index
    %c0_0 = arith.constant 0 : index
    %c0_1 = arith.constant 0 : index
    %c0_2 = arith.constant 0 : index
    %24 = vector.load %arg2[%c0, %c0_0, %c0_1, %c0_2] : memref<2x16x4x16xf32, #tpu.memory_space<vmem>>, vector<1x16x1x16xf32>
    %25 = vector.shape_cast %24 : vector<1x16x1x16xf32> to vector<16x16xf32>
    %cst = arith.constant dense<0.000000e+00> : vector<16x4xf32>
    %26 = tpu.matmul %25, %8, %cst {dimension_numbers = #tpu.dot_dimension_numbers<[1], [0], [0], [1], [0, 0, 1, 1], [], []>, precision = #tpu.contract_precision<fp32>} : vector<16x16xf32>, vector<16x4xf32>, vector<16x4xf32> -> vector<16x4xf32>
    %c0_3 = arith.constant 0 : index
    %c0_4 = arith.constant 0 : index
    %c0_5 = arith.constant 0 : index
    %c0_6 = arith.constant 0 : index
    %27 = vector.load %arg3[%c0_3, %c0_4, %c0_5, %c0_6] : memref<2x4x64x4xf32, #tpu.memory_space<vmem>>, vector<1x1x16x4xf32>
    %28 = vector.shape_cast %27 : vector<1x1x16x4xf32> to vector<16x4xf32>
    %29 = vector.shape_cast %26 : vector<16x4xf32> to vector<1x1x16x4xf32>
    tpu.vector_store %arg3[%c0_3, %c0_4, %c0_5, %c0_6], %29 {strides = array<i32>} : memref<2x4x64x4xf32, #tpu.memory_space<vmem>>, vector<1x1x16x4xf32>,
    %cst_7 = arith.constant dense<0.000000e+00> : vector<16x4xf32>
    %30 = tpu.matmul %25, %13, %cst_7 {dimension_numbers = #tpu.dot_dimension_numbers<[1], [0], [0], [1], [0, 0, 1, 1], [], []>, precision = #tpu.contract_precision<fp32>} : vector<16x16xf32>, vector<16x4xf32>, vector<16x4xf32> -> vector<16x4xf32>
    %c0_8 = arith.constant 0 : index
    %c0_9 = arith.constant 0 : index
    %c16 = arith.constant 16 : index
    %c0_10 = arith.constant 0 : index
    %31 = vector.load %arg3[%c0_8, %c0_9, %c16, %c0_10] : memref<2x4x64x4xf32, #tpu.memory_space<vmem>>, vector<1x1x16x4xf32>
    %32 = vector.shape_cast %31 : vector<1x1x16x4xf32> to vector<16x4xf32>
    %33 = vector.shape_cast %30 : vector<16x4xf32> to vector<1x1x16x4xf32>
    tpu.vector_store %arg3[%c0_8, %c0_9, %c16, %c0_10], %33 {strides = array<i32>} : memref<2x4x64x4xf32, #tpu.memory_space<vmem>>, vector<1x1x16x4xf32>,
    %cst_11 = arith.constant dense<0.000000e+00> : vector<16x4xf32>
    %34 = tpu.matmul %25, %18, %cst_11 {dimension_numbers = #tpu.dot_dimension_numbers<[1], [0], [0], [1], [0, 0, 1, 1], [], []>, precision = #tpu.contract_precision<fp32>} : vector<16x16xf32>, vector<16x4xf32>, vector<16x4xf32> -> vector<16x4xf32>
    %c0_12 = arith.constant 0 : index
    %c0_13 = arith.constant 0 : index
    %c32 = arith.constant 32 : index
    %c0_14 = arith.constant 0 : index
    %35 = vector.load %arg3[%c0_12, %c0_13, %c32, %c0_14] : memref<2x4x64x4xf32, #tpu.memory_space<vmem>>, vector<1x1x16x4xf32>
    %36 = vector.shape_cast %35 : vector<1x1x16x4xf32> to vector<16x4xf32>
    %37 = vector.shape_cast %34 : vector<16x4xf32> to vector<1x1x16x4xf32>
    tpu.vector_store %arg3[%c0_12, %c0_13, %c32, %c0_14], %37 {strides = array<i32>} : memref<2x4x64x4xf32, #tpu.memory_space<vmem>>, vector<1x1x16x4xf32>,
    %cst_15 = arith.constant dense<0.000000e+00> : vector<16x4xf32>
    %38 = tpu.matmul %25, %23, %cst_15 {dimension_numbers = #tpu.dot_dimension_numbers<[1], [0], [0], [1], [0, 0, 1, 1], [], []>, precision = #tpu.contract_precision<fp32>} : vector<16x16xf32>, vector<16x4xf32>, vector<16x4xf32> -> vector<16x4xf32>
    %c0_16 = arith.constant 0 : index
    %c0_17 = arith.constant 0 : index
    %c48 = arith.constant 48 : index
    %c0_18 = arith.constant 0 : index
    %39 = vector.load %arg3[%c0_16, %c0_17, %c48, %c0_18] : memref<2x4x64x4xf32, #tpu.memory_space<vmem>>, vector<1x1x16x4xf32>
    %40 = vector.shape_cast %39 : vector<1x1x16x4xf32> to vector<16x4xf32>
    %41 = vector.shape_cast %38 : vector<16x4xf32> to vector<1x1x16x4xf32>
    tpu.vector_store %arg3[%c0_16, %c0_17, %c48, %c0_18], %41 {strides = array<i32>} : memref<2x4x64x4xf32, #tpu.memory_space<vmem>>, vector<1x1x16x4xf32>,
    %c0_19 = arith.constant 0 : index
    %c0_20 = arith.constant 0 : index
    %c1 = arith.constant 1 : index
    %c0_21 = arith.constant 0 : index
    %42 = vector.load %arg2[%c0_19, %c0_20, %c1, %c0_21] : memref<2x16x4x16xf32, #tpu.memory_space<vmem>>, vector<1x16x1x16xf32>
    %43 = vector.shape_cast %42 : vector<1x16x1x16xf32> to vector<16x16xf32>
    %cst_22 = arith.constant dense<0.000000e+00> : vector<16x4xf32>
    %44 = tpu.matmul %43, %8, %cst_22 {dimension_numbers = #tpu.dot_dimension_numbers<[1], [0], [0], [1], [0, 0, 1, 1], [], []>, precision = #tpu.contract_precision<fp32>} : vector<16x16xf32>, vector<16x4xf32>, vector<16x4xf32> -> vector<16x4xf32>
    %c0_23 = arith.constant 0 : index
    %c1_24 = arith.constant 1 : index
    %c0_25 = arith.constant 0 : index
    %c0_26 = arith.constant 0 : index
    %45 = vector.load %arg3[%c0_23, %c1_24, %c0_25, %c0_26] : memref<2x4x64x4xf32, #tpu.memory_space<vmem>>, vector<1x1x16x4xf32>
    %46 = vector.shape_cast %45 : vector<1x1x16x4xf32> to vector<16x4xf32>
    %47 = vector.shape_cast %44 : vector<16x4xf32> to vector<1x1x16x4xf32>
    tpu.vector_store %arg3[%c0_23, %c1_24, %c0_25, %c0_26], %47 {strides = array<i32>} : memref<2x4x64x4xf32, #tpu.memory_space<vmem>>, vector<1x1x16x4xf32>,
    %cst_27 = arith.constant dense<0.000000e+00> : vector<16x4xf32>
    %48 = tpu.matmul %43, %13, %cst_27 {dimension_numbers = #tpu.dot_dimension_numbers<[1], [0], [0], [1], [0, 0, 1, 1], [], []>, precision = #tpu.contract_precision<fp32>} : vector<16x16xf32>, vector<16x4xf32>, vector<16x4xf32> -> vector<16x4xf32>
    %c0_28 = arith.constant 0 : index
    %c1_29 = arith.constant 1 : index
    %c16_30 = arith.constant 16 : index
    %c0_31 = arith.constant 0 : index
    %49 = vector.load %arg3[%c0_28, %c1_29, %c16_30, %c0_31] : memref<2x4x64x4xf32, #tpu.memory_space<vmem>>, vector<1x1x16x4xf32>
    %50 = vector.shape_cast %49 : vector<1x1x16x4xf32> to vector<16x4xf32>
    %51 = vector.shape_cast %48 : vector<16x4xf32> to vector<1x1x16x4xf32>
    tpu.vector_store %arg3[%c0_28, %c1_29, %c16_30, %c0_31], %51 {strides = array<i32>} : memref<2x4x64x4xf32, #tpu.memory_space<vmem>>, vector<1x1x16x4xf32>,
    %cst_32 = arith.constant dense<0.000000e+00> : vector<16x4xf32>
    %52 = tpu.matmul %43, %18, %cst_32 {dimension_numbers = #tpu.dot_dimension_numbers<[1], [0], [0], [1], [0, 0, 1, 1], [], []>, precision = #tpu.contract_precision<fp32>} : vector<16x16xf32>, vector<16x4xf32>, vector<16x4xf32> -> vector<16x4xf32>
    %c0_33 = arith.constant 0 : index
    %c1_34 = arith.constant 1 : index
    %c32_35 = arith.constant 32 : index
    %c0_36 = arith.constant 0 : index
    %53 = vector.load %arg3[%c0_33, %c1_34, %c32_35, %c0_36] : memref<2x4x64x4xf32, #tpu.memory_space<vmem>>, vector<1x1x16x4xf32>
    %54 = vector.shape_cast %53 : vector<1x1x16x4xf32> to vector<16x4xf32>
    %55 = vector.shape_cast %52 : vector<16x4xf32> to vector<1x1x16x4xf32>
    tpu.vector_store %arg3[%c0_33, %c1_34, %c32_35, %c0_36], %55 {strides = array<i32>} : memref<2x4x64x4xf32, #tpu.memory_space<vmem>>, vector<1x1x16x4xf32>,
    %cst_37 = arith.constant dense<0.000000e+00> : vector<16x4xf32>
    %56 = tpu.matmul %43, %23, %cst_37 {dimension_numbers = #tpu.dot_dimension_numbers<[1], [0], [0], [1], [0, 0, 1, 1], [], []>, precision = #tpu.contract_precision<fp32>} : vector<16x16xf32>, vector<16x4xf32>, vector<16x4xf32> -> vector<16x4xf32>
    %c0_38 = arith.constant 0 : index
    %c1_39 = arith.constant 1 : index
    %c48_40 = arith.constant 48 : index
    %c0_41 = arith.constant 0 : index
    %57 = vector.load %arg3[%c0_38, %c1_39, %c48_40, %c0_41] : memref<2x4x64x4xf32, #tpu.memory_space<vmem>>, vector<1x1x16x4xf32>
    %58 = vector.shape_cast %57 : vector<1x1x16x4xf32> to vector<16x4xf32>
    %59 = vector.shape_cast %56 : vector<16x4xf32> to vector<1x1x16x4xf32>
    tpu.vector_store %arg3[%c0_38, %c1_39, %c48_40, %c0_41], %59 {strides = array<i32>} : memref<2x4x64x4xf32, #tpu.memory_space<vmem>>, vector<1x1x16x4xf32>,
    %c0_42 = arith.constant 0 : index
    %c0_43 = arith.constant 0 : index
    %c2 = arith.constant 2 : index
    %c0_44 = arith.constant 0 : index
    %60 = vector.load %arg2[%c0_42, %c0_43, %c2, %c0_44] : memref<2x16x4x16xf32, #tpu.memory_space<vmem>>, vector<1x16x1x16xf32>
    %61 = vector.shape_cast %60 : vector<1x16x1x16xf32> to vector<16x16xf32>
    %cst_45 = arith.constant dense<0.000000e+00> : vector<16x4xf32>
    %62 = tpu.matmul %61, %8, %cst_45 {dimension_numbers = #tpu.dot_dimension_numbers<[1], [0], [0], [1], [0, 0, 1, 1], [], []>, precision = #tpu.contract_precision<fp32>} : vector<16x16xf32>, vector<16x4xf32>, vector<16x4xf32> -> vector<16x4xf32>
    %c0_46 = arith.constant 0 : index
    %c2_47 = arith.constant 2 : index
    %c0_48 = arith.constant 0 : index
    %c0_49 = arith.constant 0 : index
    %63 = vector.load %arg3[%c0_46, %c2_47, %c0_48, %c0_49] : memref<2x4x64x4xf32, #tpu.memory_space<vmem>>, vector<1x1x16x4xf32>
    %64 = vector.shape_cast %63 : vector<1x1x16x4xf32> to vector<16x4xf32>
    %65 = vector.shape_cast %62 : vector<16x4xf32> to vector<1x1x16x4xf32>
    tpu.vector_store %arg3[%c0_46, %c2_47, %c0_48, %c0_49], %65 {strides = array<i32>} : memref<2x4x64x4xf32, #tpu.memory_space<vmem>>, vector<1x1x16x4xf32>,
    %cst_50 = arith.constant dense<0.000000e+00> : vector<16x4xf32>
    %66 = tpu.matmul %61, %13, %cst_50 {dimension_numbers = #tpu.dot_dimension_numbers<[1], [0], [0], [1], [0, 0, 1, 1], [], []>, precision = #tpu.contract_precision<fp32>} : vector<16x16xf32>, vector<16x4xf32>, vector<16x4xf32> -> vector<16x4xf32>
    %c0_51 = arith.constant 0 : index
    %c2_52 = arith.constant 2 : index
    %c16_53 = arith.constant 16 : index
    %c0_54 = arith.constant 0 : index
    %67 = vector.load %arg3[%c0_51, %c2_52, %c16_53, %c0_54] : memref<2x4x64x4xf32, #tpu.memory_space<vmem>>, vector<1x1x16x4xf32>
    %68 = vector.shape_cast %67 : vector<1x1x16x4xf32> to vector<16x4xf32>
    %69 = vector.shape_cast %66 : vector<16x4xf32> to vector<1x1x16x4xf32>
    tpu.vector_store %arg3[%c0_51, %c2_52, %c16_53, %c0_54], %69 {strides = array<i32>} : memref<2x4x64x4xf32, #tpu.memory_space<vmem>>, vector<1x1x16x4xf32>,
    %cst_55 = arith.constant dense<0.000000e+00> : vector<16x4xf32>
    %70 = tpu.matmul %61, %18, %cst_55 {dimension_numbers = #tpu.dot_dimension_numbers<[1], [0], [0], [1], [0, 0, 1, 1], [], []>, precision = #tpu.contract_precision<fp32>} : vector<16x16xf32>, vector<16x4xf32>, vector<16x4xf32> -> vector<16x4xf32>
    %c0_56 = arith.constant 0 : index
    %c2_57 = arith.constant 2 : index
    %c32_58 = arith.constant 32 : index
    %c0_59 = arith.constant 0 : index
    %71 = vector.load %arg3[%c0_56, %c2_57, %c32_58, %c0_59] : memref<2x4x64x4xf32, #tpu.memory_space<vmem>>, vector<1x1x16x4xf32>
    %72 = vector.shape_cast %71 : vector<1x1x16x4xf32> to vector<16x4xf32>
    %73 = vector.shape_cast %70 : vector<16x4xf32> to vector<1x1x16x4xf32>
    tpu.vector_store %arg3[%c0_56, %c2_57, %c32_58, %c0_59], %73 {strides = array<i32>} : memref<2x4x64x4xf32, #tpu.memory_space<vmem>>, vector<1x1x16x4xf32>,
    %cst_60 = arith.constant dense<0.000000e+00> : vector<16x4xf32>
    %74 = tpu.matmul %61, %23, %cst_60 {dimension_numbers = #tpu.dot_dimension_numbers<[1], [0], [0], [1], [0, 0, 1, 1], [], []>, precision = #tpu.contract_precision<fp32>} : vector<16x16xf32>, vector<16x4xf32>, vector<16x4xf32> -> vector<16x4xf32>
    %c0_61 = arith.constant 0 : index
    %c2_62 = arith.constant 2 : index
    %c48_63 = arith.constant 48 : index
    %c0_64 = arith.constant 0 : index
    %75 = vector.load %arg3[%c0_61, %c2_62, %c48_63, %c0_64] : memref<2x4x64x4xf32, #tpu.memory_space<vmem>>, vector<1x1x16x4xf32>
    %76 = vector.shape_cast %75 : vector<1x1x16x4xf32> to vector<16x4xf32>
    %77 = vector.shape_cast %74 : vector<16x4xf32> to vector<1x1x16x4xf32>
    tpu.vector_store %arg3[%c0_61, %c2_62, %c48_63, %c0_64], %77 {strides = array<i32>} : memref<2x4x64x4xf32, #tpu.memory_space<vmem>>, vector<1x1x16x4xf32>,
    %c0_65 = arith.constant 0 : index
    %c0_66 = arith.constant 0 : index
    %c3 = arith.constant 3 : index
    %c0_67 = arith.constant 0 : index
    %78 = vector.load %arg2[%c0_65, %c0_66, %c3, %c0_67] : memref<2x16x4x16xf32, #tpu.memory_space<vmem>>, vector<1x16x1x16xf32>
    %79 = vector.shape_cast %78 : vector<1x16x1x16xf32> to vector<16x16xf32>
    %cst_68 = arith.constant dense<0.000000e+00> : vector<16x4xf32>
    %80 = tpu.matmul %79, %8, %cst_68 {dimension_numbers = #tpu.dot_dimension_numbers<[1], [0], [0], [1], [0, 0, 1, 1], [], []>, precision = #tpu.contract_precision<fp32>} : vector<16x16xf32>, vector<16x4xf32>, vector<16x4xf32> -> vector<16x4xf32>
    %c0_69 = arith.constant 0 : index
    %c3_70 = arith.constant 3 : index
    %c0_71 = arith.constant 0 : index
    %c0_72 = arith.constant 0 : index
    %81 = vector.load %arg3[%c0_69, %c3_70, %c0_71, %c0_72] : memref<2x4x64x4xf32, #tpu.memory_space<vmem>>, vector<1x1x16x4xf32>
    %82 = vector.shape_cast %81 : vector<1x1x16x4xf32> to vector<16x4xf32>
    %83 = vector.shape_cast %80 : vector<16x4xf32> to vector<1x1x16x4xf32>
    tpu.vector_store %arg3[%c0_69, %c3_70, %c0_71, %c0_72], %83 {strides = array<i32>} : memref<2x4x64x4xf32, #tpu.memory_space<vmem>>, vector<1x1x16x4xf32>,
    %cst_73 = arith.constant dense<0.000000e+00> : vector<16x4xf32>
    %84 = tpu.matmul %79, %13, %cst_73 {dimension_numbers = #tpu.dot_dimension_numbers<[1], [0], [0], [1], [0, 0, 1, 1], [], []>, precision = #tpu.contract_precision<fp32>} : vector<16x16xf32>, vector<16x4xf32>, vector<16x4xf32> -> vector<16x4xf32>
    %c0_74 = arith.constant 0 : index
    %c3_75 = arith.constant 3 : index
    %c16_76 = arith.constant 16 : index
    %c0_77 = arith.constant 0 : index
    %85 = vector.load %arg3[%c0_74, %c3_75, %c16_76, %c0_77] : memref<2x4x64x4xf32, #tpu.memory_space<vmem>>, vector<1x1x16x4xf32>
    %86 = vector.shape_cast %85 : vector<1x1x16x4xf32> to vector<16x4xf32>
    %87 = vector.shape_cast %84 : vector<16x4xf32> to vector<1x1x16x4xf32>
    tpu.vector_store %arg3[%c0_74, %c3_75, %c16_76, %c0_77], %87 {strides = array<i32>} : memref<2x4x64x4xf32, #tpu.memory_space<vmem>>, vector<1x1x16x4xf32>,
    %cst_78 = arith.constant dense<0.000000e+00> : vector<16x4xf32>
    %88 = tpu.matmul %79, %18, %cst_78 {dimension_numbers = #tpu.dot_dimension_numbers<[1], [0], [0], [1], [0, 0, 1, 1], [], []>, precision = #tpu.contract_precision<fp32>} : vector<16x16xf32>, vector<16x4xf32>, vector<16x4xf32> -> vector<16x4xf32>
    %c0_79 = arith.constant 0 : index
    %c3_80 = arith.constant 3 : index
    %c32_81 = arith.constant 32 : index
    %c0_82 = arith.constant 0 : index
    %89 = vector.load %arg3[%c0_79, %c3_80, %c32_81, %c0_82] : memref<2x4x64x4xf32, #tpu.memory_space<vmem>>, vector<1x1x16x4xf32>
    %90 = vector.shape_cast %89 : vector<1x1x16x4xf32> to vector<16x4xf32>
    %91 = vector.shape_cast %88 : vector<16x4xf32> to vector<1x1x16x4xf32>
    tpu.vector_store %arg3[%c0_79, %c3_80, %c32_81, %c0_82], %91 {strides = array<i32>} : memref<2x4x64x4xf32, #tpu.memory_space<vmem>>, vector<1x1x16x4xf32>,
    %cst_83 = arith.constant dense<0.000000e+00> : vector<16x4xf32>
    %92 = tpu.matmul %79, %23, %cst_83 {dimension_numbers = #tpu.dot_dimension_numbers<[1], [0], [0], [1], [0, 0, 1, 1], [], []>, precision = #tpu.contract_precision<fp32>} : vector<16x16xf32>, vector<16x4xf32>, vector<16x4xf32> -> vector<16x4xf32>
    %c0_84 = arith.constant 0 : index
    %c3_85 = arith.constant 3 : index
    %c48_86 = arith.constant 48 : index
    %c0_87 = arith.constant 0 : index
    %93 = vector.load %arg3[%c0_84, %c3_85, %c48_86, %c0_87] : memref<2x4x64x4xf32, #tpu.memory_space<vmem>>, vector<1x1x16x4xf32>
    %94 = vector.shape_cast %93 : vector<1x1x16x4xf32> to vector<16x4xf32>
    %95 = vector.shape_cast %92 : vector<16x4xf32> to vector<1x1x16x4xf32>
    tpu.vector_store %arg3[%c0_84, %c3_85, %c48_86, %c0_87], %95 {strides = array<i32>} : memref<2x4x64x4xf32, #tpu.memory_space<vmem>>, vector<1x1x16x4xf32>,
    %c1_88 = arith.constant 1 : index
    %c0_89 = arith.constant 0 : index
    %c0_90 = arith.constant 0 : index
    %c0_91 = arith.constant 0 : index
    %96 = vector.load %arg2[%c1_88, %c0_89, %c0_90, %c0_91] : memref<2x16x4x16xf32, #tpu.memory_space<vmem>>, vector<1x16x1x16xf32>
    %97 = vector.shape_cast %96 : vector<1x16x1x16xf32> to vector<16x16xf32>
    %cst_92 = arith.constant dense<0.000000e+00> : vector<16x4xf32>
    %98 = tpu.matmul %97, %8, %cst_92 {dimension_numbers = #tpu.dot_dimension_numbers<[1], [0], [0], [1], [0, 0, 1, 1], [], []>, precision = #tpu.contract_precision<fp32>} : vector<16x16xf32>, vector<16x4xf32>, vector<16x4xf32> -> vector<16x4xf32>
    %c1_93 = arith.constant 1 : index
    %c0_94 = arith.constant 0 : index
    %c0_95 = arith.constant 0 : index
    %c0_96 = arith.constant 0 : index
    %99 = vector.load %arg3[%c1_93, %c0_94, %c0_95, %c0_96] : memref<2x4x64x4xf32, #tpu.memory_space<vmem>>, vector<1x1x16x4xf32>
    %100 = vector.shape_cast %99 : vector<1x1x16x4xf32> to vector<16x4xf32>
    %101 = vector.shape_cast %98 : vector<16x4xf32> to vector<1x1x16x4xf32>
    tpu.vector_store %arg3[%c1_93, %c0_94, %c0_95, %c0_96], %101 {strides = array<i32>} : memref<2x4x64x4xf32, #tpu.memory_space<vmem>>, vector<1x1x16x4xf32>,
    %cst_97 = arith.constant dense<0.000000e+00> : vector<16x4xf32>
    %102 = tpu.matmul %97, %13, %cst_97 {dimension_numbers = #tpu.dot_dimension_numbers<[1], [0], [0], [1], [0, 0, 1, 1], [], []>, precision = #tpu.contract_precision<fp32>} : vector<16x16xf32>, vector<16x4xf32>, vector<16x4xf32> -> vector<16x4xf32>
    %c1_98 = arith.constant 1 : index
    %c0_99 = arith.constant 0 : index
    %c16_100 = arith.constant 16 : index
    %c0_101 = arith.constant 0 : index
    %103 = vector.load %arg3[%c1_98, %c0_99, %c16_100, %c0_101] : memref<2x4x64x4xf32, #tpu.memory_space<vmem>>, vector<1x1x16x4xf32>
    %104 = vector.shape_cast %103 : vector<1x1x16x4xf32> to vector<16x4xf32>
    %105 = vector.shape_cast %102 : vector<16x4xf32> to vector<1x1x16x4xf32>
    tpu.vector_store %arg3[%c1_98, %c0_99, %c16_100, %c0_101], %105 {strides = array<i32>} : memref<2x4x64x4xf32, #tpu.memory_space<vmem>>, vector<1x1x16x4xf32>,
    %cst_102 = arith.constant dense<0.000000e+00> : vector<16x4xf32>
    %106 = tpu.matmul %97, %18, %cst_102 {dimension_numbers = #tpu.dot_dimension_numbers<[1], [0], [0], [1], [0, 0, 1, 1], [], []>, precision = #tpu.contract_precision<fp32>} : vector<16x16xf32>, vector<16x4xf32>, vector<16x4xf32> -> vector<16x4xf32>
    %c1_103 = arith.constant 1 : index
    %c0_104 = arith.constant 0 : index
    %c32_105 = arith.constant 32 : index
    %c0_106 = arith.constant 0 : index
    %107 = vector.load %arg3[%c1_103, %c0_104, %c32_105, %c0_106] : memref<2x4x64x4xf32, #tpu.memory_space<vmem>>, vector<1x1x16x4xf32>
    %108 = vector.shape_cast %107 : vector<1x1x16x4xf32> to vector<16x4xf32>
    %109 = vector.shape_cast %106 : vector<16x4xf32> to vector<1x1x16x4xf32>
    tpu.vector_store %arg3[%c1_103, %c0_104, %c32_105, %c0_106], %109 {strides = array<i32>} : memref<2x4x64x4xf32, #tpu.memory_space<vmem>>, vector<1x1x16x4xf32>,
    %cst_107 = arith.constant dense<0.000000e+00> : vector<16x4xf32>
    %110 = tpu.matmul %97, %23, %cst_107 {dimension_numbers = #tpu.dot_dimension_numbers<[1], [0], [0], [1], [0, 0, 1, 1], [], []>, precision = #tpu.contract_precision<fp32>} : vector<16x16xf32>, vector<16x4xf32>, vector<16x4xf32> -> vector<16x4xf32>
    %c1_108 = arith.constant 1 : index
    %c0_109 = arith.constant 0 : index
    %c48_110 = arith.constant 48 : index
    %c0_111 = arith.constant 0 : index
    %111 = vector.load %arg3[%c1_108, %c0_109, %c48_110, %c0_111] : memref<2x4x64x4xf32, #tpu.memory_space<vmem>>, vector<1x1x16x4xf32>
    %112 = vector.shape_cast %111 : vector<1x1x16x4xf32> to vector<16x4xf32>
    %113 = vector.shape_cast %110 : vector<16x4xf32> to vector<1x1x16x4xf32>
    tpu.vector_store %arg3[%c1_108, %c0_109, %c48_110, %c0_111], %113 {strides = array<i32>} : memref<2x4x64x4xf32, #tpu.memory_space<vmem>>, vector<1x1x16x4xf32>,
    %c1_112 = arith.constant 1 : index
    %c0_113 = arith.constant 0 : index
    %c1_114 = arith.constant 1 : index
    %c0_115 = arith.constant 0 : index
    %114 = vector.load %arg2[%c1_112, %c0_113, %c1_114, %c0_115] : memref<2x16x4x16xf32, #tpu.memory_space<vmem>>, vector<1x16x1x16xf32>
    %115 = vector.shape_cast %114 : vector<1x16x1x16xf32> to vector<16x16xf32>
    %cst_116 = arith.constant dense<0.000000e+00> : vector<16x4xf32>
    %116 = tpu.matmul %115, %8, %cst_116 {dimension_numbers = #tpu.dot_dimension_numbers<[1], [0], [0], [1], [0, 0, 1, 1], [], []>, precision = #tpu.contract_precision<fp32>} : vector<16x16xf32>, vector<16x4xf32>, vector<16x4xf32> -> vector<16x4xf32>
    %c1_117 = arith.constant 1 : index
    %c1_118 = arith.constant 1 : index
    %c0_119 = arith.constant 0 : index
    %c0_120 = arith.constant 0 : index
    %117 = vector.load %arg3[%c1_117, %c1_118, %c0_119, %c0_120] : memref<2x4x64x4xf32, #tpu.memory_space<vmem>>, vector<1x1x16x4xf32>
    %118 = vector.shape_cast %117 : vector<1x1x16x4xf32> to vector<16x4xf32>
    %119 = vector.shape_cast %116 : vector<16x4xf32> to vector<1x1x16x4xf32>
    tpu.vector_store %arg3[%c1_117, %c1_118, %c0_119, %c0_120], %119 {strides = array<i32>} : memref<2x4x64x4xf32, #tpu.memory_space<vmem>>, vector<1x1x16x4xf32>,
    %cst_121 = arith.constant dense<0.000000e+00> : vector<16x4xf32>
    %120 = tpu.matmul %115, %13, %cst_121 {dimension_numbers = #tpu.dot_dimension_numbers<[1], [0], [0], [1], [0, 0, 1, 1], [], []>, precision = #tpu.contract_precision<fp32>} : vector<16x16xf32>, vector<16x4xf32>, vector<16x4xf32> -> vector<16x4xf32>
    %c1_122 = arith.constant 1 : index
    %c1_123 = arith.constant 1 : index
    %c16_124 = arith.constant 16 : index
    %c0_125 = arith.constant 0 : index
    %121 = vector.load %arg3[%c1_122, %c1_123, %c16_124, %c0_125] : memref<2x4x64x4xf32, #tpu.memory_space<vmem>>, vector<1x1x16x4xf32>
    %122 = vector.shape_cast %121 : vector<1x1x16x4xf32> to vector<16x4xf32>
    %123 = vector.shape_cast %120 : vector<16x4xf32> to vector<1x1x16x4xf32>
    tpu.vector_store %arg3[%c1_122, %c1_123, %c16_124, %c0_125], %123 {strides = array<i32>} : memref<2x4x64x4xf32, #tpu.memory_space<vmem>>, vector<1x1x16x4xf32>,
    %cst_126 = arith.constant dense<0.000000e+00> : vector<16x4xf32>
    %124 = tpu.matmul %115, %18, %cst_126 {dimension_numbers = #tpu.dot_dimension_numbers<[1], [0], [0], [1], [0, 0, 1, 1], [], []>, precision = #tpu.contract_precision<fp32>} : vector<16x16xf32>, vector<16x4xf32>, vector<16x4xf32> -> vector<16x4xf32>
    %c1_127 = arith.constant 1 : index
    %c1_128 = arith.constant 1 : index
    %c32_129 = arith.constant 32 : index
    %c0_130 = arith.constant 0 : index
    %125 = vector.load %arg3[%c1_127, %c1_128, %c32_129, %c0_130] : memref<2x4x64x4xf32, #tpu.memory_space<vmem>>, vector<1x1x16x4xf32>
    %126 = vector.shape_cast %125 : vector<1x1x16x4xf32> to vector<16x4xf32>
    %127 = vector.shape_cast %124 : vector<16x4xf32> to vector<1x1x16x4xf32>
    tpu.vector_store %arg3[%c1_127, %c1_128, %c32_129, %c0_130], %127 {strides = array<i32>} : memref<2x4x64x4xf32, #tpu.memory_space<vmem>>, vector<1x1x16x4xf32>,
    %cst_131 = arith.constant dense<0.000000e+00> : vector<16x4xf32>
    %128 = tpu.matmul %115, %23, %cst_131 {dimension_numbers = #tpu.dot_dimension_numbers<[1], [0], [0], [1], [0, 0, 1, 1], [], []>, precision = #tpu.contract_precision<fp32>} : vector<16x16xf32>, vector<16x4xf32>, vector<16x4xf32> -> vector<16x4xf32>
    %c1_132 = arith.constant 1 : index
    %c1_133 = arith.constant 1 : index
    %c48_134 = arith.constant 48 : index
    %c0_135 = arith.constant 0 : index
    %129 = vector.load %arg3[%c1_132, %c1_133, %c48_134, %c0_135] : memref<2x4x64x4xf32, #tpu.memory_space<vmem>>, vector<1x1x16x4xf32>
    %130 = vector.shape_cast %129 : vector<1x1x16x4xf32> to vector<16x4xf32>
    %131 = vector.shape_cast %128 : vector<16x4xf32> to vector<1x1x16x4xf32>
    tpu.vector_store %arg3[%c1_132, %c1_133, %c48_134, %c0_135], %131 {strides = array<i32>} : memref<2x4x64x4xf32, #tpu.memory_space<vmem>>, vector<1x1x16x4xf32>,
    %c1_136 = arith.constant 1 : index
    %c0_137 = arith.constant 0 : index
    %c2_138 = arith.constant 2 : index
    %c0_139 = arith.constant 0 : index
    %132 = vector.load %arg2[%c1_136, %c0_137, %c2_138, %c0_139] : memref<2x16x4x16xf32, #tpu.memory_space<vmem>>, vector<1x16x1x16xf32>
    %133 = vector.shape_cast %132 : vector<1x16x1x16xf32> to vector<16x16xf32>
    %cst_140 = arith.constant dense<0.000000e+00> : vector<16x4xf32>
    %134 = tpu.matmul %133, %8, %cst_140 {dimension_numbers = #tpu.dot_dimension_numbers<[1], [0], [0], [1], [0, 0, 1, 1], [], []>, precision = #tpu.contract_precision<fp32>} : vector<16x16xf32>, vector<16x4xf32>, vector<16x4xf32> -> vector<16x4xf32>
    %c1_141 = arith.constant 1 : index
    %c2_142 = arith.constant 2 : index
    %c0_143 = arith.constant 0 : index
    %c0_144 = arith.constant 0 : index
    %135 = vector.load %arg3[%c1_141, %c2_142, %c0_143, %c0_144] : memref<2x4x64x4xf32, #tpu.memory_space<vmem>>, vector<1x1x16x4xf32>
    %136 = vector.shape_cast %135 : vector<1x1x16x4xf32> to vector<16x4xf32>
    %137 = vector.shape_cast %134 : vector<16x4xf32> to vector<1x1x16x4xf32>
    tpu.vector_store %arg3[%c1_141, %c2_142, %c0_143, %c0_144], %137 {strides = array<i32>} : memref<2x4x64x4xf32, #tpu.memory_space<vmem>>, vector<1x1x16x4xf32>,
    %cst_145 = arith.constant dense<0.000000e+00> : vector<16x4xf32>
    %138 = tpu.matmul %133, %13, %cst_145 {dimension_numbers = #tpu.dot_dimension_numbers<[1], [0], [0], [1], [0, 0, 1, 1], [], []>, precision = #tpu.contract_precision<fp32>} : vector<16x16xf32>, vector<16x4xf32>, vector<16x4xf32> -> vector<16x4xf32>
    %c1_146 = arith.constant 1 : index
    %c2_147 = arith.constant 2 : index
    %c16_148 = arith.constant 16 : index
    %c0_149 = arith.constant 0 : index
    %139 = vector.load %arg3[%c1_146, %c2_147, %c16_148, %c0_149] : memref<2x4x64x4xf32, #tpu.memory_space<vmem>>, vector<1x1x16x4xf32>
    %140 = vector.shape_cast %139 : vector<1x1x16x4xf32> to vector<16x4xf32>
    %141 = vector.shape_cast %138 : vector<16x4xf32> to vector<1x1x16x4xf32>
    tpu.vector_store %arg3[%c1_146, %c2_147, %c16_148, %c0_149], %141 {strides = array<i32>} : memref<2x4x64x4xf32, #tpu.memory_space<vmem>>, vector<1x1x16x4xf32>,
    %cst_150 = arith.constant dense<0.000000e+00> : vector<16x4xf32>
    %142 = tpu.matmul %133, %18, %cst_150 {dimension_numbers = #tpu.dot_dimension_numbers<[1], [0], [0], [1], [0, 0, 1, 1], [], []>, precision = #tpu.contract_precision<fp32>} : vector<16x16xf32>, vector<16x4xf32>, vector<16x4xf32> -> vector<16x4xf32>
    %c1_151 = arith.constant 1 : index
    %c2_152 = arith.constant 2 : index
    %c32_153 = arith.constant 32 : index
    %c0_154 = arith.constant 0 : index
    %143 = vector.load %arg3[%c1_151, %c2_152, %c32_153, %c0_154] : memref<2x4x64x4xf32, #tpu.memory_space<vmem>>, vector<1x1x16x4xf32>
    %144 = vector.shape_cast %143 : vector<1x1x16x4xf32> to vector<16x4xf32>
    %145 = vector.shape_cast %142 : vector<16x4xf32> to vector<1x1x16x4xf32>
    tpu.vector_store %arg3[%c1_151, %c2_152, %c32_153, %c0_154], %145 {strides = array<i32>} : memref<2x4x64x4xf32, #tpu.memory_space<vmem>>, vector<1x1x16x4xf32>,
    %cst_155 = arith.constant dense<0.000000e+00> : vector<16x4xf32>
    %146 = tpu.matmul %133, %23, %cst_155 {dimension_numbers = #tpu.dot_dimension_numbers<[1], [0], [0], [1], [0, 0, 1, 1], [], []>, precision = #tpu.contract_precision<fp32>} : vector<16x16xf32>, vector<16x4xf32>, vector<16x4xf32> -> vector<16x4xf32>
    %c1_156 = arith.constant 1 : index
    %c2_157 = arith.constant 2 : index
    %c48_158 = arith.constant 48 : index
    %c0_159 = arith.constant 0 : index
    %147 = vector.load %arg3[%c1_156, %c2_157, %c48_158, %c0_159] : memref<2x4x64x4xf32, #tpu.memory_space<vmem>>, vector<1x1x16x4xf32>
    %148 = vector.shape_cast %147 : vector<1x1x16x4xf32> to vector<16x4xf32>
    %149 = vector.shape_cast %146 : vector<16x4xf32> to vector<1x1x16x4xf32>
    tpu.vector_store %arg3[%c1_156, %c2_157, %c48_158, %c0_159], %149 {strides = array<i32>} : memref<2x4x64x4xf32, #tpu.memory_space<vmem>>, vector<1x1x16x4xf32>,
    %c1_160 = arith.constant 1 : index
    %c0_161 = arith.constant 0 : index
    %c3_162 = arith.constant 3 : index
    %c0_163 = arith.constant 0 : index
    %150 = vector.load %arg2[%c1_160, %c0_161, %c3_162, %c0_163] : memref<2x16x4x16xf32, #tpu.memory_space<vmem>>, vector<1x16x1x16xf32>
    %151 = vector.shape_cast %150 : vector<1x16x1x16xf32> to vector<16x16xf32>
    %cst_164 = arith.constant dense<0.000000e+00> : vector<16x4xf32>
    %152 = tpu.matmul %151, %8, %cst_164 {dimension_numbers = #tpu.dot_dimension_numbers<[1], [0], [0], [1], [0, 0, 1, 1], [], []>, precision = #tpu.contract_precision<fp32>} : vector<16x16xf32>, vector<16x4xf32>, vector<16x4xf32> -> vector<16x4xf32>
    %c1_165 = arith.constant 1 : index
    %c3_166 = arith.constant 3 : index
    %c0_167 = arith.constant 0 : index
    %c0_168 = arith.constant 0 : index
    %153 = vector.load %arg3[%c1_165, %c3_166, %c0_167, %c0_168] : memref<2x4x64x4xf32, #tpu.memory_space<vmem>>, vector<1x1x16x4xf32>
    %154 = vector.shape_cast %153 : vector<1x1x16x4xf32> to vector<16x4xf32>
    %155 = vector.shape_cast %152 : vector<16x4xf32> to vector<1x1x16x4xf32>
    tpu.vector_store %arg3[%c1_165, %c3_166, %c0_167, %c0_168], %155 {strides = array<i32>} : memref<2x4x64x4xf32, #tpu.memory_space<vmem>>, vector<1x1x16x4xf32>,
    %cst_169 = arith.constant dense<0.000000e+00> : vector<16x4xf32>
    %156 = tpu.matmul %151, %13, %cst_169 {dimension_numbers = #tpu.dot_dimension_numbers<[1], [0], [0], [1], [0, 0, 1, 1], [], []>, precision = #tpu.contract_precision<fp32>} : vector<16x16xf32>, vector<16x4xf32>, vector<16x4xf32> -> vector<16x4xf32>
    %c1_170 = arith.constant 1 : index
    %c3_171 = arith.constant 3 : index
    %c16_172 = arith.constant 16 : index
    %c0_173 = arith.constant 0 : index
    %157 = vector.load %arg3[%c1_170, %c3_171, %c16_172, %c0_173] : memref<2x4x64x4xf32, #tpu.memory_space<vmem>>, vector<1x1x16x4xf32>
    %158 = vector.shape_cast %157 : vector<1x1x16x4xf32> to vector<16x4xf32>
    %159 = vector.shape_cast %156 : vector<16x4xf32> to vector<1x1x16x4xf32>
    tpu.vector_store %arg3[%c1_170, %c3_171, %c16_172, %c0_173], %159 {strides = array<i32>} : memref<2x4x64x4xf32, #tpu.memory_space<vmem>>, vector<1x1x16x4xf32>,
    %cst_174 = arith.constant dense<0.000000e+00> : vector<16x4xf32>
    %160 = tpu.matmul %151, %18, %cst_174 {dimension_numbers = #tpu.dot_dimension_numbers<[1], [0], [0], [1], [0, 0, 1, 1], [], []>, precision = #tpu.contract_precision<fp32>} : vector<16x16xf32>, vector<16x4xf32>, vector<16x4xf32> -> vector<16x4xf32>
    %c1_175 = arith.constant 1 : index
    %c3_176 = arith.constant 3 : index
    %c32_177 = arith.constant 32 : index
    %c0_178 = arith.constant 0 : index
    %161 = vector.load %arg3[%c1_175, %c3_176, %c32_177, %c0_178] : memref<2x4x64x4xf32, #tpu.memory_space<vmem>>, vector<1x1x16x4xf32>
    %162 = vector.shape_cast %161 : vector<1x1x16x4xf32> to vector<16x4xf32>
    %163 = vector.shape_cast %160 : vector<16x4xf32> to vector<1x1x16x4xf32>
    tpu.vector_store %arg3[%c1_175, %c3_176, %c32_177, %c0_178], %163 {strides = array<i32>} : memref<2x4x64x4xf32, #tpu.memory_space<vmem>>, vector<1x1x16x4xf32>,
    %cst_179 = arith.constant dense<0.000000e+00> : vector<16x4xf32>
    %164 = tpu.matmul %151, %23, %cst_179 {dimension_numbers = #tpu.dot_dimension_numbers<[1], [0], [0], [1], [0, 0, 1, 1], [], []>, precision = #tpu.contract_precision<fp32>} : vector<16x16xf32>, vector<16x4xf32>, vector<16x4xf32> -> vector<16x4xf32>
    %c1_180 = arith.constant 1 : index
    %c3_181 = arith.constant 3 : index
    %c48_182 = arith.constant 48 : index
    %c0_183 = arith.constant 0 : index
    %165 = vector.load %arg3[%c1_180, %c3_181, %c48_182, %c0_183] : memref<2x4x64x4xf32, #tpu.memory_space<vmem>>, vector<1x1x16x4xf32>
    %166 = vector.shape_cast %165 : vector<1x1x16x4xf32> to vector<16x4xf32>
    %167 = vector.shape_cast %164 : vector<16x4xf32> to vector<1x1x16x4xf32>
    tpu.vector_store %arg3[%c1_180, %c3_181, %c48_182, %c0_183], %167 {strides = array<i32>} : memref<2x4x64x4xf32, #tpu.memory_space<vmem>>, vector<1x1x16x4xf32>,
    return
  }
  func.func @transform_0(%arg0: i32, %arg1: i32) -> (i32, i32, i32, i32) {
    %c0_i32 = arith.constant 0 : i32
    %c0_i32_0 = arith.constant 0 : i32
    %c0_i32_1 = arith.constant 0 : i32
    return %arg0, %c0_i32, %arg1, %c0_i32_0 : i32, i32, i32, i32
  }
  func.func @transform_1(%arg0: i32, %arg1: i32) -> (i32, i32, i32, i32) {
    %c0_i32 = arith.constant 0 : i32
    %c0_i32_0 = arith.constant 0 : i32
    %c0_i32_1 = arith.constant 0 : i32
    return %arg0, %arg1, %c0_i32, %c0_i32_0 : i32, i32, i32, i32
  }
}

</mosaic_0001>

<bundles_post_ra>
// kernel: tpu_custom_call.1
= control target key start
LH: loop header
LB: loop body
LE: loop exit
PB: predicated region body
PF: predicated region fallthrough
CT: control target
= control target key end

     0   :  { %6 = vsyncpa [#allocation3], 0  ;;  %s9441_s0 = inlined_call_operand.hbm [shape: f32[4,16,4,16], index: 0, kind: input, shape index: {}]   ;;  %s9442_s1 = inlined_call_operand.vmem [shape: f32[4,4,64,4], index: 1, kind: output, shape index: {}]  }
   0x1   :  { %8 = vsyncpa [#allocation3 + $0x1], 0  ;;  %s7474_s6 = smov 0   ;;  %s7476_s7 = smov 0  }
   0x2   :  { %s7478_s8 = smov 0   ;;  %s7480_s9 = smov 0  }
   0x3   :  { %s7482_s10 = smov 0   ;;  %s7484_s11 = smov 0  }
   0x4 LB: > { %s6981_s12 = sadd.s32 4294967295, %s7458_s11   ;;  %s26_s13 = sadd.s32 1, %s7454_s10  ;;  %s7458_s11 = sphi %s7484_s11, %s14_s11   ;;  %s7454_s10 = sphi %s7482_s10, %s9480_s10   ;;  %s7450_s9 = sphi %s7480_s9, %s9479_s9   ;;  %s7446_s8 = sphi %s7478_s8, %s9478_s8   ;;  %s7442_s7 = sphi %s7476_s7, %s9477_s7   ;;  %s7438_s6 = sphi %s7474_s6, %s9476_s6  }
   0x5   : > { %p28_p0 = scmp.ge.s32.totalorder %s26_s13, 2  ;;  %s35_s14 = sadd.s32 1, %s7446_s8 }
   0x6   : > { %p42_p1 = scmp.ne.s32.totalorder %s7446_s8, %s7442_s7  ;;  %p43_p2 = scmp.eq.s32.totalorder %s7458_s11, 0 }
   0x7   : > { %s9482_s13 = smov (%p28_p0, %s26_s13), 0  ;;  %p48_p4 = scmp.ne.s32.totalorder %s7442_s7, %s7438_s6 }
   0x8   : > { %p7510_p3 = por %p43_p2, %p42_p1  ;;  %s30_s16 = ssub.s32 %s7454_s10, %s9482_s13 }
   0x9   : > { %p49_p5 = scmp.eq.s32.totalorder %s6981_s12, 0  ;;  %p33_p6 = scmp.eq.s32.totalorder %s30_s16, 0 }
   0xa   : > { %p7325_p8 = scmp.lt.s32.totalorder %s7458_s11, 2  ;;  %s100_s19 = sand.u32 1, %s7446_s8  }
   0xb   : > { %p7517_p7 = por %p49_p5, %p48_p4  ;;  %s7317_s20 = sshll.u32 %s7454_s10, 7 }
   0xc   : > { %s7523_s18 = scalar_select %p33_p6, %s7446_s8, %s35_s14  }
   0xd   : > { %s6985_s21 = sshll.u32 %s100_s19, 7  ;;  %s111_s24 = scalar_lea.hbm %s9441_s0, %s7317_s20 }
   0xe   : > { %s112_s25 = sshll.u32 %s111_s24, 4  ;;  %s104_s26 = scalar_lea.vmem [#allocation2], %s6985_s21  ;;  %s113_s25 = int_to_ptr.hbm [resolvable:$true] %s112_s25 }
   0xf   : > { %s114_s27 = sshll.u32 %s104_s26, 4  ;;  %p7322_p9 = pnand %p7325_p8, %p7510_p3  ;;  %s115_s27 = int_to_ptr.vmem [resolvable:$true] %s114_s27 }
  0x10   : > { %p6989_p10 = scmp.ge.s32.totalorder %s7458_s11, 1  ;;  %p122_p11 = scmp.lt.s32.totalorder %s7458_s11, 3 }
  0x11   : > { %s101_s28 = scalar_lea.sflag [#allocation3], %s100_s19  ;;  %s7460_s29 = smov 64  }
  0x12   : > { %s7461_s30 = smov 4   ;;  %p123_p12 = pnand %p6989_p10, %p122_p11 }
  0x13   : > { %7324 = dma.hbm_to_vmem [thread:$0]  (!%p7322_p9), %s113_s25, 2048, %s115_s27, %s101_s28, %s7460_s29, %s7460_s29, %s7461_s30  }
  0x14   : > { %126 = sbr.rel (%p123_p12) target bundleno = 947 (0x3b3), region = 24  ;;  %s128_s2 = sand.u32 (!%p123_p12), 1, %s7442_s7  }
  0x15   : > { %s6990_s3 = sshll.u32 (!%p123_p12), %s128_s2, 7  ;;  %s129_s4 = scalar_lea.sflag (!%p123_p12), [#allocation3], %s128_s2 }
  0x16   : > { %s7535_s5 = scalar_lea.vmem (!%p123_p12), [#allocation2], %s6990_s3 }
  0x19   : > { %7433 = dma.done.wait (%p7517_p7), %s129_s4, 2048  }
  0x1a   : > { %7435 = vsyncadd (%p7517_p7), %s129_s4, 4294965248  ;;  %v172_v0 = vlaneseq  ;;  %vm238_vm0 = vcmask 1041409   ;;  %vm241_vm1 = vcmask 1042434   ;;  %vm9444_vm2 = vcmask 1043459   ;;  %v206_v12 = vld [vmem:[%s7535_s5 + $0x4] sm:$0x1] }
  0x1b   : > { %vm247_vm3 = vcmask 1044484   ;;  %vm250_vm6 = vcmask 1045509   ;;  %v7462_v8 = vmov 0.0   ;;  %v7463_v11 = vmov 1.0   ;;  %v207_v15 = vld [vmem:[%s7535_s5 + $0x8] sm:$0x1] }
  0x1c   : > { %v7541_v1 = vshrl.u32 %v172_v0, 7  ;;  %v176_v2 = vand.u32 127, %v172_v0  ;;  %vm253_vm7 = vcmask 1046534   ;;  %vm256_vm8 = vcmask 1047559   ;;  %v208_v16 = vld [vmem:[%s7535_s5 + $0xc] sm:$0x1] }
  0x1d   : > { %v209_v17 = vld [vmem:[%s7535_s5 + $0x10] sm:$0x1]  ;;  %v205_v20 = vld [vmem:[%s7535_s5] sm:$0x1]  ;;  %v210_v21 = vld [vmem:[%s7535_s5 + $0x14] sm:$0x1] }
  0x1e   : > { %v7544_v3 = vadd.s32 8, %v7541_v1  ;;  %v7546_v4 = vmul.u32 4, %v176_v2  ;;  %v211_v24 = vld [vmem:[%s7535_s5 + $0x18] sm:$0x1]  ;;  %v237_v25 = vrot.slane %v206_v12, 7  ;;  %v240_v26 = vrot.slane %v207_v15, 6 }
  0x1f   : > { %v212_v27 = vld [vmem:[%s7535_s5 + $0x1c] sm:$0x1]  ;;  %v243_v28 = vrot.slane %v208_v16, 5  ;;  %v246_v29 = vrot.slane %v209_v17, 4  ;;  %v249_v30 = vrot.slane %v210_v21, 3  ;;  %vm9443_vm11 = vcmask 130048  }
  0x20   : > { %vm7550_vm4 = vcmp.eq.s32.totalorder %v7544_v3, %v7546_v4  ;;  %v184_v6 = vadd.s32 1, %v7546_v4  ;;  %vm7557_vm5 = vcmp.eq.s32.totalorder %v7541_v1, %v7546_v4  ;;  %v239_v31 = vsel %vm238_vm0, %v237_v25, %v205_v20  ;;  %v214_v35 = vld [vmem:[%s7535_s5 + $0x24] sm:$0x1]  ;;  %v213_v38 = vld [vmem:[%s7535_s5 + $0x20] sm:$0x1]  ;;  %s6991_s6 = sshll.u32 %s7450_s9, 1 }
  0x21   : > { %v6995_v9 = vsel %vm7550_vm4, 1.0, %v7462_v8  ;;  %v6994_v10 = vsel %vm7557_vm5, 1.0, %v7462_v8  ;;  %7004 = vmatpush.msk.msra.mxu3 %vm7550_vm4, %v7463_v11  ;;  %7002 = vmatpush.msk.msra.mxu0 %vm7550_vm4, %v7463_v11  ;;  %v252_v32 = vrot.slane %v211_v24, 2  ;;  %v242_v36 = vsel %vm241_vm1, %v240_v26, %v239_v31  ;;  %v215_v39 = vld [vmem:[%s7535_s5 + $0x28] sm:$0x1]  ;;  %p161_p13 = scmp.lt.s32.totalorder %s6991_s6, 3 }
  0x22   : > { %vm7575_vm9 = vcmp.eq.s32.totalorder %v7541_v1, %v184_v6  ;;  %vm7580_vm10 = vcmp.eq.s32.totalorder %v7544_v3, %v184_v6  ;;  %v7601_v22 = vsub.f32 %v6995_v9, %v6995_v9  ;;  %v7603_v23 = vsub.f32 %v6994_v10, %v6994_v10  ;;  %v216_v40 = vld [vmem:[%s7535_s5 + $0x2c] sm:$0x1]  ;;  %v217_v46 = vld [vmem:[%s7535_s5 + $0x30] sm:$0x1]  ;;  %v218_v47 = vld [vmem:[%s7535_s5 + $0x34] sm:$0x1] }
  0x23   : > { %v6996_v18 = vsel %vm7575_vm9, 1.0, %v7462_v8  ;;  %v6997_v19 = vsel %vm7580_vm10, 1.0, %v7462_v8  ;;  %7005 = vmatpush.msk.msra.mxu3 %vm7557_vm5, %v7463_v11  ;;  %7003 = vmatpush.msk.msra.mxu0 %vm7557_vm5, %v7463_v11  ;;  %v245_v42 = vsel %vm9444_vm2, %v243_v28, %v242_v36  ;;  %v255_v43 = vrot.slane %v212_v27, 1  ;;  %v219_v50 = vld [vmem:[%s7535_s5 + $0x38] sm:$0x1]  ;;  %s9484_s6 = smov (!%p161_p13, %s6991_s6), 3 }
  0x24   : > { %363 = vmatpush.msra.mxu2 %v7601_v22  ;;  %v7610_v33 = vand.u32 4294901760, %v7601_v22  ;;  %v7613_v34 = vand.u32 4294901760, %v7603_v23  ;;  %v7617_v37 = vsub.f32 %v6997_v19, %v6997_v19  ;;  %v7622_v41 = vsub.f32 %v6996_v18, %v6996_v18  ;;  %v220_v56 = vld [vmem:[%s7535_s5 + $0x3c] sm:$0x1]  ;;  %s7318_s9 = sshll.u32 %s9484_s6, 8 }
  0x25   : > { %v248_v48 = vsel %vm247_vm3, %v246_v29, %v245_v42  ;;  %v258_v51 = vrot.slane %v214_v35, 7  ;;  %v260_v52 = vrot.slane %v215_v39, 6  ;;  %v262_v57 = vrot.slane %v216_v40, 5  ;;  %s8068_s15 = scalar_lea.vmem %s9442_s1, %s7318_s9 }
  0x26   : > { %366 = vmatpush.msra.mxu2 %v7603_v23  ;;  %v329_v44 = vsub.f32 %v7601_v22, %v7610_v33  ;;  %v335_v45 = vsub.f32 %v7603_v23, %v7613_v34  ;;  %426 = vmatpush.msrb.mxu0 %v7610_v33  ;;  %v7638_v49 = vand.u32 4294901760, %v7617_v37  ;;  %v251_v53 = vsel %vm250_vm6, %v249_v30, %v248_v48 }
  0x27   : > { %v254_v58 = vsel %vm253_vm7, %v252_v32, %v251_v53  ;;  %v259_v60 = vsel %vm238_vm0, %v258_v51, %v213_v38  ;;  %v264_v61 = vrot.slane %v217_v46, 4  ;;  %v266_v0 = vrot.slane %v218_v47, 3 }
  0x28   : > { %7008 = vmatpush.msk.msrb.mxu2 %vm7580_vm10, %v7463_v11  ;;  %v7642_v54 = vand.u32 4294901760, %v329_v44  ;;  %v7644_v55 = vand.u32 4294901760, %v335_v45  ;;  %430 = vmatpush.msrb.mxu0 %v7613_v34  ;;  %v522_v59 = vsub.f32 %v7617_v37, %v7638_v49  ;;  %v257_v62 = vsel %vm256_vm8, %v255_v43, %v254_v58 }
  0x29   : > { %v261_v63 = vsel %vm241_vm1, %v260_v52, %v259_v60  ;;  %v268_v2 = vrot.slane %v219_v50, 2  ;;  %v273_v6 = vsel %vm9443_vm11, %v257_v62, 0  ;;  %v270_v12 = vrot.slane %v220_v56, 1 }
  0x2a   : > { %7009 = vmatpush.msk.msrb.mxu2 %vm7575_vm9, %v7463_v11  ;;  %331 = vmatpush.msra.mxu1 %v7642_v54  ;;  %v7659_v9 = vand.u32 4294901760, %v522_v59  ;;  %v263_v10 = vsel %vm9444_vm2, %v262_v57, %v261_v63  ;;  %v7662_v15 = vand.u32 4294901760, %v273_v6  ;;  %v7667_v17 = vand.u32 4294901760, %v7622_v41 }
  0x2b   : > { %v265_v16 = vsel %vm247_vm3, %v264_v61, %v263_v10  ;;  %v191_v30 = vadd.s32 2, %v7546_v4  ;;  %v198_v47 = vadd.s32 3, %v7546_v4  ;;  %v1046_v10 = vld [vmem:[%s7535_s5 + $0x1] sm:$0x1] }
  0x2c   : > { %337 = vmatpush.msra.mxu1 %v7644_v55  ;;  %524 = vmatpush.msrb.mxu3 %v7659_v9  ;;  %v267_v18 = vsel %vm250_vm6, %v266_v0, %v265_v16  ;;  %v7675_v19 = vsub.f32 %v273_v6, %v7662_v15  ;;  %v528_v21 = vsub.f32 %v7622_v41, %v7667_v17  ;;  %v1047_v0 = vld [vmem:[%s7535_s5 + $0x5] sm:$0x1] }
  0x2d   : > { %339 = vmatmul.f32.vlgmr.msra.gmra.mxu1 %v7662_v15  ;;  %v269_v20 = vsel %vm253_vm7, %v268_v2, %v267_v18  ;;  %vm7716_vm12 = vcmp.eq.s32.totalorder %v7544_v3, %v191_v30  ;;  %vm7747_vm13 = vcmp.eq.s32.totalorder %v7541_v1, %v191_v30  ;;  %vm7766_vm14 = vcmp.eq.s32.totalorder %v7544_v3, %v198_v47  ;;  %v1048_v2 = vld [vmem:[%s7535_s5 + $0x9] sm:$0x1] }
  0x2e   : > { %7006 = vmatpush.msk.msrb.mxu1 %vm7550_vm4, %v7463_v11  ;;  %v271_v24 = vsel %vm256_vm8, %v270_v12, %v269_v20  ;;  %369 = vmatmul.f32.vlgmr.msra.gmra.mxu2 %v7675_v19  ;;  %v7687_v25 = vand.u32 4294901760, %v7675_v19  ;;  %v7690_v27 = vand.u32 4294901760, %v528_v21  ;;  %v6999_v38 = vsel %vm7716_vm12, 1.0, %v7462_v8  ;;  %v1049_v12 = vld [vmem:[%s7535_s5 + $0xd] sm:$0x1] }
  0x2f   : > { %v275_v26 = vsel %vm9443_vm11, %v271_v24, 0  ;;  %619 = vmatpush.msra.mxu2 %v7638_v49  ;;  %v7728_v39 = vsub.f32 %v6999_v38, %v6999_v38  ;;  %v6998_v46 = vsel %vm7747_vm13, 1.0, %v7462_v8  ;;  %v7001_v56 = vsel %vm7766_vm14, 1.0, %v7462_v8  ;;  %v1055_v20 = vld [vmem:[%s7535_s5 + $0x25] sm:$0x1] }
  0x30   : > { %7007 = vmatpush.msk.msrb.mxu1 %vm7557_vm5, %v7463_v11  ;;  %v7695_v28 = vand.u32 4294901760, %v275_v26  ;;  %399 = vmatmul.f32.vlgmr.msra.gmra.mxu3 %v7687_v25  ;;  %v298_v29 = vsub.f32 %v7675_v19, %v7687_v25  ;;  %v7757_v50 = vsub.f32 %v6998_v46, %v6998_v46  ;;  %vm7786_vm15 = vcmp.eq.s32.totalorder %v7541_v1, %v198_v47  ;;  %v1050_v21 = vld [vmem:[%s7535_s5 + $0x11] sm:$0x1]  ;;  %v1051_v38 = vld [vmem:[%s7535_s5 + $0x15] sm:$0x1] }
  0x31   : > { %530 = vmatpush.msrb.mxu3 %v7690_v27  ;;  %623 = vmatpush.msra.mxu2 %v7667_v17  ;;  %v7738_v42 = vand.u32 4294901760, %v7728_v39  ;;  %v7795_v57 = vsub.f32 %v7001_v56, %v7001_v56  ;;  %v7000_v1 = vsel %vm7786_vm15, 1.0, %v7462_v8  ;;  %v1078_v6 = vrot.slane %v1047_v0, 7  ;;  %v1057_v47 = vld [vmem:[%s7535_s5 + $0x2d] sm:$0x1] }
  0x32   : > { %7010 = vmatpush.msk.msra.mxu1 %vm7580_vm10, %v7463_v11  ;;  %v7706_v31 = vsub.f32 %v275_v26, %v7695_v28  ;;  %v7710_v32 = vand.u32 4294901760, %v298_v29  ;;  %v7762_v51 = vand.u32 4294901760, %v7757_v50  ;;  %v7813_v60 = vsub.f32 %v7000_v1, %v7000_v1  ;;  %v1056_v29 = vld [vmem:[%s7535_s5 + $0x29] sm:$0x1]  ;;  %v1052_v56 = vld [vmem:[%s7535_s5 + $0x19] sm:$0x1] }
  0x33   : > { %7012 = vmatpush.msk.msra.mxu3 %vm7580_vm10, %v7463_v11  ;;  %v714_v44 = vsub.f32 %v7728_v39, %v7738_v42  ;;  %v7805_v58 = vand.u32 4294901760, %v7795_v57  ;;  %v1080_v16 = vrot.slane %v1048_v2, 6  ;;  %v1079_v18 = vsel %vm238_vm0, %v1078_v6, %v1046_v10  ;;  %v1053_v2 = vld [vmem:[%s7535_s5 + $0x1d] sm:$0x1] }
  0x34   : > { %7011 = vmatpush.msk.msra.mxu1 %vm7575_vm9, %v7463_v11  ;;  %v7721_v36 = vand.u32 4294901760, %v7706_v31  ;;  %300 = vmatmul.f32.vlgmr.msra.gmra.mxu0 %v7710_v32  ;;  %v720_v4 = vsub.f32 %v7757_v50, %v7762_v51  ;;  %v7816_v61 = vand.u32 4294901760, %v7813_v60  ;;  %v1082_v24 = vrot.slane %v1049_v12, 5 }
  0x35   : > { %343 = vmatmul.f32.gmra.mxu1 %v7695_v28  ;;  %556 = vmatpush.msra.mxu0 %v7617_v37  ;;  %v7755_v48 = vand.u32 4294901760, %v714_v44  ;;  %v906_v59 = vsub.f32 %v7795_v57, %v7805_v58  ;;  %v1081_v26 = vsel %vm241_vm1, %v1080_v16, %v1079_v18  ;;  %v1092_v30 = vrot.slane %v1055_v20, 7  ;;  %v1054_v44 = vld [vmem:[%s7535_s5 + $0x21] sm:$0x1]  ;;  %v1059_v16 = vld [vmem:[%s7535_s5 + $0x35] sm:$0x1] }
  0x36   : > { %v306_v40 = vsub.f32 %v7706_v31, %v7721_v36  ;;  %7013 = vmatpush.msk.msra.mxu3 %vm7575_vm9, %v7463_v11  ;;  %374 = vmatmul.f32.gmra.mxu2 %v7706_v31  ;;  %v7775_v53 = vand.u32 4294901760, %v720_v4  ;;  %v912_v62 = vsub.f32 %v7813_v60, %v7816_v61  ;;  %v1083_v46 = vsel %vm9444_vm2, %v1082_v24, %v1081_v26  ;;  %v1060_v26 = vld [vmem:[%s7535_s5 + $0x39] sm:$0x1] }
  0x37   : > { %559 = vmatpush.msra.mxu0 %v7622_v41  ;;  %v7820_v8 = vand.u32 4294901760, %v906_v59  ;;  %v1094_v4 = vrot.slane %v1056_v29, 6  ;;  %v1086_v1 = vrot.slane %v1051_v38, 3  ;;  %v1093_v59 = vsel %vm238_vm0, %v1092_v30, %v1054_v44 }
  0x38   : > { %405 = vmatmul.f32.gmra.mxu3 %v7721_v36  ;;  %v7742_v43 = vand.u32 4294901760, %v306_v40  ;;  %v7831_v63 = vand.u32 4294901760, %v912_v62  ;;  %v1084_v40 = vrot.slane %v1050_v21, 4  ;;  %v1058_v62 = vld [vmem:[%s7535_s5 + $0x31] sm:$0x1]  ;;  %v1096_v0 = vrot.slane %v1057_v47, 5 }
  0x39   : > { %v1088_v6 = vrot.slane %v1052_v56, 2  ;;  %v1095_v10 = vsel %vm241_vm1, %v1094_v4, %v1093_v59  ;;  %v1098_v18 = vrot.slane %v1058_v62, 4  ;;  %v1090_v20 = vrot.slane %v1053_v2, 1 }
  0x3a   : > { %v1097_v21 = vsel %vm9444_vm2, %v1096_v0, %v1095_v10  ;;  %v1100_v29 = vrot.slane %v1059_v16, 3  ;;  %v1102_v44 = vrot.slane %v1060_v26, 2 }
  0x3b   : > { %v1099_v30 = vsel %vm247_vm3, %v1098_v18, %v1097_v21 }
  0x3c   : > { %308 = vmatmul.f32.gmra.mxu0 %v7742_v43 }
  0x3d   : > { %459 = vmatmul.f32.vlgmr.msrb.gmra.mxu1 %v7662_v15 }
  0x3e   : > { %716 = vmatpush.msrb.mxu1 %v7755_v48  ;;  %493 = vmatmul.f32.vlgmr.msrb.gmra.mxu2 %v7710_v32 }
  0x3f   : > { %748 = vmatpush.msrb.mxu2 %v7728_v39 }
  0x40   : > { %532 = vmatmul.f32.vlgmr.msrb.gmra.mxu3 %v7662_v15  ;;  %722 = vmatpush.msrb.mxu1 %v7775_v53 }
  0x41   : > { %7016 = vmatpush.msk.msrb.mxu3 %vm7716_vm12, %v7463_v11  ;;  %751 = vmatpush.msrb.mxu2 %v7757_v50 }
  0x43   : > { %7017 = vmatpush.msk.msrb.mxu3 %vm7747_vm13, %v7463_v11 }
  0x44   : > { %432 = vmatmul.f32.vlgmr.msrb.gmra.mxu0 %v7662_v15 }
  0x45   : > { %463 = vmatmul.f32.gmra.mxu1 %v7695_v28  ;;  %7014 = vmatpush.msk.msrb.mxu0 %vm7716_vm12, %v7463_v11 }
  0x46   : > { %501 = vmatmul.f32.gmra.mxu2 %v7742_v43 }
  0x47   : > { %7015 = vmatpush.msk.msrb.mxu0 %vm7747_vm13, %v7463_v11 }
  0x48   : > { %536 = vmatmul.f32.gmra.mxu3 %v7695_v28 }
  0x4c   : > { %436 = vmatmul.f32.gmra.mxu0 %v7695_v28 }
  0x4d   : > { %592 = vmatmul.f32.vlgmr.msra.gmra.mxu1 %v7687_v25 }
  0x4e   : > { %7018 = vmatpush.msk.msra.mxu1 %vm7716_vm12, %v7463_v11  ;;  %625 = vmatmul.f32.vlgmr.msra.gmra.mxu2 %v7662_v15 }
  0x4f   : > { %7020 = vmatpush.msk.msra.mxu2 %vm7766_vm14, %v7463_v11 }
  0x50   : > { %7019 = vmatpush.msk.msra.mxu1 %vm7747_vm13, %v7463_v11  ;;  %652 = vmatmul.f32.vlgmr.msra.gmra.mxu3 %v7662_v15 }
  0x51   : > { %908 = vmatpush.msra.mxu3 %v7820_v8  ;;  %7021 = vmatpush.msk.msra.mxu2 %vm7786_vm15, %v7463_v11 }
  0x53   : > { %914 = vmatpush.msra.mxu3 %v7831_v63 }
  0x54   : > { %562 = vmatmul.f32.vlgmr.msra.gmra.mxu0 %v7675_v19 }
  0x55   : > { %598 = vmatmul.f32.gmra.mxu1 %v7721_v36  ;;  %811 = vmatpush.msra.mxu0 %v7738_v42 }
  0x56   : > { %629 = vmatmul.f32.gmra.mxu2 %v7695_v28 }
  0x57   : > { %815 = vmatpush.msra.mxu0 %v7762_v51 }
  0x58   : > { %656 = vmatmul.f32.gmra.mxu3 %v7695_v28 }
  0x5c   : > { %567 = vmatmul.f32.gmra.mxu0 %v7706_v31 }
  0x5d   : > { %724 = vmatmul.f32.vlgmr.msrb.gmra.mxu1 %v7662_v15 }
  0x5e   : > { %7022 = vmatpush.msk.msrb.mxu1 %vm7766_vm14, %v7463_v11  ;;  %754 = vmatmul.f32.vlgmr.msrb.gmra.mxu2 %v7675_v19 }
  0x5f   : > { %1003 = vmatpush.msrb.mxu2 %v7805_v58 }
  0x60   : > { %7023 = vmatpush.msk.msrb.mxu1 %vm7786_vm15, %v7463_v11  ;;  %784 = vmatmul.f32.vlgmr.msrb.gmra.mxu3 %v7687_v25 }
  0x61   : > { %7024 = vmatpush.msk.msrb.mxu3 %vm7766_vm14, %v7463_v11  ;;  %1007 = vmatpush.msrb.mxu2 %v7816_v61 }
  0x63   : > { %7025 = vmatpush.msk.msrb.mxu3 %vm7786_vm15, %v7463_v11 }
  0x64   : > { %685 = vmatmul.f32.vlgmr.msrb.gmra.mxu0 %v7710_v32 }
  0x65   : > { %728 = vmatmul.f32.gmra.mxu1 %v7695_v28  ;;  %940 = vmatpush.msrb.mxu0 %v7795_v57 }
  0x66   : > { %759 = vmatmul.f32.gmra.mxu2 %v7706_v31 }
  0x67   : > { %943 = vmatpush.msrb.mxu0 %v7813_v60 }
  0x68   : > { %790 = vmatmul.f32.gmra.mxu3 %v7721_v36 }
  0x6c   : > { %693 = vmatmul.f32.gmra.mxu0 %v7742_v43 }
  0x6d   : > { %844 = vmatmul.f32.vlgmr.msra.gmra.mxu1 %v7662_v15 }
  0x6e   : > { %1164 = vmatpush.msra.mxu1 %v7642_v54  ;;  %877 = vmatmul.f32.vlgmr.msra.gmra.mxu2 %v7710_v32  ;;  %v1085_v32 = vsel %vm247_vm3, %v1084_v40, %v1083_v46  ;;  %v1061_v40 = vld [vmem:[%s7535_s5 + $0x3d] sm:$0x1] }
  0x6f   : > { %1196 = vmatpush.msra.mxu2 %v7601_v22  ;;  %v1087_v12 = vsel %vm250_vm6, %v1086_v1, %v1085_v32  ;;  %v1104_v47 = vrot.slane %v1061_v40, 1 }
  0x70   : > { %1170 = vmatpush.msra.mxu1 %v7644_v55  ;;  %916 = vmatmul.f32.vlgmr.msra.gmra.mxu3 %v7662_v15  ;;  %v1089_v24 = vsel %vm253_vm7, %v1088_v6, %v1087_v12 }
  0x71   : > { %7028 = vmatpush.msk.msra.mxu3 %vm7550_vm4, %v7463_v11  ;;  %1199 = vmatpush.msra.mxu2 %v7603_v23  ;;  %v1091_v38 = vsel %vm256_vm8, %v1090_v20, %v1089_v24 }
  0x72   : > { %v1106_v46 = vsel %vm9443_vm11, %v1091_v38, 0 }
  0x73   : > { %7029 = vmatpush.msk.msra.mxu3 %vm7557_vm5, %v7463_v11 }
  0x74   : > { %817 = vmatmul.f32.vlgmr.msra.gmra.mxu0 %v7662_v15 }
  0x75   : > { %848 = vmatmul.f32.gmra.mxu1 %v7695_v28  ;;  %7026 = vmatpush.msk.msra.mxu0 %vm7550_vm4, %v7463_v11 }
  0x76   : > { %885 = vmatmul.f32.gmra.mxu2 %v7742_v43  ;;  %v1101_v43 = vsel %vm250_vm6, %v1100_v29, %v1099_v30 }
  0x77   : > { %7027 = vmatpush.msk.msra.mxu0 %vm7557_vm5, %v7463_v11  ;;  %v1103_v4 = vsel %vm253_vm7, %v1102_v44, %v1101_v43  ;;  %v1880_v43 = vld [vmem:[%s7535_s5 + $0x6] sm:$0x1] }
  0x78   : > { %920 = vmatmul.f32.gmra.mxu3 %v7695_v28  ;;  %v1105_v56 = vsel %vm256_vm8, %v1104_v47, %v1103_v4 }
  0x7c   : > { %821 = vmatmul.f32.gmra.mxu0 %v7695_v28 }
  0x7d   : > { %976 = vmatmul.f32.vlgmr.msrb.gmra.mxu1 %v7687_v25  ;;  %v7939_v25 = vand.u32 4294901760, %v1106_v46 }
  0x7e   : > { %7030 = vmatpush.msk.msrb.mxu1 %vm7550_vm4, %v7463_v11  ;;  %1009 = vmatmul.f32.vlgmr.msrb.gmra.mxu2 %v7662_v15 }
  0x7f   : > { %7034 = vmatpush.msk.msrb.mxu2 %vm7580_vm10, %v7463_v11  ;;  %v7950_v1 = vsub.f32 %v1106_v46, %v7939_v25 }
  0x80   : > { %7031 = vmatpush.msk.msrb.mxu1 %vm7557_vm5, %v7463_v11  ;;  %1036 = vmatmul.f32.vlgmr.msrb.gmra.mxu3 %v7662_v15  ;;  %v1108_v15 = vsel %vm9443_vm11, %v1105_v56, 0  ;;  %vm467_vm11 = vcmask 31744  }
  0x81   : > { %1357 = vmatpush.msrb.mxu3 %v7659_v9  ;;  %7035 = vmatpush.msk.msrb.mxu2 %vm7575_vm9, %v7463_v11  ;;  %v7958_v59 = vand.u32 4294901760, %v7950_v1  ;;  %v7960_v32 = vand.u32 4294901760, %v1108_v15 }
  0x83   : > { %1363 = vmatpush.msrb.mxu3 %v7690_v27 }
  0x84   : > { %946 = vmatmul.f32.vlgmr.msrb.gmra.mxu0 %v7675_v19  ;;  %v1131_v19 = vsub.f32 %v7950_v1, %v7958_v59 }
  0x85   : > { %982 = vmatmul.f32.gmra.mxu1 %v7721_v36  ;;  %1259 = vmatpush.msrb.mxu0 %v7610_v33  ;;  %v7967_v36 = vsub.f32 %v1108_v15, %v7960_v32 }
  0x86   : > { %1013 = vmatmul.f32.gmra.mxu2 %v7695_v28 }
  0x87   : > { %1263 = vmatpush.msrb.mxu0 %v7613_v34 }
  0x88   : > { %1040 = vmatmul.f32.gmra.mxu3 %v7695_v28  ;;  %v7978_v28 = vand.u32 4294901760, %v1131_v19  ;;  %v1881_v19 = vld [vmem:[%s7535_s5 + $0xa] sm:$0x1] }
  0x8c   : > { %951 = vmatmul.f32.gmra.mxu0 %v7706_v31  ;;  %v7981_v31 = vand.u32 4294901760, %v7967_v36 }
  0x8d   : > { %1172 = vmatmul.f32.vlgmr.msra.gmra.mxu1 %v7939_v25 }
  0x8e   : > { %7036 = vmatpush.msk.msra.mxu1 %vm7580_vm10, %v7463_v11  ;;  %1202 = vmatmul.f32.vlgmr.msra.gmra.mxu2 %v7950_v1  ;;  %v1139_v62 = vsub.f32 %v7967_v36, %v7981_v31 }
  0x8f   : > { %1452 = vmatpush.msra.mxu2 %v7638_v49 }
  0x90   : > { %7037 = vmatpush.msk.msra.mxu1 %vm7575_vm9, %v7463_v11  ;;  %1232 = vmatmul.f32.vlgmr.msra.gmra.mxu3 %v7958_v59  ;;  %v7998_v0 = vand.u32 4294901760, %v1139_v62  ;;  %v1911_v62 = vrot.slane %v1880_v43, 7 }
  0x91   : > { %7038 = vmatpush.msk.msra.mxu3 %vm7580_vm10, %v7463_v11  ;;  %1456 = vmatpush.msra.mxu2 %v7667_v17 }
  0x93   : > { %7039 = vmatpush.msk.msra.mxu3 %vm7575_vm9, %v7463_v11 }
  0x94   : > { %1133 = vmatmul.f32.vlgmr.msra.gmra.mxu0 %v7978_v28 }
  0x95   : > { %1176 = vmatmul.f32.gmra.mxu1 %v7960_v32  ;;  %1389 = vmatpush.msra.mxu0 %v7617_v37 }
  0x96   : > { %1207 = vmatmul.f32.gmra.mxu2 %v7967_v36 }
  0x97   : > { %1392 = vmatpush.msra.mxu0 %v7622_v41 }
  0x98   : > { %1238 = vmatmul.f32.gmra.mxu3 %v7981_v31 }
  0x9c   : > { %1141 = vmatmul.f32.gmra.mxu0 %v7998_v0 }
  0x9d   : > { %1292 = vmatmul.f32.vlgmr.msrb.gmra.mxu1 %v7939_v25 }
  0x9e   : > { %1549 = vmatpush.msrb.mxu1 %v7755_v48  ;;  %1326 = vmatmul.f32.vlgmr.msrb.gmra.mxu2 %v7978_v28 }
  0x9f   : > { %1581 = vmatpush.msrb.mxu2 %v7728_v39 }
  0xa0   : > { %1555 = vmatpush.msrb.mxu1 %v7775_v53  ;;  %1365 = vmatmul.f32.vlgmr.msrb.gmra.mxu3 %v7939_v25 }
  0xa1   : > { %7044 = vmatpush.msk.msrb.mxu3 %vm7716_vm12, %v7463_v11  ;;  %1584 = vmatpush.msrb.mxu2 %v7757_v50 }
  0xa3   : > { %7045 = vmatpush.msk.msrb.mxu3 %vm7747_vm13, %v7463_v11 }
  0xa4   : > { %1265 = vmatmul.f32.vlgmr.msrb.gmra.mxu0 %v7939_v25 }
  0xa5   : > { %1296 = vmatmul.f32.gmra.mxu1 %v7960_v32  ;;  %7042 = vmatpush.msk.msrb.mxu0 %vm7716_vm12, %v7463_v11 }
  0xa6   : > { %1334 = vmatmul.f32.gmra.mxu2 %v7998_v0 }
  0xa7   : > { %7043 = vmatpush.msk.msrb.mxu0 %vm7747_vm13, %v7463_v11 }
  0xa8   : > { %1369 = vmatmul.f32.gmra.mxu3 %v7960_v32 }
  0xaa   : > { %v340_v2 = vpop.f32.mrf.mxu1 }
  0xac   : > { %1269 = vmatmul.f32.gmra.mxu0 %v7960_v32 }
  0xad   : > { %1425 = vmatmul.f32.vlgmr.msra.gmra.mxu1 %v7958_v59 }
  0xae   : > { %7046 = vmatpush.msk.msra.mxu1 %vm7716_vm12, %v7463_v11  ;;  %1458 = vmatmul.f32.vlgmr.msra.gmra.mxu2 %v7939_v25 }
  0xaf   : > { %7050 = vmatpush.msk.msra.mxu2 %vm7766_vm14, %v7463_v11 }
  0xb0   : > { %7047 = vmatpush.msk.msra.mxu1 %vm7747_vm13, %v7463_v11  ;;  %1485 = vmatmul.f32.vlgmr.msra.gmra.mxu3 %v7939_v25 }
  0xb1   : > { %v301_v6 = vpop.f32.mrf.mxu0  ;;  %v370_v10 = vpop.f32.mrf.mxu2  ;;  %1741 = vmatpush.msra.mxu3 %v7820_v8  ;;  %7051 = vmatpush.msk.msra.mxu2 %vm7786_vm15, %v7463_v11 }
  0xb2   : > { %v344_v12 = vpop.f32.mrf.mxu1  ;;  %v341_v18 = vadd.f32 %v340_v2, %v301_v6  ;;  %v1879_v2 = vld [vmem:[%s7535_s5 + $0x2] sm:$0x1]  ;;  %v1882_v6 = vld [vmem:[%s7535_s5 + $0xe] sm:$0x1] }
  0xb3   : > { %v400_v16 = vpop.f32.mrf.mxu3  ;;  %1747 = vmatpush.msra.mxu3 %v7831_v63 }
  0xb4   : > { %1395 = vmatmul.f32.vlgmr.msra.gmra.mxu0 %v7950_v1  ;;  %v371_v29 = vadd.f32 %v370_v10, %v341_v18  ;;  %v1913_v10 = vrot.slane %v1881_v19, 6 }
  0xb5   : > { %1431 = vmatmul.f32.gmra.mxu1 %v7981_v31  ;;  %1644 = vmatpush.msra.mxu0 %v7738_v42 }
  0xb6   : > { %1462 = vmatmul.f32.gmra.mxu2 %v7960_v32  ;;  %v401_v30 = vadd.f32 %v400_v16, %v371_v29  ;;  %v1912_v16 = vsel %vm238_vm0, %v1911_v62, %v1879_v2  ;;  %v1887_v62 = vld [vmem:[%s7535_s5 + $0x22] sm:$0x1] }
  0xb7   : > { %1648 = vmatpush.msra.mxu0 %v7762_v51  ;;  %v1914_v43 = vsel %vm241_vm1, %v1913_v10, %v1912_v16 }
  0xb8   : > { %1489 = vmatmul.f32.gmra.mxu3 %v7960_v32 }
  0xb9   : > { %v309_v20 = vpop.f32.mrf.mxu0  ;;  %v375_v21 = vpop.f32.mrf.mxu2 }
  0xba   : > { %v460_v24 = vpop.f32.mrf.mxu1  ;;  %v345_v38 = vadd.f32 %v344_v12, %v309_v20 }
  0xbb   : > { %v406_v26 = vpop.f32.mrf.mxu3 }
  0xbc   : > { %1400 = vmatmul.f32.gmra.mxu0 %v7967_v36  ;;  %v376_v56 = vadd.f32 %v375_v21, %v345_v38  ;;  %v1888_v21 = vld [vmem:[%s7535_s5 + $0x26] sm:$0x1]  ;;  %v1915_v38 = vrot.slane %v1882_v6, 5 }
  0xbd   : > { %1557 = vmatmul.f32.vlgmr.msrb.gmra.mxu1 %v7939_v25 }
  0xbe   : > { %7052 = vmatpush.msk.msrb.mxu1 %vm7766_vm14, %v7463_v11  ;;  %1587 = vmatmul.f32.vlgmr.msrb.gmra.mxu2 %v7950_v1  ;;  %v407_v12 = vadd.f32 %v406_v26, %v376_v56  ;;  %v1889_v26 = vld [vmem:[%s7535_s5 + $0x2a] sm:$0x1]  ;;  %v1925_v56 = vrot.slane %v1888_v21, 7  ;;  %v1916_v2 = vsel %vm9444_vm2, %v1915_v38, %v1914_v43 }
  0xbf   : > { %1836 = vmatpush.msrb.mxu2 %v7805_v58  ;;  %v1927_v6 = vrot.slane %v1889_v26, 6 }
  0xc0   : > { %7053 = vmatpush.msk.msrb.mxu1 %vm7786_vm15, %v7463_v11  ;;  %1617 = vmatmul.f32.vlgmr.msrb.gmra.mxu3 %v7958_v59 }
  0xc1   : > { %v433_v40 = vpop.f32.mrf.mxu0  ;;  %v494_v44 = vpop.f32.mrf.mxu2  ;;  %7054 = vmatpush.msk.msrb.mxu3 %vm7766_vm14, %v7463_v11  ;;  %1840 = vmatpush.msrb.mxu2 %v7816_v61 }
  0xc2   : > { %v434_v46 = vadd.f32 %v433_v40, %v401_v30  ;;  %v464_v47 = vpop.f32.mrf.mxu1  ;;  %v1883_v30 = vld [vmem:[%s7535_s5 + $0x12] sm:$0x1] }
  0xc3   : > { %v533_v4 = vpop.f32.mrf.mxu3  ;;  %7055 = vmatpush.msk.msrb.mxu3 %vm7786_vm15, %v7463_v11  ;;  %v1917_v19 = vrot.slane %v1883_v30, 4 }
  0xc4   : > { %v461_v15 = vadd.f32 %v460_v24, %v434_v46  ;;  %1518 = vmatmul.f32.vlgmr.msrb.gmra.mxu0 %v7978_v28  ;;  %v534_v10 = vadd.f32 %v533_v4, %v494_v44  ;;  %v1891_v4 = vld [vmem:[%s7535_s5 + $0x32] sm:$0x1] }
  0xc5   : > { %1561 = vmatmul.f32.gmra.mxu1 %v7960_v32  ;;  %1773 = vmatpush.msrb.mxu0 %v7795_v57 }
  0xc6   : > { %468 = vst.msk [vmem:[%s8068_s15] sm:$0xff] %vm467_vm11, %v461_v15  ;;  %1592 = vmatmul.f32.gmra.mxu2 %v7967_v36  ;;  %v1884_v15 = vld [vmem:[%s7535_s5 + $0x16] sm:$0x1] }
  0xc7   : > { %1776 = vmatpush.msrb.mxu0 %v7813_v60  ;;  %v1919_v16 = vrot.slane %v1884_v15, 3 }
  0xc8   : > { %1623 = vmatmul.f32.gmra.mxu3 %v7981_v31 }
  0xc9   : > { %v437_v18 = vpop.f32.mrf.mxu0  ;;  %v502_v20 = vpop.f32.mrf.mxu2 }
  0xca   : > { %v438_v24 = vadd.f32 %v437_v18, %v407_v12  ;;  %v593_v29 = vpop.f32.mrf.mxu1  ;;  %v1885_v12 = vld [vmem:[%s7535_s5 + $0x1a] sm:$0x1]  ;;  %v1926_v18 = vsel %vm238_vm0, %v1925_v56, %v1887_v62  ;;  %v1892_v62 = vld [vmem:[%s7535_s5 + $0x36] sm:$0x1] }
  0xcb   : > { %v537_v40 = vpop.f32.mrf.mxu3  ;;  %v1921_v26 = vrot.slane %v1885_v12, 2  ;;  %v1928_v56 = vsel %vm241_vm1, %v1927_v6, %v1926_v18  ;;  %v1893_v18 = vld [vmem:[%s7535_s5 + $0x3a] sm:$0x1] }
  0xcc   : > { %v465_v46 = vadd.f32 %v464_v47, %v438_v24  ;;  %1526 = vmatmul.f32.gmra.mxu0 %v7998_v0  ;;  %v1890_v47 = vld [vmem:[%s7535_s5 + $0x2e] sm:$0x1]  ;;  %v538_v12 = vadd.f32 %v537_v40, %v502_v20 }
  0xcd   : > { %1677 = vmatmul.f32.vlgmr.msra.gmra.mxu1 %v7939_v25  ;;  %v1929_v38 = vrot.slane %v1890_v47, 5 }
  0xce   : > { %1997 = vmatpush.msra.mxu1 %v7642_v54  ;;  %469 = vst.msk [vmem:[%s8068_s15 + $0x8] sm:$0xff] %vm467_vm11, %v465_v46  ;;  %1710 = vmatmul.f32.vlgmr.msra.gmra.mxu2 %v7978_v28  ;;  %v1918_v28 = vsel %vm247_vm3, %v1917_v19, %v1916_v2  ;;  %v1886_v46 = vld [vmem:[%s7535_s5 + $0x1e] sm:$0x1]  ;;  %v1931_v2 = vrot.slane %v1891_v4, 4 }
  0xcf   : > { %2029 = vmatpush.msra.mxu2 %v7601_v22  ;;  %v1920_v19 = vsel %vm250_vm6, %v1919_v16, %v1918_v28 }
  0xd0   : > { %2003 = vmatpush.msra.mxu1 %v7644_v55  ;;  %1749 = vmatmul.f32.vlgmr.msra.gmra.mxu3 %v7939_v25  ;;  %v1922_v6 = vsel %vm253_vm7, %v1921_v26, %v1920_v19 }
  0xd1   : > { %v563_v21 = vpop.f32.mrf.mxu0  ;;  %v626_v24 = vpop.f32.mrf.mxu2  ;;  %7060 = vmatpush.msk.msra.mxu3 %vm7550_vm4, %v7463_v11  ;;  %2032 = vmatpush.msra.mxu2 %v7603_v23 }
  0xd2   : > { %v564_v30 = vadd.f32 %v563_v21, %v534_v10  ;;  %v599_v44 = vpop.f32.mrf.mxu1  ;;  %v1923_v10 = vrot.slane %v1886_v46, 1  ;;  %v1933_v21 = vrot.slane %v1892_v62, 3 }
  0xd3   : > { %v653_v43 = vpop.f32.mrf.mxu3  ;;  %7061 = vmatpush.msk.msra.mxu3 %vm7557_vm5, %v7463_v11 }
  0xd4   : > { %v594_v15 = vadd.f32 %v593_v29, %v564_v30  ;;  %1650 = vmatmul.f32.vlgmr.msra.gmra.mxu0 %v7939_v25  ;;  %v1930_v29 = vsel %vm9444_vm2, %v1929_v38, %v1928_v56  ;;  %v1924_v38 = vsel %vm256_vm8, %v1923_v10, %v1922_v6  ;;  %v1894_v56 = vld [vmem:[%s7535_s5 + $0x3e] sm:$0x1]  ;;  %vm9463_vm2 = vcmask 130048  }
  0xd5   : > { %1681 = vmatmul.f32.gmra.mxu1 %v7960_v32  ;;  %7058 = vmatpush.msk.msra.mxu0 %vm7550_vm4, %v7463_v11  ;;  %v1939_v40 = vsel %vm9463_vm2, %v1924_v38, 0  ;;  %v1937_v19 = vrot.slane %v1894_v56, 1 }
  0xd6   : > { %v627_v47 = vadd.f32 %v626_v24, %v594_v15  ;;  %1718 = vmatmul.f32.gmra.mxu2 %v7998_v0  ;;  %v1932_v0 = vsel %vm247_vm3, %v1931_v2, %v1930_v29  ;;  %v1935_v15 = vrot.slane %v1893_v18, 2  ;;  %v8151_v62 = vand.u32 4294901760, %v1939_v40 }
  0xd7   : > { %7059 = vmatpush.msk.msra.mxu0 %vm7557_vm5, %v7463_v11  ;;  %v1934_v20 = vsel %vm250_vm6, %v1933_v21, %v1932_v0 }
  0xd8   : > { %v654_v16 = vadd.f32 %v653_v43, %v627_v47  ;;  %1753 = vmatmul.f32.gmra.mxu3 %v7960_v32 }
  0xd9   : > { %v568_v28 = vpop.f32.mrf.mxu0  ;;  %v630_v24 = vpop.f32.mrf.mxu2 }
  0xda   : > { %660 = vst.msk [vmem:[%s8068_s15 + $0x10] sm:$0xff] %vm467_vm11, %v654_v16  ;;  %v569_v30 = vadd.f32 %v568_v28, %v538_v12  ;;  %v725_v4 = vpop.f32.mrf.mxu1 }
  0xdb   : > { %v657_v46 = vpop.f32.mrf.mxu3 }
  0xdc   : > { %v600_v26 = vadd.f32 %v599_v44, %v569_v30  ;;  %1654 = vmatmul.f32.gmra.mxu0 %v7960_v32  ;;  %v1936_v44 = vsel %vm253_vm7, %v1935_v15, %v1934_v20 }
  0xdd   : > { %1809 = vmatmul.f32.vlgmr.msrb.gmra.mxu1 %v7958_v59  ;;  %v1938_v29 = vsel %vm256_vm8, %v1937_v19, %v1936_v44 }
  0xde   : > { %7062 = vmatpush.msk.msrb.mxu1 %vm7550_vm4, %v7463_v11  ;;  %v631_v43 = vadd.f32 %v630_v24, %v600_v26  ;;  %1842 = vmatmul.f32.vlgmr.msrb.gmra.mxu2 %v7939_v25  ;;  %v1941_v12 = vsel %vm9463_vm2, %v1938_v29, 0  ;;  %vm9464_vm2 = vcmask 1043459  }
  0xdf   : > { %7066 = vmatpush.msk.msrb.mxu2 %vm7580_vm10, %v7463_v11 }
  0xe0   : > { %7063 = vmatpush.msk.msrb.mxu1 %vm7557_vm5, %v7463_v11  ;;  %v658_v59 = vadd.f32 %v657_v46, %v631_v43  ;;  %1869 = vmatmul.f32.vlgmr.msrb.gmra.mxu3 %v7939_v25  ;;  %v8164_v25 = vsub.f32 %v1939_v40, %v8151_v62 }
  0xe1   : > { %v686_v2 = vpop.f32.mrf.mxu0  ;;  %v755_v47 = vpop.f32.mrf.mxu2  ;;  %2190 = vmatpush.msrb.mxu3 %v7659_v9  ;;  %7067 = vmatpush.msk.msrb.mxu2 %vm7575_vm9, %v7463_v11 }
  0xe2   : > { %661 = vst.msk [vmem:[%s8068_s15 + $0x18] sm:$0xff] %vm467_vm11, %v658_v59  ;;  %v729_v10 = vpop.f32.mrf.mxu1  ;;  %v726_v16 = vadd.f32 %v725_v4, %v686_v2  ;;  %v8172_v18 = vand.u32 4294901760, %v8164_v25 }
  0xe3   : > { %v785_v6 = vpop.f32.mrf.mxu3  ;;  %2196 = vmatpush.msrb.mxu3 %v7690_v27 }
  0xe4   : > { %1779 = vmatmul.f32.vlgmr.msrb.gmra.mxu0 %v7950_v1  ;;  %v8174_v1 = vand.u32 4294901760, %v1941_v12  ;;  %v756_v0 = vadd.f32 %v755_v47, %v726_v16  ;;  %v1964_v30 = vsub.f32 %v8164_v25, %v8172_v18 }
  0xe5   : > { %1815 = vmatmul.f32.gmra.mxu1 %v7981_v31  ;;  %2092 = vmatpush.msrb.mxu0 %v7610_v33 }
  0xe6   : > { %1846 = vmatmul.f32.gmra.mxu2 %v7960_v32  ;;  %v8181_v4 = vsub.f32 %v1941_v12, %v8174_v1  ;;  %v8192_v38 = vand.u32 4294901760, %v1964_v30 }
  0xe7   : > { %2096 = vmatpush.msrb.mxu0 %v7613_v34 }
  0xe8   : > { %1873 = vmatmul.f32.gmra.mxu3 %v7960_v32  ;;  %v786_v32 = vadd.f32 %v785_v6, %v756_v0  ;;  %v8195_v46 = vand.u32 4294901760, %v8181_v4 }
  0xe9   : > { %v694_v31 = vpop.f32.mrf.mxu0  ;;  %v760_v21 = vpop.f32.mrf.mxu2 }
  0xea   : > { %v845_v28 = vpop.f32.mrf.mxu1  ;;  %v1972_v44 = vsub.f32 %v8181_v4, %v8195_v46 }
  0xeb   : > { %v791_v24 = vpop.f32.mrf.mxu3 }
  0xec   : > { %1784 = vmatmul.f32.gmra.mxu0 %v7967_v36  ;;  %v730_v36 = vadd.f32 %v729_v10, %v694_v31  ;;  %v8214_v2 = vand.u32 4294901760, %v1972_v44 }
  0xed   : > { %2005 = vmatmul.f32.vlgmr.msra.gmra.mxu1 %v8151_v62 }
  0xee   : > { %7068 = vmatpush.msk.msra.mxu1 %vm7580_vm10, %v7463_v11  ;;  %2035 = vmatmul.f32.vlgmr.msra.gmra.mxu2 %v8164_v25  ;;  %v761_v43 = vadd.f32 %v760_v21, %v730_v36 }
  0xef   : > { %2285 = vmatpush.msra.mxu2 %v7638_v49 }
  0xf0   : > { %7069 = vmatpush.msk.msra.mxu1 %vm7575_vm9, %v7463_v11  ;;  %2065 = vmatmul.f32.vlgmr.msra.gmra.mxu3 %v8172_v18  ;;  %v792_v59 = vadd.f32 %v791_v24, %v761_v43 }
  0xf1   : > { %v818_v56 = vpop.f32.mrf.mxu0  ;;  %v878_v15 = vpop.f32.mrf.mxu2  ;;  %7070 = vmatpush.msk.msra.mxu3 %vm7580_vm10, %v7463_v11  ;;  %2289 = vmatpush.msra.mxu2 %v7667_v17 }
  0xf2   : > { %v819_v26 = vadd.f32 %v818_v56, %v786_v32  ;;  %v849_v20 = vpop.f32.mrf.mxu1 }
  0xf3   : > { %v917_v40 = vpop.f32.mrf.mxu3  ;;  %7071 = vmatpush.msk.msra.mxu3 %vm7575_vm9, %v7463_v11 }
  0xf4   : > { %v846_v19 = vadd.f32 %v845_v28, %v819_v26  ;;  %1966 = vmatmul.f32.vlgmr.msra.gmra.mxu0 %v8192_v38  ;;  %v918_v31 = vadd.f32 %v917_v40, %v878_v15 }
  0xf5   : > { %2009 = vmatmul.f32.gmra.mxu1 %v8174_v1  ;;  %2222 = vmatpush.msra.mxu0 %v7617_v37 }
  0xf6   : > { %852 = vst.msk [vmem:[%s8068_s15 + $0x20] sm:$0xff] %vm467_vm11, %v846_v19  ;;  %2040 = vmatmul.f32.gmra.mxu2 %v8181_v4 }
  0xf7   : > { %2225 = vmatpush.msra.mxu0 %v7622_v41 }
  0xf8   : > { %2071 = vmatmul.f32.gmra.mxu3 %v8195_v46 }
  0xf9   : > { %v822_v47 = vpop.f32.mrf.mxu0  ;;  %v886_v10 = vpop.f32.mrf.mxu2 }
  0xfa   : > { %v823_v29 = vadd.f32 %v822_v47, %v792_v59  ;;  %v977_v6 = vpop.f32.mrf.mxu1 }
  0xfb   : > { %v921_v12 = vpop.f32.mrf.mxu3 }
  0xfc   : > { %v850_v16 = vadd.f32 %v849_v20, %v823_v29  ;;  %1974 = vmatmul.f32.gmra.mxu0 %v8214_v2  ;;  %v922_v56 = vadd.f32 %v921_v12, %v886_v10 }
  0xfd   : > { %2125 = vmatmul.f32.vlgmr.msrb.gmra.mxu1 %v8151_v62 }
  0xfe   : > { %2382 = vmatpush.msrb.mxu1 %v7755_v48  ;;  %853 = vst.msk [vmem:[%s8068_s15 + $0x28] sm:$0xff] %vm467_vm11, %v850_v16  ;;  %2159 = vmatmul.f32.vlgmr.msrb.gmra.mxu2 %v8192_v38 }
  0xff   : > { %2414 = vmatpush.msrb.mxu2 %v7728_v39 }
 0x100   : > { %2388 = vmatpush.msrb.mxu1 %v7775_v53  ;;  %2198 = vmatmul.f32.vlgmr.msrb.gmra.mxu3 %v8151_v62 }
 0x101   : > { %v947_v21 = vpop.f32.mrf.mxu0  ;;  %v1010_v28 = vpop.f32.mrf.mxu2  ;;  %7076 = vmatpush.msk.msrb.mxu3 %vm7716_vm12, %v7463_v11  ;;  %2417 = vmatpush.msrb.mxu2 %v7757_v50 }
 0x102   : > { %v948_v24 = vadd.f32 %v947_v21, %v918_v31  ;;  %v983_v0 = vpop.f32.mrf.mxu1 }
 0x103   : > { %v1037_v30 = vpop.f32.mrf.mxu3  ;;  %7077 = vmatpush.msk.msrb.mxu3 %vm7747_vm13, %v7463_v11 }
 0x104   : > { %v978_v32 = vadd.f32 %v977_v6, %v948_v24  ;;  %2098 = vmatmul.f32.vlgmr.msrb.gmra.mxu0 %v8151_v62 }
 0x105   : > { %2129 = vmatmul.f32.gmra.mxu1 %v8174_v1  ;;  %7074 = vmatpush.msk.msrb.mxu0 %vm7716_vm12, %v7463_v11 }
 0x106   : > { %v1011_v36 = vadd.f32 %v1010_v28, %v978_v32  ;;  %2167 = vmatmul.f32.gmra.mxu2 %v8214_v2 }
 0x107   : > { %7075 = vmatpush.msk.msrb.mxu0 %vm7747_vm13, %v7463_v11 }
 0x108   : > { %v1038_v15 = vadd.f32 %v1037_v30, %v1011_v36  ;;  %2202 = vmatmul.f32.gmra.mxu3 %v8174_v1 }
 0x109   : > { %v952_v26 = vpop.f32.mrf.mxu0  ;;  %v1014_v20 = vpop.f32.mrf.mxu2 }
 0x10a   : > { %1044 = vst.msk [vmem:[%s8068_s15 + $0x30] sm:$0xff] %vm467_vm11, %v1038_v15  ;;  %v953_v40 = vadd.f32 %v952_v26, %v922_v56  ;;  %v1173_v43 = vpop.f32.mrf.mxu1  ;;  %v2713_v15 = vld [vmem:[%s7535_s5 + $0x7] sm:$0x1] }
 0x10b   : > { %v1041_v19 = vpop.f32.mrf.mxu3 }
 0x10c   : > { %v984_v44 = vadd.f32 %v983_v0, %v953_v40  ;;  %2102 = vmatmul.f32.gmra.mxu0 %v8174_v1 }
 0x10d   : > { %2258 = vmatmul.f32.vlgmr.msra.gmra.mxu1 %v8172_v18 }
 0x10e   : > { %7078 = vmatpush.msk.msra.mxu1 %vm7716_vm12, %v7463_v11  ;;  %v1015_v59 = vadd.f32 %v1014_v20, %v984_v44  ;;  %2291 = vmatmul.f32.vlgmr.msra.gmra.mxu2 %v8151_v62  ;;  %v2714_v44 = vld [vmem:[%s7535_s5 + $0xb] sm:$0x1] }
 0x10f   : > { %7082 = vmatpush.msk.msra.mxu2 %vm7766_vm14, %v7463_v11 }
 0x110   : > { %7079 = vmatpush.msk.msra.mxu1 %vm7747_vm13, %v7463_v11  ;;  %v1042_v47 = vadd.f32 %v1041_v19, %v1015_v59  ;;  %2318 = vmatmul.f32.vlgmr.msra.gmra.mxu3 %v8151_v62  ;;  %v2744_v59 = vrot.slane %v2713_v15, 7 }
 0x111   : > { %v1134_v10 = vpop.f32.mrf.mxu0  ;;  %v1203_v29 = vpop.f32.mrf.mxu2  ;;  %2574 = vmatpush.msra.mxu3 %v7820_v8  ;;  %7083 = vmatpush.msk.msra.mxu2 %vm7786_vm15, %v7463_v11 }
 0x112   : > { %1045 = vst.msk [vmem:[%s8068_s15 + $0x38] sm:$0xff] %vm467_vm11, %v1042_v47  ;;  %v1177_v6 = vpop.f32.mrf.mxu1  ;;  %v1174_v16 = vadd.f32 %v1173_v43, %v1134_v10  ;;  %v2712_v47 = vld [vmem:[%s7535_s5 + $0x3] sm:$0x1]  ;;  %v2715_v10 = vld [vmem:[%s7535_s5 + $0xf] sm:$0x1] }
 0x113   : > { %v1233_v12 = vpop.f32.mrf.mxu3  ;;  %2580 = vmatpush.msra.mxu3 %v7831_v63 }
 0x114   : > { %2228 = vmatmul.f32.vlgmr.msra.gmra.mxu0 %v8164_v25  ;;  %v1204_v0 = vadd.f32 %v1203_v29, %v1174_v16  ;;  %v2746_v29 = vrot.slane %v2714_v44, 6 }
 0x115   : > { %2264 = vmatmul.f32.gmra.mxu1 %v8195_v46  ;;  %2477 = vmatpush.msra.mxu0 %v7738_v42 }
 0x116   : > { %2295 = vmatmul.f32.gmra.mxu2 %v8174_v1  ;;  %v1234_v30 = vadd.f32 %v1233_v12, %v1204_v0  ;;  %v2745_v12 = vsel %vm238_vm0, %v2744_v59, %v2712_v47  ;;  %v2720_v59 = vld [vmem:[%s7535_s5 + $0x23] sm:$0x1] }
 0x117   : > { %2481 = vmatpush.msra.mxu0 %v7762_v51  ;;  %v2747_v15 = vsel %vm241_vm1, %v2746_v29, %v2745_v12 }
 0x118   : > { %2322 = vmatmul.f32.gmra.mxu3 %v8174_v1 }
 0x119   : > { %v1142_v31 = vpop.f32.mrf.mxu0  ;;  %v1208_v21 = vpop.f32.mrf.mxu2 }
 0x11a   : > { %v1293_v28 = vpop.f32.mrf.mxu1  ;;  %v1178_v32 = vadd.f32 %v1177_v6, %v1142_v31 }
 0x11b   : > { %v1239_v24 = vpop.f32.mrf.mxu3 }
 0x11c   : > { %2233 = vmatmul.f32.gmra.mxu0 %v8181_v4  ;;  %v1209_v43 = vadd.f32 %v1208_v21, %v1178_v32  ;;  %v2721_v21 = vld [vmem:[%s7535_s5 + $0x27] sm:$0x1]  ;;  %v2748_v32 = vrot.slane %v2715_v10, 5 }
 0x11d   : > { %2390 = vmatmul.f32.vlgmr.msrb.gmra.mxu1 %v8151_v62 }
 0x11e   : > { %7084 = vmatpush.msk.msrb.mxu1 %vm7766_vm14, %v7463_v11  ;;  %2420 = vmatmul.f32.vlgmr.msrb.gmra.mxu2 %v8164_v25  ;;  %v1240_v6 = vadd.f32 %v1239_v24, %v1209_v43  ;;  %v2722_v24 = vld [vmem:[%s7535_s5 + $0x2b] sm:$0x1]  ;;  %v2758_v43 = vrot.slane %v2721_v21, 7  ;;  %v2749_v47 = vsel %vm9464_vm2, %v2748_v32, %v2747_v15 }
 0x11f   : > { %2669 = vmatpush.msrb.mxu2 %v7805_v58  ;;  %v2760_v10 = vrot.slane %v2722_v24, 6 }
 0x120   : > { %7085 = vmatpush.msk.msrb.mxu1 %vm7786_vm15, %v7463_v11  ;;  %2450 = vmatmul.f32.vlgmr.msrb.gmra.mxu3 %v8172_v18 }
 0x121   : > { %v1266_v36 = vpop.f32.mrf.mxu0  ;;  %v1327_v56 = vpop.f32.mrf.mxu2  ;;  %7086 = vmatpush.msk.msrb.mxu3 %vm7766_vm14, %v7463_v11  ;;  %2673 = vmatpush.msrb.mxu2 %v7816_v61 }
 0x122   : > { %v1267_v26 = vadd.f32 %v1266_v36, %v1234_v30  ;;  %v1297_v20 = vpop.f32.mrf.mxu1  ;;  %v2716_v30 = vld [vmem:[%s7535_s5 + $0x13] sm:$0x1] }
 0x123   : > { %v1366_v40 = vpop.f32.mrf.mxu3  ;;  %7087 = vmatpush.msk.msrb.mxu3 %vm7786_vm15, %v7463_v11  ;;  %v2750_v44 = vrot.slane %v2716_v30, 4 }
 0x124   : > { %v1294_v19 = vadd.f32 %v1293_v28, %v1267_v26  ;;  %2351 = vmatmul.f32.vlgmr.msrb.gmra.mxu0 %v8192_v38  ;;  %v1367_v29 = vadd.f32 %v1366_v40, %v1327_v56  ;;  %v2724_v40 = vld [vmem:[%s7535_s5 + $0x33] sm:$0x1] }
 0x125   : > { %2394 = vmatmul.f32.gmra.mxu1 %v8174_v1  ;;  %2606 = vmatpush.msrb.mxu0 %v7795_v57 }
 0x126   : > { %7032 = vst.msk [vmem:[%s8068_s15 + $0x40] sm:$0xff] %vm467_vm11, %v1294_v19  ;;  %2425 = vmatmul.f32.gmra.mxu2 %v8181_v4  ;;  %v2717_v19 = vld [vmem:[%s7535_s5 + $0x17] sm:$0x1] }
 0x127   : > { %2609 = vmatpush.msrb.mxu0 %v7813_v60  ;;  %v2752_v12 = vrot.slane %v2717_v19, 3 }
 0x128   : > { %2456 = vmatmul.f32.gmra.mxu3 %v8195_v46 }
 0x129   : > { %v1270_v16 = vpop.f32.mrf.mxu0  ;;  %v1335_v31 = vpop.f32.mrf.mxu2 }
 0x12a   : > { %v1271_v28 = vadd.f32 %v1270_v16, %v1240_v6  ;;  %v1426_v0 = vpop.f32.mrf.mxu1  ;;  %v2718_v6 = vld [vmem:[%s7535_s5 + $0x1b] sm:$0x1]  ;;  %v2759_v16 = vsel %vm238_vm0, %v2758_v43, %v2720_v59  ;;  %v2725_v59 = vld [vmem:[%s7535_s5 + $0x37] sm:$0x1] }
 0x12b   : > { %v1370_v36 = vpop.f32.mrf.mxu3  ;;  %v2754_v24 = vrot.slane %v2718_v6, 2  ;;  %v2761_v43 = vsel %vm241_vm1, %v2760_v10, %v2759_v16  ;;  %v2726_v16 = vld [vmem:[%s7535_s5 + $0x3b] sm:$0x1] }
 0x12c   : > { %v1298_v26 = vadd.f32 %v1297_v20, %v1271_v28  ;;  %2359 = vmatmul.f32.gmra.mxu0 %v8214_v2  ;;  %v2723_v20 = vld [vmem:[%s7535_s5 + $0x2f] sm:$0x1]  ;;  %v1371_v6 = vadd.f32 %v1370_v36, %v1335_v31 }
 0x12d   : > { %2510 = vmatmul.f32.vlgmr.msra.gmra.mxu1 %v8151_v62  ;;  %v2762_v32 = vrot.slane %v2723_v20, 5 }
 0x12e   : > { %2830 = vmatpush.msra.mxu1 %v7642_v54  ;;  %7033 = vst.msk [vmem:[%s8068_s15 + $0x48] sm:$0xff] %vm467_vm11, %v1298_v26  ;;  %2543 = vmatmul.f32.vlgmr.msra.gmra.mxu2 %v8192_v38  ;;  %v2751_v38 = vsel %vm247_vm3, %v2750_v44, %v2749_v47  ;;  %v2719_v26 = vld [vmem:[%s7535_s5 + $0x1f] sm:$0x1]  ;;  %v2764_v47 = vrot.slane %v2724_v40, 4 }
 0x12f   : > { %2862 = vmatpush.msra.mxu2 %v7601_v22  ;;  %v2753_v44 = vsel %vm250_vm6, %v2752_v12, %v2751_v38 }
 0x130   : > { %2836 = vmatpush.msra.mxu1 %v7644_v55  ;;  %2582 = vmatmul.f32.vlgmr.msra.gmra.mxu3 %v8151_v62  ;;  %v2755_v10 = vsel %vm253_vm7, %v2754_v24, %v2753_v44 }
 0x131   : > { %v1396_v21 = vpop.f32.mrf.mxu0  ;;  %v1459_v28 = vpop.f32.mrf.mxu2  ;;  %7092 = vmatpush.msk.msra.mxu3 %vm7550_vm4, %v7463_v11  ;;  %2865 = vmatpush.msra.mxu2 %v7603_v23 }
 0x132   : > { %v1397_v30 = vadd.f32 %v1396_v21, %v1367_v29  ;;  %v1432_v56 = vpop.f32.mrf.mxu1  ;;  %v2756_v29 = vrot.slane %v2719_v26, 1  ;;  %v2766_v21 = vrot.slane %v2725_v59, 3 }
 0x133   : > { %v1486_v15 = vpop.f32.mrf.mxu3  ;;  %7093 = vmatpush.msk.msra.mxu3 %vm7557_vm5, %v7463_v11 }
 0x134   : > { %v1427_v19 = vadd.f32 %v1426_v0, %v1397_v30  ;;  %2483 = vmatmul.f32.vlgmr.msra.gmra.mxu0 %v8151_v62  ;;  %v2763_v0 = vsel %vm9464_vm2, %v2762_v32, %v2761_v43  ;;  %v2757_v32 = vsel %vm256_vm8, %v2756_v29, %v2755_v10  ;;  %v2727_v43 = vld [vmem:[%s7535_s5 + $0x3f] sm:$0x1]  ;;  %vm9465_vm2 = vcmask 130048  }
 0x135   : > { %2514 = vmatmul.f32.gmra.mxu1 %v8174_v1  ;;  %7090 = vmatpush.msk.msra.mxu0 %vm7550_vm4, %v7463_v11  ;;  %v2772_v36 = vsel %vm9465_vm2, %v2757_v32, 0  ;;  %v2770_v44 = vrot.slane %v2727_v43, 1 }
 0x136   : > { %v1460_v20 = vadd.f32 %v1459_v28, %v1427_v19  ;;  %2551 = vmatmul.f32.gmra.mxu2 %v8214_v2  ;;  %v2765_v2 = vsel %vm247_vm3, %v2764_v47, %v2763_v0  ;;  %v2768_v19 = vrot.slane %v2726_v16, 2  ;;  %v8367_v59 = vand.u32 4294901760, %v2772_v36 }
 0x137   : > { %7091 = vmatpush.msk.msra.mxu0 %vm7557_vm5, %v7463_v11  ;;  %v2767_v31 = vsel %vm250_vm6, %v2766_v21, %v2765_v2 }
 0x138   : > { %v1487_v12 = vadd.f32 %v1486_v15, %v1460_v20  ;;  %2586 = vmatmul.f32.gmra.mxu3 %v8174_v1 }
 0x139   : > { %v1401_v38 = vpop.f32.mrf.mxu0  ;;  %v1463_v28 = vpop.f32.mrf.mxu2 }
 0x13a   : > { %7040 = vst.msk [vmem:[%s8068_s15 + $0x50] sm:$0xff] %vm467_vm11, %v1487_v12  ;;  %v1402_v30 = vadd.f32 %v1401_v38, %v1371_v6  ;;  %v1558_v40 = vpop.f32.mrf.mxu1 }
 0x13b   : > { %v1490_v26 = vpop.f32.mrf.mxu3 }
 0x13c   : > { %v1433_v24 = vadd.f32 %v1432_v56, %v1402_v30  ;;  %2487 = vmatmul.f32.gmra.mxu0 %v8174_v1  ;;  %v2769_v56 = vsel %vm253_vm7, %v2768_v19, %v2767_v31 }
 0x13d   : > { %2642 = vmatmul.f32.vlgmr.msrb.gmra.mxu1 %v8172_v18  ;;  %v2771_v0 = vsel %vm256_vm8, %v2770_v44, %v2769_v56 }
 0x13e   : > { %7094 = vmatpush.msk.msrb.mxu1 %vm7550_vm4, %v7463_v11  ;;  %v1464_v15 = vadd.f32 %v1463_v28, %v1433_v24  ;;  %2675 = vmatmul.f32.vlgmr.msrb.gmra.mxu2 %v8151_v62  ;;  %v2774_v6 = vsel %vm9465_vm2, %v2771_v0, 0  ;;  %vm9466_vm2 = vcmask 1043459  }
 0x13f   : > { %7098 = vmatpush.msk.msrb.mxu2 %vm7580_vm10, %v7463_v11 }
 0x140   : > { %7095 = vmatpush.msk.msrb.mxu1 %vm7557_vm5, %v7463_v11  ;;  %v1491_v18 = vadd.f32 %v1490_v26, %v1464_v15  ;;  %2702 = vmatmul.f32.vlgmr.msrb.gmra.mxu3 %v8151_v62  ;;  %v8380_v62 = vsub.f32 %v2772_v36, %v8367_v59 }
 0x141   : > { %v1519_v47 = vpop.f32.mrf.mxu0  ;;  %v1588_v20 = vpop.f32.mrf.mxu2  ;;  %3023 = vmatpush.msrb.mxu3 %v7659_v9  ;;  %7099 = vmatpush.msk.msrb.mxu2 %vm7575_vm9, %v7463_v11 }
 0x142   : > { %7041 = vst.msk [vmem:[%s8068_s15 + $0x58] sm:$0xff] %vm467_vm11, %v1491_v18  ;;  %v1562_v29 = vpop.f32.mrf.mxu1  ;;  %v1559_v12 = vadd.f32 %v1558_v40, %v1519_v47  ;;  %v8388_v16 = vand.u32 4294901760, %v8380_v62 }
 0x143   : > { %v1618_v10 = vpop.f32.mrf.mxu3  ;;  %3029 = vmatpush.msrb.mxu3 %v7690_v27 }
 0x144   : > { %2612 = vmatmul.f32.vlgmr.msrb.gmra.mxu0 %v8164_v25  ;;  %v8390_v25 = vand.u32 4294901760, %v2774_v6  ;;  %v1589_v2 = vadd.f32 %v1588_v20, %v1559_v12  ;;  %v2797_v30 = vsub.f32 %v8380_v62, %v8388_v16 }
 0x145   : > { %2648 = vmatmul.f32.gmra.mxu1 %v8195_v46  ;;  %2925 = vmatpush.msrb.mxu0 %v7610_v33 }
 0x146   : > { %2679 = vmatmul.f32.gmra.mxu2 %v8174_v1  ;;  %v8397_v40 = vsub.f32 %v2774_v6, %v8390_v25  ;;  %v8408_v32 = vand.u32 4294901760, %v2797_v30 }
 0x147   : > { %2929 = vmatpush.msrb.mxu0 %v7613_v34 }
 0x148   : > { %2706 = vmatmul.f32.gmra.mxu3 %v8174_v1  ;;  %v1619_v1 = vadd.f32 %v1618_v10, %v1589_v2  ;;  %v8411_v26 = vand.u32 4294901760, %v8397_v40 }
 0x149   : > { %v1527_v46 = vpop.f32.mrf.mxu0  ;;  %v1593_v21 = vpop.f32.mrf.mxu2 }
 0x14a   : > { %v1678_v38 = vpop.f32.mrf.mxu1  ;;  %v2805_v56 = vsub.f32 %v8397_v40, %v8411_v26 }
 0x14b   : > { %v1624_v28 = vpop.f32.mrf.mxu3 }
 0x14c   : > { %2617 = vmatmul.f32.gmra.mxu0 %v8181_v4  ;;  %v1563_v4 = vadd.f32 %v1562_v29, %v1527_v46  ;;  %v8430_v47 = vand.u32 4294901760, %v2805_v56 }
 0x14d   : > { %2838 = vmatmul.f32.vlgmr.msra.gmra.mxu1 %v8367_v59 }
 0x14e   : > { %7100 = vmatpush.msk.msra.mxu1 %vm7580_vm10, %v7463_v11  ;;  %2868 = vmatmul.f32.vlgmr.msra.gmra.mxu2 %v8380_v62  ;;  %v1594_v15 = vadd.f32 %v1593_v21, %v1563_v4 }
 0x14f   : > { %3118 = vmatpush.msra.mxu2 %v7638_v49 }
 0x150   : > { %7101 = vmatpush.msk.msra.mxu1 %vm7575_vm9, %v7463_v11  ;;  %2898 = vmatmul.f32.vlgmr.msra.gmra.mxu3 %v8388_v16  ;;  %v1625_v18 = vadd.f32 %v1624_v28, %v1594_v15 }
 0x151   : > { %v1651_v43 = vpop.f32.mrf.mxu0  ;;  %v1711_v19 = vpop.f32.mrf.mxu2  ;;  %7102 = vmatpush.msk.msra.mxu3 %vm7580_vm10, %v7463_v11  ;;  %3122 = vmatpush.msra.mxu2 %v7667_v17 }
 0x152   : > { %v1652_v24 = vadd.f32 %v1651_v43, %v1619_v1  ;;  %v1682_v31 = vpop.f32.mrf.mxu1 }
 0x153   : > { %v1750_v36 = vpop.f32.mrf.mxu3  ;;  %7103 = vmatpush.msk.msra.mxu3 %vm7575_vm9, %v7463_v11 }
 0x154   : > { %v1679_v44 = vadd.f32 %v1678_v38, %v1652_v24  ;;  %2799 = vmatmul.f32.vlgmr.msra.gmra.mxu0 %v8408_v32  ;;  %v1751_v46 = vadd.f32 %v1750_v36, %v1711_v19 }
 0x155   : > { %2842 = vmatmul.f32.gmra.mxu1 %v8390_v25  ;;  %3055 = vmatpush.msra.mxu0 %v7617_v37 }
 0x156   : > { %7048 = vst.msk [vmem:[%s8068_s15 + $0x60] sm:$0xff] %vm467_vm11, %v1679_v44  ;;  %2873 = vmatmul.f32.gmra.mxu2 %v8397_v40 }
 0x157   : > { %3058 = vmatpush.msra.mxu0 %v7622_v41 }
 0x158   : > { %2904 = vmatmul.f32.gmra.mxu3 %v8411_v26 }
 0x159   : > { %v1655_v20 = vpop.f32.mrf.mxu0  ;;  %v1719_v29 = vpop.f32.mrf.mxu2 }
 0x15a   : > { %v1656_v0 = vadd.f32 %v1655_v20, %v1625_v18  ;;  %v1810_v10 = vpop.f32.mrf.mxu1 }
 0x15b   : > { %v1754_v6 = vpop.f32.mrf.mxu3 }
 0x15c   : > { %v1683_v12 = vadd.f32 %v1682_v31, %v1656_v0  ;;  %2807 = vmatmul.f32.gmra.mxu0 %v8430_v47  ;;  %v1755_v43 = vadd.f32 %v1754_v6, %v1719_v29 }
 0x15d   : > { %2958 = vmatmul.f32.vlgmr.msrb.gmra.mxu1 %v8367_v59 }
 0x15e   : > { %3215 = vmatpush.msrb.mxu1 %v7755_v48  ;;  %7049 = vst.msk [vmem:[%s8068_s15 + $0x68] sm:$0xff] %vm467_vm11, %v1683_v12  ;;  %2992 = vmatmul.f32.vlgmr.msrb.gmra.mxu2 %v8408_v32 }
 0x15f   : > { %3247 = vmatpush.msrb.mxu2 %v7728_v39 }
 0x160   : > { %3221 = vmatpush.msrb.mxu1 %v7775_v53  ;;  %3031 = vmatmul.f32.vlgmr.msrb.gmra.mxu3 %v8367_v59 }
 0x161   : > { %v1780_v21 = vpop.f32.mrf.mxu0  ;;  %v1843_v38 = vpop.f32.mrf.mxu2  ;;  %7108 = vmatpush.msk.msrb.mxu3 %vm7716_vm12, %v7463_v11  ;;  %3250 = vmatpush.msrb.mxu2 %v7757_v50 }
 0x162   : > { %v1781_v28 = vadd.f32 %v1780_v21, %v1751_v46  ;;  %v1816_v2 = vpop.f32.mrf.mxu1 }
 0x163   : > { %v1870_v30 = vpop.f32.mrf.mxu3  ;;  %7109 = vmatpush.msk.msrb.mxu3 %vm7747_vm13, %v7463_v11 }
 0x164   : > { %v1811_v1 = vadd.f32 %v1810_v10, %v1781_v28  ;;  %2931 = vmatmul.f32.vlgmr.msrb.gmra.mxu0 %v8367_v59 }
 0x165   : > { %2962 = vmatmul.f32.gmra.mxu1 %v8390_v25  ;;  %7106 = vmatpush.msk.msrb.mxu0 %vm7716_vm12, %v7463_v11 }
 0x166   : > { %v1844_v4 = vadd.f32 %v1843_v38, %v1811_v1  ;;  %3000 = vmatmul.f32.gmra.mxu2 %v8430_v47 }
 0x167   : > { %7107 = vmatpush.msk.msrb.mxu0 %vm7747_vm13, %v7463_v11 }
 0x168   : > { %v1871_v19 = vadd.f32 %v1870_v30, %v1844_v4  ;;  %3035 = vmatmul.f32.gmra.mxu3 %v8390_v25 }
 0x169   : > { %v1785_v24 = vpop.f32.mrf.mxu0  ;;  %v1847_v31 = vpop.f32.mrf.mxu2 }
 0x16a   : > { %7056 = vst.msk [vmem:[%s8068_s15 + $0x70] sm:$0xff] %vm467_vm11, %v1871_v19  ;;  %v1786_v36 = vadd.f32 %v1785_v24, %v1755_v43  ;;  %v2006_v15 = vpop.f32.mrf.mxu1  ;;  %v7123_v19 = vld [vmem:[%s7535_s5 + $0x44] sm:$0x1] }
 0x16b   : > { %v1874_v44 = vpop.f32.mrf.mxu3 }
 0x16c   : > { %v1817_v56 = vadd.f32 %v1816_v2, %v1786_v36  ;;  %2935 = vmatmul.f32.gmra.mxu0 %v8390_v25 }
 0x16d   : > { %3091 = vmatmul.f32.vlgmr.msra.gmra.mxu1 %v8388_v16 }
 0x16e   : > { %7110 = vmatpush.msk.msra.mxu1 %vm7716_vm12, %v7463_v11  ;;  %v1848_v18 = vadd.f32 %v1847_v31, %v1817_v56  ;;  %3124 = vmatmul.f32.vlgmr.msra.gmra.mxu2 %v8367_v59  ;;  %v7124_v56 = vld [vmem:[%s7535_s5 + $0x48] sm:$0x1] }
 0x16f   : > { %7114 = vmatpush.msk.msra.mxu2 %vm7766_vm14, %v7463_v11 }
 0x170   : > { %7111 = vmatpush.msk.msra.mxu1 %vm7747_vm13, %v7463_v11  ;;  %v1875_v20 = vadd.f32 %v1874_v44, %v1848_v18  ;;  %3151 = vmatmul.f32.vlgmr.msra.gmra.mxu3 %v8367_v59  ;;  %v3578_v18 = vrot.slane %v7123_v19, 7 }
 0x171   : > { %v1967_v29 = vpop.f32.mrf.mxu0  ;;  %v2036_v0 = vpop.f32.mrf.mxu2  ;;  %3407 = vmatpush.msra.mxu3 %v7820_v8  ;;  %7115 = vmatpush.msk.msra.mxu2 %vm7786_vm15, %v7463_v11 }
 0x172   : > { %7057 = vst.msk [vmem:[%s8068_s15 + $0x78] sm:$0xff] %vm467_vm11, %v1875_v20  ;;  %v2010_v10 = vpop.f32.mrf.mxu1  ;;  %v2007_v12 = vadd.f32 %v2006_v15, %v1967_v29  ;;  %v7122_v20 = vld [vmem:[%s7535_s5 + $0x40] sm:$0x1]  ;;  %v7125_v29 = vld [vmem:[%s7535_s5 + $0x4c] sm:$0x1] }
 0x173   : > { %v2066_v6 = vpop.f32.mrf.mxu3  ;;  %3413 = vmatpush.msra.mxu3 %v7831_v63 }
 0x174   : > { %3061 = vmatmul.f32.vlgmr.msra.gmra.mxu0 %v8380_v62  ;;  %v2037_v2 = vadd.f32 %v2036_v0, %v2007_v12  ;;  %v3580_v0 = vrot.slane %v7124_v56, 6 }
 0x175   : > { %3097 = vmatmul.f32.gmra.mxu1 %v8411_v26  ;;  %3310 = vmatpush.msra.mxu0 %v7738_v42 }
 0x176   : > { %3128 = vmatmul.f32.gmra.mxu2 %v8390_v25  ;;  %v2067_v30 = vadd.f32 %v2066_v6, %v2037_v2  ;;  %v3579_v6 = vsel %vm238_vm0, %v3578_v18, %v7122_v20  ;;  %v7130_v18 = vld [vmem:[%s7535_s5 + $0x60] sm:$0x1] }
 0x177   : > { %3314 = vmatpush.msra.mxu0 %v7762_v51  ;;  %v3581_v19 = vsel %vm241_vm1, %v3580_v0, %v3579_v6 }
 0x178   : > { %3155 = vmatmul.f32.gmra.mxu3 %v8390_v25 }
 0x179   : > { %v1975_v46 = vpop.f32.mrf.mxu0  ;;  %v2041_v21 = vpop.f32.mrf.mxu2 }
 0x17a   : > { %v2126_v38 = vpop.f32.mrf.mxu1  ;;  %v2011_v1 = vadd.f32 %v2010_v10, %v1975_v46 }
 0x17b   : > { %v2072_v28 = vpop.f32.mrf.mxu3 }
 0x17c   : > { %3066 = vmatmul.f32.gmra.mxu0 %v8397_v40  ;;  %v2042_v15 = vadd.f32 %v2041_v21, %v2011_v1  ;;  %v7131_v21 = vld [vmem:[%s7535_s5 + $0x64] sm:$0x1]  ;;  %v3582_v1 = vrot.slane %v7125_v29, 5 }
 0x17d   : > { %3223 = vmatmul.f32.vlgmr.msrb.gmra.mxu1 %v8367_v59 }
 0x17e   : > { %7116 = vmatpush.msk.msrb.mxu1 %vm7766_vm14, %v7463_v11  ;;  %3253 = vmatmul.f32.vlgmr.msrb.gmra.mxu2 %v8380_v62  ;;  %v2073_v10 = vadd.f32 %v2072_v28, %v2042_v15  ;;  %v7132_v28 = vld [vmem:[%s7535_s5 + $0x68] sm:$0x1]  ;;  %v3592_v15 = vrot.slane %v7131_v21, 7  ;;  %v3583_v20 = vsel %vm9466_vm2, %v3582_v1, %v3581_v19 }
 0x17f   : > { %3502 = vmatpush.msrb.mxu2 %v7805_v58  ;;  %v3594_v29 = vrot.slane %v7132_v28, 6 }
 0x180   : > { %7117 = vmatpush.msk.msrb.mxu1 %vm7786_vm15, %v7463_v11  ;;  %3283 = vmatmul.f32.vlgmr.msrb.gmra.mxu3 %v8388_v16 }
 0x181   : > { %v2099_v4 = vpop.f32.mrf.mxu0  ;;  %v2160_v43 = vpop.f32.mrf.mxu2  ;;  %7118 = vmatpush.msk.msrb.mxu3 %vm7766_vm14, %v7463_v11  ;;  %3506 = vmatpush.msrb.mxu2 %v7816_v61 }
 0x182   : > { %v2100_v24 = vadd.f32 %v2099_v4, %v2067_v30  ;;  %v2130_v31 = vpop.f32.mrf.mxu1  ;;  %v7126_v30 = vld [vmem:[%s7535_s5 + $0x50] sm:$0x1] }
 0x183   : > { %v2199_v36 = vpop.f32.mrf.mxu3  ;;  %7119 = vmatpush.msk.msrb.mxu3 %vm7786_vm15, %v7463_v11  ;;  %v3584_v56 = vrot.slane %v7126_v30, 4 }
 0x184   : > { %v2127_v44 = vadd.f32 %v2126_v38, %v2100_v24  ;;  %3184 = vmatmul.f32.vlgmr.msrb.gmra.mxu0 %v8408_v32  ;;  %v2200_v0 = vadd.f32 %v2199_v36, %v2160_v43  ;;  %v7134_v36 = vld [vmem:[%s7535_s5 + $0x70] sm:$0x1] }
 0x185   : > { %3227 = vmatmul.f32.gmra.mxu1 %v8390_v25  ;;  %3439 = vmatpush.msrb.mxu0 %v7795_v57 }
 0x186   : > { %7064 = vst.msk [vmem:[%s8068_s15 + $0x80] sm:$0xff] %vm467_vm11, %v2127_v44  ;;  %3258 = vmatmul.f32.gmra.mxu2 %v8397_v40  ;;  %v7127_v44 = vld [vmem:[%s7535_s5 + $0x54] sm:$0x1] }
 0x187   : > { %3442 = vmatpush.msrb.mxu0 %v7813_v60  ;;  %v3586_v6 = vrot.slane %v7127_v44, 3 }
 0x188   : > { %3289 = vmatmul.f32.gmra.mxu3 %v8411_v26 }
 0x189   : > { %v2103_v12 = vpop.f32.mrf.mxu0  ;;  %v2168_v46 = vpop.f32.mrf.mxu2 }
 0x18a   : > { %v2104_v38 = vadd.f32 %v2103_v12, %v2073_v10  ;;  %v2259_v2 = vpop.f32.mrf.mxu1  ;;  %v7128_v10 = vld [vmem:[%s7535_s5 + $0x58] sm:$0x1]  ;;  %v3593_v12 = vsel %vm238_vm0, %v3592_v15, %v7130_v18  ;;  %v7135_v18 = vld [vmem:[%s7535_s5 + $0x74] sm:$0x1] }
 0x18b   : > { %v2203_v4 = vpop.f32.mrf.mxu3  ;;  %v3588_v28 = vrot.slane %v7128_v10, 2  ;;  %v3595_v15 = vsel %vm241_vm1, %v3594_v29, %v3593_v12  ;;  %v7136_v12 = vld [vmem:[%s7535_s5 + $0x78] sm:$0x1] }
 0x18c   : > { %v2131_v24 = vadd.f32 %v2130_v31, %v2104_v38  ;;  %3192 = vmatmul.f32.gmra.mxu0 %v8430_v47  ;;  %v7133_v31 = vld [vmem:[%s7535_s5 + $0x6c] sm:$0x1]  ;;  %v2204_v10 = vadd.f32 %v2203_v4, %v2168_v46 }
 0x18d   : > { %3343 = vmatmul.f32.vlgmr.msra.gmra.mxu1 %v8367_v59  ;;  %v3596_v1 = vrot.slane %v7133_v31, 5 }
 0x18e   : > { %3664 = vmatpush.msra.mxu1 %v7642_v54  ;;  %7065 = vst.msk [vmem:[%s8068_s15 + $0x88] sm:$0xff] %vm467_vm11, %v2131_v24  ;;  %3376 = vmatmul.f32.vlgmr.msra.gmra.mxu2 %v8408_v32  ;;  %v3585_v32 = vsel %vm247_vm3, %v3584_v56, %v3583_v20  ;;  %v7129_v24 = vld [vmem:[%s7535_s5 + $0x5c] sm:$0x1]  ;;  %v3598_v20 = vrot.slane %v7134_v36, 4 }
 0x18f   : > { %3696 = vmatpush.msra.mxu2 %v7601_v22  ;;  %v3587_v56 = vsel %vm250_vm6, %v3586_v6, %v3585_v32 }
 0x190   : > { %3670 = vmatpush.msra.mxu1 %v7644_v55  ;;  %3415 = vmatmul.f32.vlgmr.msra.gmra.mxu3 %v8367_v59  ;;  %v3589_v29 = vsel %vm253_vm7, %v3588_v28, %v3587_v56 }
 0x191   : > { %v2229_v21 = vpop.f32.mrf.mxu0  ;;  %v2292_v38 = vpop.f32.mrf.mxu2  ;;  %7140 = vmatpush.msk.msra.mxu3 %vm7550_vm4, %v7463_v11  ;;  %3699 = vmatpush.msra.mxu2 %v7603_v23 }
 0x192   : > { %v2230_v30 = vadd.f32 %v2229_v21, %v2200_v0  ;;  %v2265_v43 = vpop.f32.mrf.mxu1  ;;  %v3590_v0 = vrot.slane %v7129_v24, 1  ;;  %v3600_v21 = vrot.slane %v7135_v18, 3 }
 0x193   : > { %v2319_v19 = vpop.f32.mrf.mxu3  ;;  %7141 = vmatpush.msk.msra.mxu3 %vm7557_vm5, %v7463_v11 }
 0x194   : > { %v2260_v44 = vadd.f32 %v2259_v2, %v2230_v30  ;;  %3316 = vmatmul.f32.vlgmr.msra.gmra.mxu0 %v8367_v59  ;;  %v3597_v2 = vsel %vm9466_vm2, %v3596_v1, %v3595_v15  ;;  %v3591_v1 = vsel %vm256_vm8, %v3590_v0, %v3589_v29  ;;  %v7137_v15 = vld [vmem:[%s7535_s5 + $0x7c] sm:$0x1]  ;;  %vm9467_vm2 = vcmask 130048  }
 0x195   : > { %3347 = vmatmul.f32.gmra.mxu1 %v8390_v25  ;;  %7138 = vmatpush.msk.msra.mxu0 %vm7550_vm4, %v7463_v11  ;;  %v3606_v4 = vsel %vm9467_vm2, %v3591_v1, 0  ;;  %v3604_v56 = vrot.slane %v7137_v15, 1 }
 0x196   : > { %v2293_v31 = vadd.f32 %v2292_v38, %v2260_v44  ;;  %3384 = vmatmul.f32.gmra.mxu2 %v8430_v47  ;;  %v3599_v47 = vsel %vm247_vm3, %v3598_v20, %v3597_v2  ;;  %v3602_v44 = vrot.slane %v7136_v12, 2  ;;  %v8583_v18 = vand.u32 4294901760, %v3606_v4 }
 0x197   : > { %7139 = vmatpush.msk.msra.mxu0 %vm7557_vm5, %v7463_v11  ;;  %v3601_v46 = vsel %vm250_vm6, %v3600_v21, %v3599_v47 }
 0x198   : > { %v2320_v6 = vadd.f32 %v2319_v19, %v2293_v31  ;;  %3419 = vmatmul.f32.gmra.mxu3 %v8390_v25 }
 0x199   : > { %v2234_v32 = vpop.f32.mrf.mxu0  ;;  %v2296_v38 = vpop.f32.mrf.mxu2 }
 0x19a   : > { %7072 = vst.msk [vmem:[%s8068_s15 + $0x90] sm:$0xff] %vm467_vm11, %v2320_v6  ;;  %v2235_v30 = vadd.f32 %v2234_v32, %v2204_v10  ;;  %v2391_v36 = vpop.f32.mrf.mxu1 }
 0x19b   : > { %v2323_v24 = vpop.f32.mrf.mxu3 }
 0x19c   : > { %v2266_v28 = vadd.f32 %v2265_v43, %v2235_v30  ;;  %3320 = vmatmul.f32.gmra.mxu0 %v8390_v25  ;;  %v3603_v43 = vsel %vm253_vm7, %v3602_v44, %v3601_v46 }
 0x19d   : > { %3475 = vmatmul.f32.vlgmr.msrb.gmra.mxu1 %v8388_v16  ;;  %v3605_v2 = vsel %vm256_vm8, %v3604_v56, %v3603_v43 }
 0x19e   : > { %7142 = vmatpush.msk.msrb.mxu1 %vm7550_vm4, %v7463_v11  ;;  %v2297_v19 = vadd.f32 %v2296_v38, %v2266_v28  ;;  %3508 = vmatmul.f32.vlgmr.msrb.gmra.mxu2 %v8367_v59  ;;  %v3608_v10 = vsel %vm9467_vm2, %v3605_v2, 0  ;;  %vm9468_vm2 = vcmask 1043459  }
 0x19f   : > { %7146 = vmatpush.msk.msrb.mxu2 %vm7580_vm10, %v7463_v11 }
 0x1a0   : > { %7143 = vmatpush.msk.msrb.mxu1 %vm7557_vm5, %v7463_v11  ;;  %v2324_v16 = vadd.f32 %v2323_v24, %v2297_v19  ;;  %3535 = vmatmul.f32.vlgmr.msrb.gmra.mxu3 %v8367_v59  ;;  %v8596_v59 = vsub.f32 %v3606_v4, %v8583_v18 }
 0x1a1   : > { %v2352_v20 = vpop.f32.mrf.mxu0  ;;  %v2421_v31 = vpop.f32.mrf.mxu2  ;;  %3857 = vmatpush.msrb.mxu3 %v7659_v9  ;;  %7147 = vmatpush.msk.msrb.mxu2 %vm7575_vm9, %v7463_v11 }
 0x1a2   : > { %7073 = vst.msk [vmem:[%s8068_s15 + $0x98] sm:$0xff] %vm467_vm11, %v2324_v16  ;;  %v2395_v0 = vpop.f32.mrf.mxu1  ;;  %v2392_v6 = vadd.f32 %v2391_v36, %v2352_v20  ;;  %v8604_v12 = vand.u32 4294901760, %v8596_v59 }
 0x1a3   : > { %v2451_v29 = vpop.f32.mrf.mxu3  ;;  %3863 = vmatpush.msrb.mxu3 %v7690_v27 }
 0x1a4   : > { %3445 = vmatmul.f32.vlgmr.msrb.gmra.mxu0 %v8380_v62  ;;  %v8606_v62 = vand.u32 4294901760, %v3608_v10  ;;  %v2422_v47 = vadd.f32 %v2421_v31, %v2392_v6  ;;  %v3631_v30 = vsub.f32 %v8596_v59, %v8604_v12 }
 0x1a5   : > { %3481 = vmatmul.f32.gmra.mxu1 %v8411_v26  ;;  %3759 = vmatpush.msrb.mxu0 %v7610_v33 }
 0x1a6   : > { %3512 = vmatmul.f32.gmra.mxu2 %v8390_v25  ;;  %v8613_v36 = vsub.f32 %v3608_v10, %v8606_v62  ;;  %v8624_v1 = vand.u32 4294901760, %v3631_v30 }
 0x1a7   : > { %3763 = vmatpush.msrb.mxu0 %v7613_v34 }
 0x1a8   : > { %3539 = vmatmul.f32.gmra.mxu3 %v8390_v25  ;;  %v2452_v25 = vadd.f32 %v2451_v29, %v2422_v47  ;;  %v8627_v24 = vand.u32 4294901760, %v8613_v36 }
 0x1a9   : > { %v2360_v26 = vpop.f32.mrf.mxu0  ;;  %v2426_v21 = vpop.f32.mrf.mxu2 }
 0x1aa   : > { %v2511_v32 = vpop.f32.mrf.mxu1  ;;  %v3639_v43 = vsub.f32 %v8613_v36, %v8627_v24 }
 0x1ab   : > { %v2457_v38 = vpop.f32.mrf.mxu3 }
 0x1ac   : > { %3450 = vmatmul.f32.gmra.mxu0 %v8397_v40  ;;  %v2396_v40 = vadd.f32 %v2395_v0, %v2360_v26  ;;  %v8646_v20 = vand.u32 4294901760, %v3639_v43 }
 0x1ad   : > { %3672 = vmatmul.f32.vlgmr.msra.gmra.mxu1 %v8583_v18 }
 0x1ae   : > { %7148 = vmatpush.msk.msra.mxu1 %vm7580_vm10, %v7463_v11  ;;  %3702 = vmatmul.f32.vlgmr.msra.gmra.mxu2 %v8596_v59  ;;  %v2427_v19 = vadd.f32 %v2426_v21, %v2396_v40 }
 0x1af   : > { %3952 = vmatpush.msra.mxu2 %v7638_v49 }
 0x1b0   : > { %7149 = vmatpush.msk.msra.mxu1 %vm7575_vm9, %v7463_v11  ;;  %3732 = vmatmul.f32.vlgmr.msra.gmra.mxu3 %v8604_v12  ;;  %v2458_v16 = vadd.f32 %v2457_v38, %v2427_v19 }
 0x1b1   : > { %v2484_v15 = vpop.f32.mrf.mxu0  ;;  %v2544_v44 = vpop.f32.mrf.mxu2  ;;  %7150 = vmatpush.msk.msra.mxu3 %vm7580_vm10, %v7463_v11  ;;  %3956 = vmatpush.msra.mxu2 %v7667_v17 }
 0x1b2   : > { %v2485_v28 = vadd.f32 %v2484_v15, %v2452_v25  ;;  %v2515_v46 = vpop.f32.mrf.mxu1 }
 0x1b3   : > { %v2583_v4 = vpop.f32.mrf.mxu3  ;;  %7151 = vmatpush.msk.msra.mxu3 %vm7575_vm9, %v7463_v11 }
 0x1b4   : > { %v2512_v56 = vadd.f32 %v2511_v32, %v2485_v28  ;;  %3633 = vmatmul.f32.vlgmr.msra.gmra.mxu0 %v8624_v1  ;;  %v2584_v26 = vadd.f32 %v2583_v4, %v2544_v44 }
 0x1b5   : > { %3676 = vmatmul.f32.gmra.mxu1 %v8606_v62  ;;  %3889 = vmatpush.msra.mxu0 %v7617_v37 }
 0x1b6   : > { %7080 = vst.msk [vmem:[%s8068_s15 + $0xa0] sm:$0xff] %vm467_vm11, %v2512_v56  ;;  %3707 = vmatmul.f32.gmra.mxu2 %v8613_v36 }
 0x1b7   : > { %3892 = vmatpush.msra.mxu0 %v7622_v41 }
 0x1b8   : > { %3738 = vmatmul.f32.gmra.mxu3 %v8627_v24 }
 0x1b9   : > { %v2488_v31 = vpop.f32.mrf.mxu0  ;;  %v2552_v0 = vpop.f32.mrf.mxu2 }
 0x1ba   : > { %v2489_v2 = vadd.f32 %v2488_v31, %v2458_v16  ;;  %v2643_v29 = vpop.f32.mrf.mxu1 }
 0x1bb   : > { %v2587_v10 = vpop.f32.mrf.mxu3 }
 0x1bc   : > { %v2516_v6 = vadd.f32 %v2515_v46, %v2489_v2  ;;  %3641 = vmatmul.f32.gmra.mxu0 %v8646_v20  ;;  %v2588_v15 = vadd.f32 %v2587_v10, %v2552_v0 }
 0x1bd   : > { %3792 = vmatmul.f32.vlgmr.msrb.gmra.mxu1 %v8583_v18 }
 0x1be   : > { %4049 = vmatpush.msrb.mxu1 %v7755_v48  ;;  %7081 = vst.msk [vmem:[%s8068_s15 + $0xa8] sm:$0xff] %vm467_vm11, %v2516_v6  ;;  %3826 = vmatmul.f32.vlgmr.msrb.gmra.mxu2 %v8624_v1 }
 0x1bf   : > { %4081 = vmatpush.msrb.mxu2 %v7728_v39 }
 0x1c0   : > { %4055 = vmatpush.msrb.mxu1 %v7775_v53  ;;  %3865 = vmatmul.f32.vlgmr.msrb.gmra.mxu3 %v8583_v18 }
 0x1c1   : > { %v2613_v21 = vpop.f32.mrf.mxu0  ;;  %v2676_v32 = vpop.f32.mrf.mxu2  ;;  %7156 = vmatpush.msk.msrb.mxu3 %vm7716_vm12, %v7463_v11  ;;  %4084 = vmatpush.msrb.mxu2 %v7757_v50 }
 0x1c2   : > { %v2614_v38 = vadd.f32 %v2613_v21, %v2584_v26  ;;  %v2649_v47 = vpop.f32.mrf.mxu1 }
 0x1c3   : > { %v2703_v30 = vpop.f32.mrf.mxu3  ;;  %7157 = vmatpush.msk.msrb.mxu3 %vm7747_vm13, %v7463_v11 }
 0x1c4   : > { %v2644_v25 = vadd.f32 %v2643_v29, %v2614_v38  ;;  %3765 = vmatmul.f32.vlgmr.msrb.gmra.mxu0 %v8583_v18 }
 0x1c5   : > { %3796 = vmatmul.f32.gmra.mxu1 %v8606_v62  ;;  %7154 = vmatpush.msk.msrb.mxu0 %vm7716_vm12, %v7463_v11 }
 0x1c6   : > { %v2677_v40 = vadd.f32 %v2676_v32, %v2644_v25  ;;  %3834 = vmatmul.f32.gmra.mxu2 %v8646_v20 }
 0x1c7   : > { %7155 = vmatpush.msk.msrb.mxu0 %vm7747_vm13, %v7463_v11 }
 0x1c8   : > { %v2704_v44 = vadd.f32 %v2703_v30, %v2677_v40  ;;  %3869 = vmatmul.f32.gmra.mxu3 %v8606_v62 }
 0x1c9   : > { %v2618_v28 = vpop.f32.mrf.mxu0  ;;  %v2680_v46 = vpop.f32.mrf.mxu2 }
 0x1ca   : > { %7088 = vst.msk [vmem:[%s8068_s15 + $0xb0] sm:$0xff] %vm467_vm11, %v2704_v44  ;;  %v2619_v4 = vadd.f32 %v2618_v28, %v2588_v15  ;;  %v2839_v19 = vpop.f32.mrf.mxu1  ;;  %v7171_v44 = vld [vmem:[%s7535_s5 + $0x45] sm:$0x1] }
 0x1cb   : > { %v2707_v56 = vpop.f32.mrf.mxu3 }
 0x1cc   : > { %v2650_v43 = vadd.f32 %v2649_v47, %v2619_v4  ;;  %3769 = vmatmul.f32.gmra.mxu0 %v8606_v62 }
 0x1cd   : > { %3925 = vmatmul.f32.vlgmr.msra.gmra.mxu1 %v8604_v12 }
 0x1ce   : > { %7158 = vmatpush.msk.msra.mxu1 %vm7716_vm12, %v7463_v11  ;;  %v2681_v16 = vadd.f32 %v2680_v46, %v2650_v43  ;;  %3958 = vmatmul.f32.vlgmr.msra.gmra.mxu2 %v8583_v18  ;;  %v7172_v43 = vld [vmem:[%s7535_s5 + $0x49] sm:$0x1] }
 0x1cf   : > { %7162 = vmatpush.msk.msra.mxu2 %vm7766_vm14, %v7463_v11 }
 0x1d0   : > { %7159 = vmatpush.msk.msra.mxu1 %vm7747_vm13, %v7463_v11  ;;  %v2708_v31 = vadd.f32 %v2707_v56, %v2681_v16  ;;  %3985 = vmatmul.f32.vlgmr.msra.gmra.mxu3 %v8583_v18  ;;  %v4411_v16 = vrot.slane %v7171_v44, 7 }
 0x1d1   : > { %v2800_v0 = vpop.f32.mrf.mxu0  ;;  %v2869_v2 = vpop.f32.mrf.mxu2  ;;  %4241 = vmatpush.msra.mxu3 %v7820_v8  ;;  %7163 = vmatpush.msk.msra.mxu2 %vm7786_vm15, %v7463_v11 }
 0x1d2   : > { %7089 = vst.msk [vmem:[%s8068_s15 + $0xb8] sm:$0xff] %vm467_vm11, %v2708_v31  ;;  %v2843_v29 = vpop.f32.mrf.mxu1  ;;  %v2840_v6 = vadd.f32 %v2839_v19, %v2800_v0  ;;  %v7170_v31 = vld [vmem:[%s7535_s5 + $0x41] sm:$0x1]  ;;  %v7173_v0 = vld [vmem:[%s7535_s5 + $0x4d] sm:$0x1] }
 0x1d3   : > { %v2899_v10 = vpop.f32.mrf.mxu3  ;;  %4247 = vmatpush.msra.mxu3 %v7831_v63 }
 0x1d4   : > { %3895 = vmatmul.f32.vlgmr.msra.gmra.mxu0 %v8596_v59  ;;  %v2870_v47 = vadd.f32 %v2869_v2, %v2840_v6  ;;  %v4413_v2 = vrot.slane %v7172_v43, 6 }
 0x1d5   : > { %3931 = vmatmul.f32.gmra.mxu1 %v8627_v24  ;;  %4144 = vmatpush.msra.mxu0 %v7738_v42 }
 0x1d6   : > { %3962 = vmatmul.f32.gmra.mxu2 %v8606_v62  ;;  %v2900_v30 = vadd.f32 %v2899_v10, %v2870_v47  ;;  %v4412_v10 = vsel %vm238_vm0, %v4411_v16, %v7170_v31  ;;  %v7178_v16 = vld [vmem:[%s7535_s5 + $0x61] sm:$0x1] }
 0x1d7   : > { %4148 = vmatpush.msra.mxu0 %v7762_v51  ;;  %v4414_v44 = vsel %vm241_vm1, %v4413_v2, %v4412_v10 }
 0x1d8   : > { %3989 = vmatmul.f32.gmra.mxu3 %v8606_v62 }
 0x1d9   : > { %v2808_v26 = vpop.f32.mrf.mxu0  ;;  %v2874_v21 = vpop.f32.mrf.mxu2 }
 0x1da   : > { %v2959_v32 = vpop.f32.mrf.mxu1  ;;  %v2844_v25 = vadd.f32 %v2843_v29, %v2808_v26 }
 0x1db   : > { %v2905_v38 = vpop.f32.mrf.mxu3 }
 0x1dc   : > { %3900 = vmatmul.f32.gmra.mxu0 %v8613_v36  ;;  %v2875_v19 = vadd.f32 %v2874_v21, %v2844_v25  ;;  %v7179_v21 = vld [vmem:[%s7535_s5 + $0x65] sm:$0x1]  ;;  %v4415_v25 = vrot.slane %v7173_v0, 5 }
 0x1dd   : > { %4057 = vmatmul.f32.vlgmr.msrb.gmra.mxu1 %v8583_v18 }
 0x1de   : > { %7164 = vmatpush.msk.msrb.mxu1 %vm7766_vm14, %v7463_v11  ;;  %4087 = vmatmul.f32.vlgmr.msrb.gmra.mxu2 %v8596_v59  ;;  %v2906_v29 = vadd.f32 %v2905_v38, %v2875_v19  ;;  %v7180_v38 = vld [vmem:[%s7535_s5 + $0x69] sm:$0x1]  ;;  %v4425_v19 = vrot.slane %v7179_v21, 7  ;;  %v4416_v31 = vsel %vm9468_vm2, %v4415_v25, %v4414_v44 }
 0x1df   : > { %4336 = vmatpush.msrb.mxu2 %v7805_v58  ;;  %v4427_v0 = vrot.slane %v7180_v38, 6 }
 0x1e0   : > { %7165 = vmatpush.msk.msrb.mxu1 %vm7786_vm15, %v7463_v11  ;;  %4117 = vmatmul.f32.vlgmr.msrb.gmra.mxu3 %v8604_v12 }
 0x1e1   : > { %v2932_v40 = vpop.f32.mrf.mxu0  ;;  %v2993_v15 = vpop.f32.mrf.mxu2  ;;  %7166 = vmatpush.msk.msrb.mxu3 %vm7766_vm14, %v7463_v11  ;;  %4340 = vmatpush.msrb.mxu2 %v7816_v61 }
 0x1e2   : > { %v2933_v28 = vadd.f32 %v2932_v40, %v2900_v30  ;;  %v2963_v46 = vpop.f32.mrf.mxu1  ;;  %v7174_v30 = vld [vmem:[%s7535_s5 + $0x51] sm:$0x1] }
 0x1e3   : > { %v3032_v4 = vpop.f32.mrf.mxu3  ;;  %7167 = vmatpush.msk.msrb.mxu3 %vm7786_vm15, %v7463_v11  ;;  %v4417_v43 = vrot.slane %v7174_v30, 4 }
 0x1e4   : > { %v2960_v56 = vadd.f32 %v2959_v32, %v2933_v28  ;;  %4018 = vmatmul.f32.vlgmr.msrb.gmra.mxu0 %v8624_v1  ;;  %v3033_v2 = vadd.f32 %v3032_v4, %v2993_v15  ;;  %v7182_v4 = vld [vmem:[%s7535_s5 + $0x71] sm:$0x1] }
 0x1e5   : > { %4061 = vmatmul.f32.gmra.mxu1 %v8606_v62  ;;  %4273 = vmatpush.msrb.mxu0 %v7795_v57 }
 0x1e6   : > { %7096 = vst.msk [vmem:[%s8068_s15 + $0xc0] sm:$0xff] %vm467_vm11, %v2960_v56  ;;  %4092 = vmatmul.f32.gmra.mxu2 %v8613_v36  ;;  %v7175_v56 = vld [vmem:[%s7535_s5 + $0x55] sm:$0x1] }
 0x1e7   : > { %4276 = vmatpush.msrb.mxu0 %v7813_v60  ;;  %v4419_v10 = vrot.slane %v7175_v56, 3 }
 0x1e8   : > { %4123 = vmatmul.f32.gmra.mxu3 %v8627_v24 }
 0x1e9   : > { %v2936_v6 = vpop.f32.mrf.mxu0  ;;  %v3001_v26 = vpop.f32.mrf.mxu2 }
 0x1ea   : > { %v2937_v32 = vadd.f32 %v2936_v6, %v2906_v29  ;;  %v3092_v47 = vpop.f32.mrf.mxu1  ;;  %v7176_v29 = vld [vmem:[%s7535_s5 + $0x59] sm:$0x1]  ;;  %v4426_v6 = vsel %vm238_vm0, %v4425_v19, %v7178_v16  ;;  %v7183_v16 = vld [vmem:[%s7535_s5 + $0x75] sm:$0x1] }
 0x1eb   : > { %v3036_v40 = vpop.f32.mrf.mxu3  ;;  %v4421_v38 = vrot.slane %v7176_v29, 2  ;;  %v4428_v19 = vsel %vm241_vm1, %v4427_v0, %v4426_v6  ;;  %v7184_v6 = vld [vmem:[%s7535_s5 + $0x79] sm:$0x1] }
 0x1ec   : > { %v2964_v28 = vadd.f32 %v2963_v46, %v2937_v32  ;;  %4026 = vmatmul.f32.gmra.mxu0 %v8646_v20  ;;  %v7181_v46 = vld [vmem:[%s7535_s5 + $0x6d] sm:$0x1]  ;;  %v3037_v29 = vadd.f32 %v3036_v40, %v3001_v26 }
 0x1ed   : > { %4177 = vmatmul.f32.vlgmr.msra.gmra.mxu1 %v8583_v18  ;;  %v4429_v25 = vrot.slane %v7181_v46, 5 }
 0x1ee   : > { %4497 = vmatpush.msra.mxu1 %v7642_v54  ;;  %7097 = vst.msk [vmem:[%s8068_s15 + $0xc8] sm:$0xff] %vm467_vm11, %v2964_v28  ;;  %4210 = vmatmul.f32.vlgmr.msra.gmra.mxu2 %v8624_v1  ;;  %v4418_v1 = vsel %vm247_vm3, %v4417_v43, %v4416_v31  ;;  %v7177_v28 = vld [vmem:[%s7535_s5 + $0x5d] sm:$0x1]  ;;  %v4431_v31 = vrot.slane %v7182_v4, 4 }
 0x1ef   : > { %4529 = vmatpush.msra.mxu2 %v7601_v22  ;;  %v4420_v43 = vsel %vm250_vm6, %v4419_v10, %v4418_v1 }
 0x1f0   : > { %4503 = vmatpush.msra.mxu1 %v7644_v55  ;;  %4249 = vmatmul.f32.vlgmr.msra.gmra.mxu3 %v8583_v18  ;;  %v4422_v0 = vsel %vm253_vm7, %v4421_v38, %v4420_v43 }
 0x1f1   : > { %v3062_v21 = vpop.f32.mrf.mxu0  ;;  %v3125_v32 = vpop.f32.mrf.mxu2  ;;  %7188 = vmatpush.msk.msra.mxu3 %vm7550_vm4, %v7463_v11  ;;  %4532 = vmatpush.msra.mxu2 %v7603_v23 }
 0x1f2   : > { %v3063_v30 = vadd.f32 %v3062_v21, %v3033_v2  ;;  %v3098_v15 = vpop.f32.mrf.mxu1  ;;  %v4423_v2 = vrot.slane %v7177_v28, 1  ;;  %v4433_v21 = vrot.slane %v7183_v16, 3 }
 0x1f3   : > { %v3152_v44 = vpop.f32.mrf.mxu3  ;;  %7189 = vmatpush.msk.msra.mxu3 %vm7557_vm5, %v7463_v11 }
 0x1f4   : > { %v3093_v56 = vadd.f32 %v3092_v47, %v3063_v30  ;;  %4150 = vmatmul.f32.vlgmr.msra.gmra.mxu0 %v8583_v18  ;;  %v4430_v47 = vsel %vm9468_vm2, %v4429_v25, %v4428_v19  ;;  %v4424_v25 = vsel %vm256_vm8, %v4423_v2, %v4422_v0  ;;  %v7185_v19 = vld [vmem:[%s7535_s5 + $0x7d] sm:$0x1]  ;;  %vm9469_vm2 = vcmask 130048  }
 0x1f5   : > { %4181 = vmatmul.f32.gmra.mxu1 %v8606_v62  ;;  %7186 = vmatpush.msk.msra.mxu0 %vm7550_vm4, %v7463_v11  ;;  %v4439_v40 = vsel %vm9469_vm2, %v4424_v25, 0  ;;  %v4437_v43 = vrot.slane %v7185_v19, 1 }
 0x1f6   : > { %v3126_v46 = vadd.f32 %v3125_v32, %v3093_v56  ;;  %4218 = vmatmul.f32.gmra.mxu2 %v8646_v20  ;;  %v4432_v20 = vsel %vm247_vm3, %v4431_v31, %v4430_v47  ;;  %v4435_v56 = vrot.slane %v7184_v6, 2  ;;  %v8799_v16 = vand.u32 4294901760, %v4439_v40 }
 0x1f7   : > { %7187 = vmatpush.msk.msra.mxu0 %vm7557_vm5, %v7463_v11  ;;  %v4434_v26 = vsel %vm250_vm6, %v4433_v21, %v4432_v20 }
 0x1f8   : > { %v3153_v10 = vadd.f32 %v3152_v44, %v3126_v46  ;;  %4253 = vmatmul.f32.gmra.mxu3 %v8606_v62 }
 0x1f9   : > { %v3067_v1 = vpop.f32.mrf.mxu0  ;;  %v3129_v32 = vpop.f32.mrf.mxu2 }
 0x1fa   : > { %7104 = vst.msk [vmem:[%s8068_s15 + $0xd0] sm:$0xff] %vm467_vm11, %v3153_v10  ;;  %v3068_v30 = vadd.f32 %v3067_v1, %v3037_v29  ;;  %v3224_v4 = vpop.f32.mrf.mxu1 }
 0x1fb   : > { %v3156_v28 = vpop.f32.mrf.mxu3 }
 0x1fc   : > { %v3099_v38 = vadd.f32 %v3098_v15, %v3068_v30  ;;  %4154 = vmatmul.f32.gmra.mxu0 %v8606_v62  ;;  %v4436_v15 = vsel %vm253_vm7, %v4435_v56, %v4434_v26 }
 0x1fd   : > { %4309 = vmatmul.f32.vlgmr.msrb.gmra.mxu1 %v8604_v12  ;;  %v4438_v47 = vsel %vm256_vm8, %v4437_v43, %v4436_v15 }
 0x1fe   : > { %7190 = vmatpush.msk.msrb.mxu1 %vm7550_vm4, %v7463_v11  ;;  %v3130_v44 = vadd.f32 %v3129_v32, %v3099_v38  ;;  %4342 = vmatmul.f32.vlgmr.msrb.gmra.mxu2 %v8583_v18  ;;  %v4441_v29 = vsel %vm9469_vm2, %v4438_v47, 0  ;;  %vm9470_vm2 = vcmask 1043459  }
 0x1ff   : > { %7194 = vmatpush.msk.msrb.mxu2 %vm7580_vm10, %v7463_v11 }
 0x200   : > { %7191 = vmatpush.msk.msrb.mxu1 %vm7557_vm5, %v7463_v11  ;;  %v3157_v12 = vadd.f32 %v3156_v28, %v3130_v44  ;;  %4369 = vmatmul.f32.vlgmr.msrb.gmra.mxu3 %v8583_v18  ;;  %v8812_v18 = vsub.f32 %v4439_v40, %v8799_v16 }
 0x201   : > { %v3185_v31 = vpop.f32.mrf.mxu0  ;;  %v3254_v46 = vpop.f32.mrf.mxu2  ;;  %4690 = vmatpush.msrb.mxu3 %v7659_v9  ;;  %7195 = vmatpush.msk.msrb.mxu2 %vm7575_vm9, %v7463_v11 }
 0x202   : > { %7105 = vst.msk [vmem:[%s8068_s15 + $0xd8] sm:$0xff] %vm467_vm11, %v3157_v12  ;;  %v3228_v2 = vpop.f32.mrf.mxu1  ;;  %v3225_v10 = vadd.f32 %v3224_v4, %v3185_v31  ;;  %v8820_v6 = vand.u32 4294901760, %v8812_v18 }
 0x203   : > { %v3284_v0 = vpop.f32.mrf.mxu3  ;;  %4696 = vmatpush.msrb.mxu3 %v7690_v27 }
 0x204   : > { %4279 = vmatmul.f32.vlgmr.msrb.gmra.mxu0 %v8596_v59  ;;  %v8822_v59 = vand.u32 4294901760, %v4441_v29  ;;  %v3255_v20 = vadd.f32 %v3254_v46, %v3225_v10  ;;  %v4464_v30 = vsub.f32 %v8812_v18, %v8820_v6 }
 0x205   : > { %4315 = vmatmul.f32.gmra.mxu1 %v8627_v24  ;;  %4592 = vmatpush.msrb.mxu0 %v7610_v33 }
 0x206   : > { %4346 = vmatmul.f32.gmra.mxu2 %v8606_v62  ;;  %v8829_v4 = vsub.f32 %v4441_v29, %v8822_v59  ;;  %v8840_v25 = vand.u32 4294901760, %v4464_v30 }
 0x207   : > { %4596 = vmatpush.msrb.mxu0 %v7613_v34 }
 0x208   : > { %4373 = vmatmul.f32.gmra.mxu3 %v8606_v62  ;;  %v3285_v62 = vadd.f32 %v3284_v0, %v3255_v20  ;;  %v8843_v28 = vand.u32 4294901760, %v8829_v4 }
 0x209   : > { %v3193_v24 = vpop.f32.mrf.mxu0  ;;  %v3259_v21 = vpop.f32.mrf.mxu2 }
 0x20a   : > { %v3344_v1 = vpop.f32.mrf.mxu1  ;;  %v4472_v15 = vsub.f32 %v8829_v4, %v8843_v28 }
 0x20b   : > { %v3290_v32 = vpop.f32.mrf.mxu3 }
 0x20c   : > { %4284 = vmatmul.f32.gmra.mxu0 %v8613_v36  ;;  %v3229_v36 = vadd.f32 %v3228_v2, %v3193_v24  ;;  %v8862_v31 = vand.u32 4294901760, %v4472_v15 }
 0x20d   : > { %4505 = vmatmul.f32.vlgmr.msra.gmra.mxu1 %v8799_v16 }
 0x20e   : > { %7196 = vmatpush.msk.msra.mxu1 %vm7580_vm10, %v7463_v11  ;;  %4535 = vmatmul.f32.vlgmr.msra.gmra.mxu2 %v8812_v18  ;;  %v3260_v44 = vadd.f32 %v3259_v21, %v3229_v36 }
 0x20f   : > { %4785 = vmatpush.msra.mxu2 %v7638_v49 }
 0x210   : > { %7197 = vmatpush.msk.msra.mxu1 %vm7575_vm9, %v7463_v11  ;;  %4565 = vmatmul.f32.vlgmr.msra.gmra.mxu3 %v8820_v6  ;;  %v3291_v12 = vadd.f32 %v3290_v32, %v3260_v44 }
 0x211   : > { %v3317_v19 = vpop.f32.mrf.mxu0  ;;  %v3377_v56 = vpop.f32.mrf.mxu2  ;;  %7198 = vmatpush.msk.msra.mxu3 %vm7580_vm10, %v7463_v11  ;;  %4789 = vmatpush.msra.mxu2 %v7667_v17 }
 0x212   : > { %v3318_v38 = vadd.f32 %v3317_v19, %v3285_v62  ;;  %v3348_v26 = vpop.f32.mrf.mxu1 }
 0x213   : > { %v3416_v40 = vpop.f32.mrf.mxu3  ;;  %7199 = vmatpush.msk.msra.mxu3 %vm7575_vm9, %v7463_v11 }
 0x214   : > { %v3345_v43 = vadd.f32 %v3344_v1, %v3318_v38  ;;  %4466 = vmatmul.f32.vlgmr.msra.gmra.mxu0 %v8840_v25  ;;  %v3417_v24 = vadd.f32 %v3416_v40, %v3377_v56 }
 0x215   : > { %4509 = vmatmul.f32.gmra.mxu1 %v8822_v59  ;;  %4722 = vmatpush.msra.mxu0 %v7617_v37 }
 0x216   : > { %7112 = vst.msk [vmem:[%s8068_s15 + $0xe0] sm:$0xff] %vm467_vm11, %v3345_v43  ;;  %4540 = vmatmul.f32.gmra.mxu2 %v8829_v4 }
 0x217   : > { %4725 = vmatpush.msra.mxu0 %v7622_v41 }
 0x218   : > { %4571 = vmatmul.f32.gmra.mxu3 %v8843_v28 }
 0x219   : > { %v3321_v46 = vpop.f32.mrf.mxu0  ;;  %v3385_v2 = vpop.f32.mrf.mxu2 }
 0x21a   : > { %v3322_v47 = vadd.f32 %v3321_v46, %v3291_v12  ;;  %v3476_v0 = vpop.f32.mrf.mxu1 }
 0x21b   : > { %v3420_v29 = vpop.f32.mrf.mxu3 }
 0x21c   : > { %v3349_v10 = vadd.f32 %v3348_v26, %v3322_v47  ;;  %4474 = vmatmul.f32.gmra.mxu0 %v8862_v31  ;;  %v3421_v19 = vadd.f32 %v3420_v29, %v3385_v2 }
 0x21d   : > { %4625 = vmatmul.f32.vlgmr.msrb.gmra.mxu1 %v8799_v16 }
 0x21e   : > { %4882 = vmatpush.msrb.mxu1 %v7755_v48  ;;  %7113 = vst.msk [vmem:[%s8068_s15 + $0xe8] sm:$0xff] %vm467_vm11, %v3349_v10  ;;  %4659 = vmatmul.f32.vlgmr.msrb.gmra.mxu2 %v8840_v25 }
 0x21f   : > { %4914 = vmatpush.msrb.mxu2 %v7728_v39 }
 0x220   : > { %4888 = vmatpush.msrb.mxu1 %v7775_v53  ;;  %4698 = vmatmul.f32.vlgmr.msrb.gmra.mxu3 %v8799_v16 }
 0x221   : > { %v3446_v21 = vpop.f32.mrf.mxu0  ;;  %v3509_v1 = vpop.f32.mrf.mxu2  ;;  %7204 = vmatpush.msk.msrb.mxu3 %vm7716_vm12, %v7463_v11  ;;  %4917 = vmatpush.msrb.mxu2 %v7757_v50 }
 0x222   : > { %v3447_v32 = vadd.f32 %v3446_v21, %v3417_v24  ;;  %v3482_v20 = vpop.f32.mrf.mxu1 }
 0x223   : > { %v3536_v30 = vpop.f32.mrf.mxu3  ;;  %7205 = vmatpush.msk.msrb.mxu3 %vm7747_vm13, %v7463_v11 }
 0x224   : > { %v3477_v62 = vadd.f32 %v3476_v0, %v3447_v32  ;;  %4598 = vmatmul.f32.vlgmr.msrb.gmra.mxu0 %v8799_v16 }
 0x225   : > { %4629 = vmatmul.f32.gmra.mxu1 %v8822_v59  ;;  %7202 = vmatpush.msk.msrb.mxu0 %vm7716_vm12, %v7463_v11 }
 0x226   : > { %v3510_v36 = vadd.f32 %v3509_v1, %v3477_v62  ;;  %4667 = vmatmul.f32.gmra.mxu2 %v8862_v31 }
 0x227   : > { %7203 = vmatpush.msk.msrb.mxu0 %vm7747_vm13, %v7463_v11 }
 0x228   : > { %v3537_v56 = vadd.f32 %v3536_v30, %v3510_v36  ;;  %4702 = vmatmul.f32.gmra.mxu3 %v8822_v59 }
 0x229   : > { %v3451_v38 = vpop.f32.mrf.mxu0  ;;  %v3513_v26 = vpop.f32.mrf.mxu2 }
 0x22a   : > { %7120 = vst.msk [vmem:[%s8068_s15 + $0xf0] sm:$0xff] %vm467_vm11, %v3537_v56  ;;  %v3452_v40 = vadd.f32 %v3451_v38, %v3421_v19  ;;  %v3673_v44 = vpop.f32.mrf.mxu1  ;;  %v7219_v56 = vld [vmem:[%s7535_s5 + $0x46] sm:$0x1] }
 0x22b   : > { %v3540_v43 = vpop.f32.mrf.mxu3 }
 0x22c   : > { %v3483_v15 = vadd.f32 %v3482_v20, %v3452_v40  ;;  %4602 = vmatmul.f32.gmra.mxu0 %v8822_v59 }
 0x22d   : > { %4758 = vmatmul.f32.vlgmr.msra.gmra.mxu1 %v8820_v6 }
 0x22e   : > { %7206 = vmatpush.msk.msra.mxu1 %vm7716_vm12, %v7463_v11  ;;  %v3514_v12 = vadd.f32 %v3513_v26, %v3483_v15  ;;  %4791 = vmatmul.f32.vlgmr.msra.gmra.mxu2 %v8799_v16  ;;  %v7220_v15 = vld [vmem:[%s7535_s5 + $0x4a] sm:$0x1] }
 0x22f   : > { %7210 = vmatpush.msk.msra.mxu2 %vm7766_vm14, %v7463_v11 }
 0x230   : > { %7207 = vmatpush.msk.msra.mxu1 %vm7747_vm13, %v7463_v11  ;;  %v3541_v46 = vadd.f32 %v3540_v43, %v3514_v12  ;;  %4818 = vmatmul.f32.vlgmr.msra.gmra.mxu3 %v8799_v16  ;;  %v5244_v12 = vrot.slane %v7219_v56, 7 }
 0x231   : > { %v3634_v2 = vpop.f32.mrf.mxu0  ;;  %v3703_v47 = vpop.f32.mrf.mxu2  ;;  %5074 = vmatpush.msra.mxu3 %v7820_v8  ;;  %7211 = vmatpush.msk.msra.mxu2 %vm7786_vm15, %v7463_v11 }
 0x232   : > { %7121 = vst.msk [vmem:[%s8068_s15 + $0xf8] sm:$0xff] %vm467_vm11, %v3541_v46  ;;  %v3677_v0 = vpop.f32.mrf.mxu1  ;;  %v3674_v10 = vadd.f32 %v3673_v44, %v3634_v2  ;;  %v7218_v46 = vld [vmem:[%s7535_s5 + $0x42] sm:$0x1]  ;;  %v7221_v2 = vld [vmem:[%s7535_s5 + $0x4e] sm:$0x1] }
 0x233   : > { %v3733_v29 = vpop.f32.mrf.mxu3  ;;  %5080 = vmatpush.msra.mxu3 %v7831_v63 }
 0x234   : > { %4728 = vmatmul.f32.vlgmr.msra.gmra.mxu0 %v8812_v18  ;;  %v3704_v20 = vadd.f32 %v3703_v47, %v3674_v10  ;;  %v5246_v47 = vrot.slane %v7220_v15, 6 }
 0x235   : > { %4764 = vmatmul.f32.gmra.mxu1 %v8843_v28  ;;  %4977 = vmatpush.msra.mxu0 %v7738_v42 }
 0x236   : > { %4795 = vmatmul.f32.gmra.mxu2 %v8822_v59  ;;  %v3734_v30 = vadd.f32 %v3733_v29, %v3704_v20  ;;  %v5245_v29 = vsel %vm238_vm0, %v5244_v12, %v7218_v46  ;;  %v7226_v12 = vld [vmem:[%s7535_s5 + $0x62] sm:$0x1] }
 0x237   : > { %4981 = vmatpush.msra.mxu0 %v7762_v51  ;;  %v5247_v56 = vsel %vm241_vm1, %v5246_v47, %v5245_v29 }
 0x238   : > { %4822 = vmatmul.f32.gmra.mxu3 %v8822_v59 }
 0x239   : > { %v3642_v24 = vpop.f32.mrf.mxu0  ;;  %v3708_v21 = vpop.f32.mrf.mxu2 }
 0x23a   : > { %v3793_v1 = vpop.f32.mrf.mxu1  ;;  %v3678_v62 = vadd.f32 %v3677_v0, %v3642_v24 }
 0x23b   : > { %v3739_v32 = vpop.f32.mrf.mxu3 }
 0x23c   : > { %4733 = vmatmul.f32.gmra.mxu0 %v8829_v4  ;;  %v3709_v44 = vadd.f32 %v3708_v21, %v3678_v62  ;;  %v7227_v21 = vld [vmem:[%s7535_s5 + $0x66] sm:$0x1]  ;;  %v5248_v62 = vrot.slane %v7221_v2, 5 }
 0x23d   : > { %4890 = vmatmul.f32.vlgmr.msrb.gmra.mxu1 %v8799_v16 }
 0x23e   : > { %7212 = vmatpush.msk.msrb.mxu1 %vm7766_vm14, %v7463_v11  ;;  %4920 = vmatmul.f32.vlgmr.msrb.gmra.mxu2 %v8812_v18  ;;  %v3740_v0 = vadd.f32 %v3739_v32, %v3709_v44  ;;  %v7228_v32 = vld [vmem:[%s7535_s5 + $0x6a] sm:$0x1]  ;;  %v5258_v44 = vrot.slane %v7227_v21, 7  ;;  %v5249_v46 = vsel %vm9470_vm2, %v5248_v62, %v5247_v56 }
 0x23f   : > { %5169 = vmatpush.msrb.mxu2 %v7805_v58  ;;  %v5260_v2 = vrot.slane %v7228_v32, 6 }
 0x240   : > { %7213 = vmatpush.msk.msrb.mxu1 %vm7786_vm15, %v7463_v11  ;;  %4950 = vmatmul.f32.vlgmr.msrb.gmra.mxu3 %v8820_v6 }
 0x241   : > { %v3766_v36 = vpop.f32.mrf.mxu0  ;;  %v3827_v19 = vpop.f32.mrf.mxu2  ;;  %7214 = vmatpush.msk.msrb.mxu3 %vm7766_vm14, %v7463_v11  ;;  %5173 = vmatpush.msrb.mxu2 %v7816_v61 }
 0x242   : > { %v3767_v38 = vadd.f32 %v3766_v36, %v3734_v30  ;;  %v3797_v26 = vpop.f32.mrf.mxu1  ;;  %v7222_v30 = vld [vmem:[%s7535_s5 + $0x52] sm:$0x1] }
 0x243   : > { %v3866_v40 = vpop.f32.mrf.mxu3  ;;  %7215 = vmatpush.msk.msrb.mxu3 %vm7786_vm15, %v7463_v11  ;;  %v5250_v15 = vrot.slane %v7222_v30, 4 }
 0x244   : > { %v3794_v43 = vadd.f32 %v3793_v1, %v3767_v38  ;;  %4851 = vmatmul.f32.vlgmr.msrb.gmra.mxu0 %v8840_v25  ;;  %v3867_v47 = vadd.f32 %v3866_v40, %v3827_v19  ;;  %v7230_v40 = vld [vmem:[%s7535_s5 + $0x72] sm:$0x1] }
 0x245   : > { %4894 = vmatmul.f32.gmra.mxu1 %v8822_v59  ;;  %5106 = vmatpush.msrb.mxu0 %v7795_v57 }
 0x246   : > { %7144 = vst.msk [vmem:[%s8068_s15 + $0x100] sm:$0xff] %vm467_vm11, %v3794_v43  ;;  %4925 = vmatmul.f32.gmra.mxu2 %v8829_v4  ;;  %v7223_v43 = vld [vmem:[%s7535_s5 + $0x56] sm:$0x1] }
 0x247   : > { %5109 = vmatpush.msrb.mxu0 %v7813_v60  ;;  %v5252_v29 = vrot.slane %v7223_v43, 3 }
 0x248   : > { %4956 = vmatmul.f32.gmra.mxu3 %v8843_v28 }
 0x249   : > { %v3770_v10 = vpop.f32.mrf.mxu0  ;;  %v3835_v24 = vpop.f32.mrf.mxu2 }
 0x24a   : > { %v3771_v1 = vadd.f32 %v3770_v10, %v3740_v0  ;;  %v3926_v20 = vpop.f32.mrf.mxu1  ;;  %v7224_v0 = vld [vmem:[%s7535_s5 + $0x5a] sm:$0x1]  ;;  %v5259_v10 = vsel %vm238_vm0, %v5258_v44, %v7226_v12  ;;  %v7231_v12 = vld [vmem:[%s7535_s5 + $0x76] sm:$0x1] }
 0x24b   : > { %v3870_v36 = vpop.f32.mrf.mxu3  ;;  %v5254_v32 = vrot.slane %v7224_v0, 2  ;;  %v5261_v44 = vsel %vm241_vm1, %v5260_v2, %v5259_v10  ;;  %v7232_v10 = vld [vmem:[%s7535_s5 + $0x7a] sm:$0x1] }
 0x24c   : > { %v3798_v38 = vadd.f32 %v3797_v26, %v3771_v1  ;;  %4859 = vmatmul.f32.gmra.mxu0 %v8862_v31  ;;  %v7229_v26 = vld [vmem:[%s7535_s5 + $0x6e] sm:$0x1]  ;;  %v3871_v0 = vadd.f32 %v3870_v36, %v3835_v24 }
 0x24d   : > { %5010 = vmatmul.f32.vlgmr.msra.gmra.mxu1 %v8799_v16  ;;  %v5262_v62 = vrot.slane %v7229_v26, 5 }
 0x24e   : > { %5330 = vmatpush.msra.mxu1 %v7642_v54  ;;  %7145 = vst.msk [vmem:[%s8068_s15 + $0x108] sm:$0xff] %vm467_vm11, %v3798_v38  ;;  %5043 = vmatmul.f32.vlgmr.msra.gmra.mxu2 %v8840_v25  ;;  %v5251_v25 = vsel %vm247_vm3, %v5250_v15, %v5249_v46  ;;  %v7225_v38 = vld [vmem:[%s7535_s5 + $0x5e] sm:$0x1]  ;;  %v5264_v46 = vrot.slane %v7230_v40, 4 }
 0x24f   : > { %5362 = vmatpush.msra.mxu2 %v7601_v22  ;;  %v5253_v15 = vsel %vm250_vm6, %v5252_v29, %v5251_v25 }
 0x250   : > { %5336 = vmatpush.msra.mxu1 %v7644_v55  ;;  %5082 = vmatmul.f32.vlgmr.msra.gmra.mxu3 %v8799_v16  ;;  %v5255_v2 = vsel %vm253_vm7, %v5254_v32, %v5253_v15 }
 0x251   : > { %v3896_v21 = vpop.f32.mrf.mxu0  ;;  %v3959_v1 = vpop.f32.mrf.mxu2  ;;  %7236 = vmatpush.msk.msra.mxu3 %vm7550_vm4, %v7463_v11  ;;  %5365 = vmatpush.msra.mxu2 %v7603_v23 }
 0x252   : > { %v3897_v30 = vadd.f32 %v3896_v21, %v3867_v47  ;;  %v3932_v19 = vpop.f32.mrf.mxu1  ;;  %v5256_v47 = vrot.slane %v7225_v38, 1  ;;  %v5266_v21 = vrot.slane %v7231_v12, 3 }
 0x253   : > { %v3986_v56 = vpop.f32.mrf.mxu3  ;;  %7237 = vmatpush.msk.msra.mxu3 %vm7557_vm5, %v7463_v11 }
 0x254   : > { %v3927_v43 = vadd.f32 %v3926_v20, %v3897_v30  ;;  %4983 = vmatmul.f32.vlgmr.msra.gmra.mxu0 %v8799_v16  ;;  %v5263_v20 = vsel %vm9470_vm2, %v5262_v62, %v5261_v44  ;;  %v5257_v62 = vsel %vm256_vm8, %v5256_v47, %v5255_v2  ;;  %v7233_v44 = vld [vmem:[%s7535_s5 + $0x7e] sm:$0x1]  ;;  %vm9471_vm2 = vcmask 130048  }
 0x255   : > { %5014 = vmatmul.f32.gmra.mxu1 %v8822_v59  ;;  %7234 = vmatpush.msk.msra.mxu0 %vm7550_vm4, %v7463_v11  ;;  %v5272_v36 = vsel %vm9471_vm2, %v5257_v62, 0  ;;  %v5270_v15 = vrot.slane %v7233_v44, 1 }
 0x256   : > { %v3960_v26 = vadd.f32 %v3959_v1, %v3927_v43  ;;  %5051 = vmatmul.f32.gmra.mxu2 %v8862_v31  ;;  %v5265_v31 = vsel %vm247_vm3, %v5264_v46, %v5263_v20  ;;  %v5268_v43 = vrot.slane %v7232_v10, 2  ;;  %v9015_v12 = vand.u32 4294901760, %v5272_v36 }
 0x257   : > { %7235 = vmatpush.msk.msra.mxu0 %vm7557_vm5, %v7463_v11  ;;  %v5267_v24 = vsel %vm250_vm6, %v5266_v21, %v5265_v31 }
 0x258   : > { %v3987_v29 = vadd.f32 %v3986_v56, %v3960_v26  ;;  %5086 = vmatmul.f32.gmra.mxu3 %v8822_v59 }
 0x259   : > { %v3901_v25 = vpop.f32.mrf.mxu0  ;;  %v3963_v1 = vpop.f32.mrf.mxu2 }
 0x25a   : > { %7152 = vst.msk [vmem:[%s8068_s15 + $0x110] sm:$0xff] %vm467_vm11, %v3987_v29  ;;  %v3902_v30 = vadd.f32 %v3901_v25, %v3871_v0  ;;  %v4058_v40 = vpop.f32.mrf.mxu1 }
 0x25b   : > { %v3990_v38 = vpop.f32.mrf.mxu3 }
 0x25c   : > { %v3933_v32 = vadd.f32 %v3932_v19, %v3902_v30  ;;  %4987 = vmatmul.f32.gmra.mxu0 %v8822_v59  ;;  %v5269_v19 = vsel %vm253_vm7, %v5268_v43, %v5267_v24 }
 0x25d   : > { %5142 = vmatmul.f32.vlgmr.msrb.gmra.mxu1 %v8820_v6  ;;  %v5271_v20 = vsel %vm256_vm8, %v5270_v15, %v5269_v19 }
 0x25e   : > { %7238 = vmatpush.msk.msrb.mxu1 %vm7550_vm4, %v7463_v11  ;;  %v3964_v56 = vadd.f32 %v3963_v1, %v3933_v32  ;;  %5175 = vmatmul.f32.vlgmr.msrb.gmra.mxu2 %v8799_v16  ;;  %v5274_v0 = vsel %vm9471_vm2, %v5271_v20, 0  ;;  %vm9472_vm2 = vcmask 1043459  }
 0x25f   : > { %7242 = vmatpush.msk.msrb.mxu2 %vm7580_vm10, %v7463_v11 }
 0x260   : > { %7239 = vmatpush.msk.msrb.mxu1 %vm7557_vm5, %v7463_v11  ;;  %v3991_v6 = vadd.f32 %v3990_v38, %v3964_v56  ;;  %5202 = vmatmul.f32.vlgmr.msrb.gmra.mxu3 %v8799_v16  ;;  %v9028_v16 = vsub.f32 %v5272_v36, %v9015_v12 }
 0x261   : > { %v4019_v46 = vpop.f32.mrf.mxu0  ;;  %v4088_v26 = vpop.f32.mrf.mxu2  ;;  %5523 = vmatpush.msrb.mxu3 %v7659_v9  ;;  %7243 = vmatpush.msk.msrb.mxu2 %vm7575_vm9, %v7463_v11 }
 0x262   : > { %7153 = vst.msk [vmem:[%s8068_s15 + $0x118] sm:$0xff] %vm467_vm11, %v3991_v6  ;;  %v4062_v47 = vpop.f32.mrf.mxu1  ;;  %v4059_v29 = vadd.f32 %v4058_v40, %v4019_v46  ;;  %v9036_v10 = vand.u32 4294901760, %v9028_v16 }
 0x263   : > { %v4118_v2 = vpop.f32.mrf.mxu3  ;;  %5529 = vmatpush.msrb.mxu3 %v7690_v27 }
 0x264   : > { %5112 = vmatmul.f32.vlgmr.msrb.gmra.mxu0 %v8812_v18  ;;  %v9038_v18 = vand.u32 4294901760, %v5274_v0  ;;  %v4089_v31 = vadd.f32 %v4088_v26, %v4059_v29  ;;  %v5297_v30 = vsub.f32 %v9028_v16, %v9036_v10 }
 0x265   : > { %5148 = vmatmul.f32.gmra.mxu1 %v8843_v28  ;;  %5425 = vmatpush.msrb.mxu0 %v7610_v33 }
 0x266   : > { %5179 = vmatmul.f32.gmra.mxu2 %v8822_v59  ;;  %v9045_v40 = vsub.f32 %v5274_v0, %v9038_v18  ;;  %v9056_v62 = vand.u32 4294901760, %v5297_v30 }
 0x267   : > { %5429 = vmatpush.msrb.mxu0 %v7613_v34 }
 0x268   : > { %5206 = vmatmul.f32.gmra.mxu3 %v8822_v59  ;;  %v4119_v59 = vadd.f32 %v4118_v2, %v4089_v31  ;;  %v9059_v38 = vand.u32 4294901760, %v9045_v40 }
 0x269   : > { %v4027_v28 = vpop.f32.mrf.mxu0  ;;  %v4093_v21 = vpop.f32.mrf.mxu2 }
 0x26a   : > { %v4178_v25 = vpop.f32.mrf.mxu1  ;;  %v5305_v19 = vsub.f32 %v9045_v40, %v9059_v38 }
 0x26b   : > { %v4124_v1 = vpop.f32.mrf.mxu3 }
 0x26c   : > { %5117 = vmatmul.f32.gmra.mxu0 %v8829_v4  ;;  %v4063_v4 = vadd.f32 %v4062_v47, %v4027_v28  ;;  %v9078_v46 = vand.u32 4294901760, %v5305_v19 }
 0x26d   : > { %5338 = vmatmul.f32.vlgmr.msra.gmra.mxu1 %v9015_v12 }
 0x26e   : > { %7244 = vmatpush.msk.msra.mxu1 %vm7580_vm10, %v7463_v11  ;;  %5368 = vmatmul.f32.vlgmr.msra.gmra.mxu2 %v9028_v16  ;;  %v4094_v56 = vadd.f32 %v4093_v21, %v4063_v4 }
 0x26f   : > { %5618 = vmatpush.msra.mxu2 %v7638_v49 }
 0x270   : > { %7245 = vmatpush.msk.msra.mxu1 %vm7575_vm9, %v7463_v11  ;;  %5398 = vmatmul.f32.vlgmr.msra.gmra.mxu3 %v9036_v10  ;;  %v4125_v6 = vadd.f32 %v4124_v1, %v4094_v56 }
 0x271   : > { %v4151_v44 = vpop.f32.mrf.mxu0  ;;  %v4211_v43 = vpop.f32.mrf.mxu2  ;;  %7246 = vmatpush.msk.msra.mxu3 %vm7580_vm10, %v7463_v11  ;;  %5622 = vmatpush.msra.mxu2 %v7667_v17 }
 0x272   : > { %v4152_v32 = vadd.f32 %v4151_v44, %v4119_v59  ;;  %v4182_v24 = vpop.f32.mrf.mxu1 }
 0x273   : > { %v4250_v36 = vpop.f32.mrf.mxu3  ;;  %7247 = vmatpush.msk.msra.mxu3 %vm7575_vm9, %v7463_v11 }
 0x274   : > { %v4179_v15 = vadd.f32 %v4178_v25, %v4152_v32  ;;  %5299 = vmatmul.f32.vlgmr.msra.gmra.mxu0 %v9056_v62  ;;  %v4251_v28 = vadd.f32 %v4250_v36, %v4211_v43 }
 0x275   : > { %5342 = vmatmul.f32.gmra.mxu1 %v9038_v18  ;;  %5555 = vmatpush.msra.mxu0 %v7617_v37 }
 0x276   : > { %7160 = vst.msk [vmem:[%s8068_s15 + $0x120] sm:$0xff] %vm467_vm11, %v4179_v15  ;;  %5373 = vmatmul.f32.gmra.mxu2 %v9045_v40 }
 0x277   : > { %5558 = vmatpush.msra.mxu0 %v7622_v41 }
 0x278   : > { %5404 = vmatmul.f32.gmra.mxu3 %v9059_v38 }
 0x279   : > { %v4155_v26 = vpop.f32.mrf.mxu0  ;;  %v4219_v47 = vpop.f32.mrf.mxu2 }
 0x27a   : > { %v4156_v20 = vadd.f32 %v4155_v26, %v4125_v6  ;;  %v4310_v2 = vpop.f32.mrf.mxu1 }
 0x27b   : > { %v4254_v0 = vpop.f32.mrf.mxu3 }
 0x27c   : > { %v4183_v29 = vadd.f32 %v4182_v24, %v4156_v20  ;;  %5307 = vmatmul.f32.gmra.mxu0 %v9078_v46  ;;  %v4255_v44 = vadd.f32 %v4254_v0, %v4219_v47 }
 0x27d   : > { %5458 = vmatmul.f32.vlgmr.msrb.gmra.mxu1 %v9015_v12 }
 0x27e   : > { %5715 = vmatpush.msrb.mxu1 %v7755_v48  ;;  %7161 = vst.msk [vmem:[%s8068_s15 + $0x128] sm:$0xff] %vm467_vm11, %v4183_v29  ;;  %5492 = vmatmul.f32.vlgmr.msrb.gmra.mxu2 %v9056_v62 }
 0x27f   : > { %5747 = vmatpush.msrb.mxu2 %v7728_v39 }
 0x280   : > { %5721 = vmatpush.msrb.mxu1 %v7775_v53  ;;  %5531 = vmatmul.f32.vlgmr.msrb.gmra.mxu3 %v9015_v12 }
 0x281   : > { %v4280_v21 = vpop.f32.mrf.mxu0  ;;  %v4343_v25 = vpop.f32.mrf.mxu2  ;;  %7252 = vmatpush.msk.msrb.mxu3 %vm7716_vm12, %v7463_v11  ;;  %5750 = vmatpush.msrb.mxu2 %v7757_v50 }
 0x282   : > { %v4281_v1 = vadd.f32 %v4280_v21, %v4251_v28  ;;  %v4316_v31 = vpop.f32.mrf.mxu1 }
 0x283   : > { %v4370_v30 = vpop.f32.mrf.mxu3  ;;  %7253 = vmatpush.msk.msrb.mxu3 %vm7747_vm13, %v7463_v11 }
 0x284   : > { %v4311_v59 = vadd.f32 %v4310_v2, %v4281_v1  ;;  %5431 = vmatmul.f32.vlgmr.msrb.gmra.mxu0 %v9015_v12 }
 0x285   : > { %5462 = vmatmul.f32.gmra.mxu1 %v9038_v18  ;;  %7250 = vmatpush.msk.msrb.mxu0 %vm7716_vm12, %v7463_v11 }
 0x286   : > { %v4344_v4 = vadd.f32 %v4343_v25, %v4311_v59  ;;  %5500 = vmatmul.f32.gmra.mxu2 %v9078_v46 }
 0x287   : > { %7251 = vmatpush.msk.msrb.mxu0 %vm7747_vm13, %v7463_v11 }
 0x288   : > { %v4371_v43 = vadd.f32 %v4370_v30, %v4344_v4  ;;  %5535 = vmatmul.f32.gmra.mxu3 %v9038_v18 }
 0x289   : > { %v4285_v32 = vpop.f32.mrf.mxu0  ;;  %v4347_v24 = vpop.f32.mrf.mxu2 }
 0x28a   : > { %7168 = vst.msk [vmem:[%s8068_s15 + $0x130] sm:$0xff] %vm467_vm11, %v4371_v43  ;;  %v4286_v36 = vadd.f32 %v4285_v32, %v4255_v44  ;;  %v4506_v56 = vpop.f32.mrf.mxu1  ;;  %v7267_v43 = vld [vmem:[%s7535_s5 + $0x47] sm:$0x1] }
 0x28b   : > { %v4374_v15 = vpop.f32.mrf.mxu3 }
 0x28c   : > { %v4317_v19 = vadd.f32 %v4316_v31, %v4286_v36  ;;  %5435 = vmatmul.f32.gmra.mxu0 %v9038_v18 }
 0x28d   : > { %5591 = vmatmul.f32.vlgmr.msra.gmra.mxu1 %v9036_v10 }
 0x28e   : > { %7254 = vmatpush.msk.msra.mxu1 %vm7716_vm12, %v7463_v11  ;;  %v4348_v6 = vadd.f32 %v4347_v24, %v4317_v19  ;;  %5624 = vmatmul.f32.vlgmr.msra.gmra.mxu2 %v9015_v12  ;;  %v7268_v19 = vld [vmem:[%s7535_s5 + $0x4b] sm:$0x1] }
 0x28f   : > { %7258 = vmatpush.msk.msra.mxu2 %vm7766_vm14, %v7463_v11 }
 0x290   : > { %7255 = vmatpush.msk.msra.mxu1 %vm7747_vm13, %v7463_v11  ;;  %v4375_v26 = vadd.f32 %v4374_v15, %v4348_v6  ;;  %5651 = vmatmul.f32.vlgmr.msra.gmra.mxu3 %v9015_v12  ;;  %v6077_v6 = vrot.slane %v7267_v43, 7 }
 0x291   : > { %v4467_v47 = vpop.f32.mrf.mxu0  ;;  %v4536_v20 = vpop.f32.mrf.mxu2  ;;  %5907 = vmatpush.msra.mxu3 %v7820_v8  ;;  %7259 = vmatpush.msk.msra.mxu2 %vm7786_vm15, %v7463_v11 }
 0x292   : > { %7169 = vst.msk [vmem:[%s8068_s15 + $0x138] sm:$0xff] %vm467_vm11, %v4375_v26  ;;  %v4510_v2 = vpop.f32.mrf.mxu1  ;;  %v4507_v29 = vadd.f32 %v4506_v56, %v4467_v47  ;;  %v7266_v26 = vld [vmem:[%s7535_s5 + $0x43] sm:$0x1]  ;;  %v7269_v47 = vld [vmem:[%s7535_s5 + $0x4f] sm:$0x1] }
 0x293   : > { %v4566_v0 = vpop.f32.mrf.mxu3  ;;  %5913 = vmatpush.msra.mxu3 %v7831_v63 }
 0x294   : > { %5561 = vmatmul.f32.vlgmr.msra.gmra.mxu0 %v9028_v16  ;;  %v4537_v31 = vadd.f32 %v4536_v20, %v4507_v29  ;;  %v6079_v20 = vrot.slane %v7268_v19, 6 }
 0x295   : > { %5597 = vmatmul.f32.gmra.mxu1 %v9059_v38  ;;  %5810 = vmatpush.msra.mxu0 %v7738_v42 }
 0x296   : > { %5628 = vmatmul.f32.gmra.mxu2 %v9038_v18  ;;  %v4567_v30 = vadd.f32 %v4566_v0, %v4537_v31  ;;  %v6078_v0 = vsel %vm238_vm0, %v6077_v6, %v7266_v26  ;;  %v7274_v6 = vld [vmem:[%s7535_s5 + $0x63] sm:$0x1] }
 0x297   : > { %5814 = vmatpush.msra.mxu0 %v7762_v51  ;;  %v6080_v43 = vsel %vm241_vm1, %v6079_v20, %v6078_v0 }
 0x298   : > { %5655 = vmatmul.f32.gmra.mxu3 %v9038_v18 }
 0x299   : > { %v4475_v28 = vpop.f32.mrf.mxu0  ;;  %v4541_v21 = vpop.f32.mrf.mxu2 }
 0x29a   : > { %v4626_v25 = vpop.f32.mrf.mxu1  ;;  %v4511_v59 = vadd.f32 %v4510_v2, %v4475_v28 }
 0x29b   : > { %v4572_v1 = vpop.f32.mrf.mxu3 }
 0x29c   : > { %5566 = vmatmul.f32.gmra.mxu0 %v9045_v40  ;;  %v4542_v56 = vadd.f32 %v4541_v21, %v4511_v59  ;;  %v7275_v21 = vld [vmem:[%s7535_s5 + $0x67] sm:$0x1]  ;;  %v6081_v59 = vrot.slane %v7269_v47, 5 }
 0x29d   : > { %5723 = vmatmul.f32.vlgmr.msrb.gmra.mxu1 %v9015_v12 }
 0x29e   : > { %7260 = vmatpush.msk.msrb.mxu1 %vm7766_vm14, %v7463_v11  ;;  %5753 = vmatmul.f32.vlgmr.msrb.gmra.mxu2 %v9028_v16  ;;  %v4573_v2 = vadd.f32 %v4572_v1, %v4542_v56  ;;  %v7276_v1 = vld [vmem:[%s7535_s5 + $0x6b] sm:$0x1]  ;;  %v6091_v56 = vrot.slane %v7275_v21, 7  ;;  %v6082_v26 = vsel %vm9472_vm2, %v6081_v59, %v6080_v43 }
 0x29f   : > { %6002 = vmatpush.msrb.mxu2 %v7805_v58  ;;  %v6093_v47 = vrot.slane %v7276_v1, 6  ;;  %v7279_v1 = vld [vmem:[%s7535_s5 + $0x77] sm:$0x1] }
 0x2a0   : > { %7261 = vmatpush.msk.msrb.mxu1 %vm7786_vm15, %v7463_v11  ;;  %5783 = vmatmul.f32.vlgmr.msrb.gmra.mxu3 %v9036_v10  ;;  %v6092_v0 = vsel %vm238_vm0, %v6091_v56, %v7274_v6  ;;  %vm9473_vm0 = vmmov %vm9472_vm2 }
 0x2a1   : > { %v4599_v4 = vpop.f32.mrf.mxu0  ;;  %v4660_v44 = vpop.f32.mrf.mxu2  ;;  %7262 = vmatpush.msk.msrb.mxu3 %vm7766_vm14, %v7463_v11  ;;  %6006 = vmatpush.msrb.mxu2 %v7816_v61  ;;  %v6094_v43 = vsel %vm241_vm1, %v6093_v47, %v6092_v0  ;;  %v7280_v47 = vld [vmem:[%s7535_s5 + $0x7b] sm:$0x1]  ;;  %vm9474_vm1 = vcmask 130048  }
 0x2a2   : > { %v4600_v32 = vadd.f32 %v4599_v4, %v4567_v30  ;;  %v4630_v24 = vpop.f32.mrf.mxu1  ;;  %v7270_v30 = vld [vmem:[%s7535_s5 + $0x53] sm:$0x1] }
 0x2a3   : > { %v4699_v36 = vpop.f32.mrf.mxu3  ;;  %7263 = vmatpush.msk.msrb.mxu3 %vm7786_vm15, %v7463_v11  ;;  %v6083_v19 = vrot.slane %v7270_v30, 4  ;;  %v7273_v30 = vld [vmem:[%s7535_s5 + $0x5f] sm:$0x1] }
 0x2a4   : > { %v4627_v15 = vadd.f32 %v4626_v25, %v4600_v32  ;;  %5684 = vmatmul.f32.vlgmr.msrb.gmra.mxu0 %v9056_v62  ;;  %v4700_v20 = vadd.f32 %v4699_v36, %v4660_v44  ;;  %v7278_v44 = vld [vmem:[%s7535_s5 + $0x73] sm:$0x1] }
 0x2a5   : > { %5727 = vmatmul.f32.gmra.mxu1 %v9038_v18  ;;  %5939 = vmatpush.msrb.mxu0 %v7795_v57  ;;  %v6097_v56 = vrot.slane %v7278_v44, 4  ;;  %v6101_v44 = vrot.slane %v7280_v47, 2 }
 0x2a6   : > { %7192 = vst.msk [vmem:[%s8068_s15 + $0x140] sm:$0xff] %vm467_vm11, %v4627_v15  ;;  %5758 = vmatmul.f32.gmra.mxu2 %v9045_v40  ;;  %v7271_v15 = vld [vmem:[%s7535_s5 + $0x57] sm:$0x1] }
 0x2a7   : > { %5942 = vmatpush.msrb.mxu0 %v7813_v60 }
 0x2a8   : > { %5789 = vmatmul.f32.gmra.mxu3 %v9059_v38 }
 0x2a9   : > { %v4603_v29 = vpop.f32.mrf.mxu0  ;;  %v4668_v28 = vpop.f32.mrf.mxu2 }
 0x2aa   : > { %v4604_v25 = vadd.f32 %v4603_v29, %v4573_v2  ;;  %v4759_v31 = vpop.f32.mrf.mxu1  ;;  %v6085_v2 = vrot.slane %v7271_v15, 3 }
 0x2ab   : > { %v4703_v4 = vpop.f32.mrf.mxu3 }
 0x2ac   : > { %v4631_v32 = vadd.f32 %v4630_v24, %v4604_v25  ;;  %5692 = vmatmul.f32.gmra.mxu0 %v9078_v46  ;;  %v7277_v24 = vld [vmem:[%s7535_s5 + $0x6f] sm:$0x1] }
 0x2ad   : > { %5843 = vmatmul.f32.vlgmr.msra.gmra.mxu1 %v9015_v12  ;;  %v6095_v36 = vrot.slane %v7277_v24, 5 }
 0x2ae   : > { %6163 = vmatpush.msra.mxu1 %v7642_v54  ;;  %7193 = vst.msk [vmem:[%s8068_s15 + $0x148] sm:$0xff] %vm467_vm11, %v4631_v32  ;;  %5876 = vmatmul.f32.vlgmr.msra.gmra.mxu2 %v9056_v62  ;;  %v7272_v54 = vld [vmem:[%s7535_s5 + $0x5b] sm:$0x1] }
 0x2af   : > { %6195 = vmatpush.msra.mxu2 %v7601_v22  ;;  %v6084_v22 = vsel %vm247_vm3, %v6083_v19, %v6082_v26  ;;  %v6087_v59 = vrot.slane %v7272_v54, 2  ;;  %v6089_v19 = vrot.slane %v7273_v30, 1  ;;  %v4704_v26 = vadd.f32 %v4703_v4, %v4668_v28 }
 0x2b0   : > { %6169 = vmatpush.msra.mxu1 %v7644_v55  ;;  %5915 = vmatmul.f32.vlgmr.msra.gmra.mxu3 %v9015_v12 }
 0x2b1   : > { %v4729_v29 = vpop.f32.mrf.mxu0  ;;  %v4792_v21 = vpop.f32.mrf.mxu2  ;;  %7284 = vmatpush.msk.msra.mxu3 %vm7550_vm4, %v7463_v11  ;;  %6198 = vmatpush.msra.mxu2 %v7603_v23  ;;  %v6086_v23 = vsel %vm250_vm6, %v6085_v2, %v6084_v22 }
 0x2b2   : > { %v4730_v55 = vadd.f32 %v4729_v29, %v4700_v20  ;;  %v4765_v62 = vpop.f32.mrf.mxu1  ;;  %v6088_v6 = vsel %vm253_vm7, %v6087_v59, %v6086_v23  ;;  %v6099_v20 = vrot.slane %v7279_v1, 3 }
 0x2b3   : > { %v4819_v25 = vpop.f32.mrf.mxu3  ;;  %7285 = vmatpush.msk.msra.mxu3 %vm7557_vm5, %v7463_v11 }
 0x2b4   : > { %v4760_v32 = vadd.f32 %v4759_v31, %v4730_v55  ;;  %5816 = vmatmul.f32.vlgmr.msra.gmra.mxu0 %v9015_v12  ;;  %v6096_v31 = vsel %vm9473_vm0, %v6095_v36, %v6094_v43  ;;  %v7281_v55 = vld [vmem:[%s7535_s5 + $0x7f] sm:$0x1] }
 0x2b5   : > { %5847 = vmatmul.f32.gmra.mxu1 %v9038_v18  ;;  %7282 = vmatpush.msk.msra.mxu0 %vm7550_vm4, %v7463_v11  ;;  %v6103_v30 = vrot.slane %v7281_v55, 1 }
 0x2b6   : > { %v4793_v15 = vadd.f32 %v4792_v21, %v4760_v32  ;;  %5884 = vmatmul.f32.gmra.mxu2 %v9078_v46  ;;  %v6098_v46 = vsel %vm247_vm3, %v6097_v56, %v6096_v31  ;;  %v6090_v21 = vsel %vm256_vm8, %v6089_v19, %v6088_v6  ;;  %vm9475_vm3 = vmmov %vm9474_vm1 }
 0x2b7   : > { %7283 = vmatpush.msk.msra.mxu0 %vm7557_vm5, %v7463_v11  ;;  %v6100_v28 = vsel %vm250_vm6, %v6099_v20, %v6098_v46  ;;  %v6105_v4 = vsel %vm9474_vm1, %v6090_v21, 0 }
 0x2b8   : > { %v4820_v24 = vadd.f32 %v4819_v25, %v4793_v15  ;;  %5919 = vmatmul.f32.gmra.mxu3 %v9038_v18  ;;  %v9231_v59 = vand.u32 4294901760, %v6105_v4 }
 0x2b9   : > { %v4734_v54 = vpop.f32.mrf.mxu0  ;;  %v4796_v2 = vpop.f32.mrf.mxu2 }
 0x2ba   : > { %7200 = vst.msk [vmem:[%s8068_s15 + $0x150] sm:$0xff] %vm467_vm11, %v4820_v24  ;;  %v4735_v0 = vadd.f32 %v4734_v54, %v4704_v26  ;;  %v4891_v29 = vpop.f32.mrf.mxu1 }
 0x2bb   : > { %v4823_v22 = vpop.f32.mrf.mxu3 }
 0x2bc   : > { %v4766_v36 = vadd.f32 %v4765_v62, %v4735_v0  ;;  %5820 = vmatmul.f32.gmra.mxu0 %v9038_v18  ;;  %v6102_v62 = vsel %vm253_vm7, %v6101_v44, %v6100_v28 }
 0x2bd   : > { %5975 = vmatmul.f32.vlgmr.msrb.gmra.mxu1 %v9036_v10  ;;  %v6104_v23 = vsel %vm256_vm8, %v6103_v30, %v6102_v62 }
 0x2be   : > { %7286 = vmatpush.msk.msrb.mxu1 %vm7550_vm4, %v7463_v11  ;;  %v4797_v25 = vadd.f32 %v4796_v2, %v4766_v36  ;;  %6008 = vmatmul.f32.vlgmr.msrb.gmra.mxu2 %v9015_v12 }
 0x2bf   : > { %7290 = vmatpush.msk.msrb.mxu2 %vm7580_vm10, %v7463_v11 }
 0x2c0   : > { %7287 = vmatpush.msk.msrb.mxu1 %vm7557_vm5, %v7463_v11  ;;  %v4824_v10 = vadd.f32 %v4823_v22, %v4797_v25  ;;  %6035 = vmatmul.f32.vlgmr.msrb.gmra.mxu3 %v9015_v12  ;;  %v9244_v12 = vsub.f32 %v6105_v4, %v9231_v59 }
 0x2c1   : > { %v4852_v5 = vpop.f32.mrf.mxu0  ;;  %v4921_v43 = vpop.f32.mrf.mxu2  ;;  %6356 = vmatpush.msrb.mxu3 %v7659_v9  ;;  %7291 = vmatpush.msk.msrb.mxu2 %vm7575_vm9, %v7463_v11  ;;  %v6107_v9 = vsel %vm9475_vm3, %v6104_v23, 0 }
 0x2c2   : > { %7201 = vst.msk [vmem:[%s8068_s15 + $0x158] sm:$0xff] %vm467_vm11, %v4824_v10  ;;  %v4895_v32 = vpop.f32.mrf.mxu1  ;;  %v4892_v1 = vadd.f32 %v4891_v29, %v4852_v5 }
 0x2c3   : > { %v4951_v7 = vpop.f32.mrf.mxu3  ;;  %6362 = vmatpush.msrb.mxu3 %v7690_v27  ;;  %v9252_v27 = vand.u32 4294901760, %v9244_v12 }
 0x2c4   : > { %5945 = vmatmul.f32.vlgmr.msrb.gmra.mxu0 %v9028_v16  ;;  %v9254_v16 = vand.u32 4294901760, %v6107_v9  ;;  %v4922_v31 = vadd.f32 %v4921_v43, %v4892_v1 }
 0x2c5   : > { %5981 = vmatmul.f32.gmra.mxu1 %v9059_v38  ;;  %6258 = vmatpush.msrb.mxu0 %v7610_v33  ;;  %v6130_v33 = vsub.f32 %v9244_v12, %v9252_v27 }
 0x2c6   : > { %6012 = vmatmul.f32.gmra.mxu2 %v9038_v18 }
 0x2c7   : > { %6262 = vmatpush.msrb.mxu0 %v7613_v34  ;;  %v9261_v34 = vsub.f32 %v6107_v9, %v9254_v16  ;;  %v9272_v6 = vand.u32 4294901760, %v6130_v33 }
 0x2c8   : > { %6039 = vmatmul.f32.gmra.mxu3 %v9038_v18  ;;  %v4952_v18 = vadd.f32 %v4951_v7, %v4922_v31 }
 0x2c9   : > { %v4860_v38 = vpop.f32.mrf.mxu0  ;;  %v4926_v56 = vpop.f32.mrf.mxu2  ;;  %v9275_v26 = vand.u32 4294901760, %v9261_v34 }
 0x2ca   : > { %v5011_v15 = vpop.f32.mrf.mxu1 }
 0x2cb   : > { %v4957_v19 = vpop.f32.mrf.mxu3  ;;  %v6138_v0 = vsub.f32 %v9261_v34, %v9275_v26 }
 0x2cc   : > { %5950 = vmatmul.f32.gmra.mxu0 %v9045_v40  ;;  %v4896_v40 = vadd.f32 %v4895_v32, %v4860_v38 }
 0x2cd   : > { %6171 = vmatmul.f32.vlgmr.msra.gmra.mxu1 %v9231_v59  ;;  %v9294_v14 = vand.u32 4294901760, %v6138_v0 }
 0x2ce   : > { %7292 = vmatpush.msk.msra.mxu1 %vm7580_vm10, %v7463_v11  ;;  %6201 = vmatmul.f32.vlgmr.msra.gmra.mxu2 %v9244_v12  ;;  %v4927_v2 = vadd.f32 %v4926_v56, %v4896_v40 }
 0x2cf   : > { %6451 = vmatpush.msra.mxu2 %v7638_v49 }
 0x2d0   : > { %7293 = vmatpush.msk.msra.mxu1 %vm7575_vm9, %v7463_v11  ;;  %6231 = vmatmul.f32.vlgmr.msra.gmra.mxu3 %v9252_v27  ;;  %v4958_v13 = vadd.f32 %v4957_v19, %v4927_v2 }
 0x2d1   : > { %v4984_v24 = vpop.f32.mrf.mxu0  ;;  %v5044_v47 = vpop.f32.mrf.mxu2  ;;  %7294 = vmatpush.msk.msra.mxu3 %vm7580_vm10, %v7463_v11  ;;  %6455 = vmatpush.msra.mxu2 %v7667_v17 }
 0x2d2   : > { %v4985_v49 = vadd.f32 %v4984_v24, %v4952_v18  ;;  %v5015_v20 = vpop.f32.mrf.mxu1 }
 0x2d3   : > { %v5083_v54 = vpop.f32.mrf.mxu3  ;;  %7295 = vmatpush.msk.msra.mxu3 %vm7575_vm9, %v7463_v11 }
 0x2d4   : > { %v5012_v46 = vadd.f32 %v5011_v15, %v4985_v49  ;;  %6132 = vmatmul.f32.vlgmr.msra.gmra.mxu0 %v9272_v6 }
 0x2d5   : > { %6175 = vmatmul.f32.gmra.mxu1 %v9254_v16  ;;  %6388 = vmatpush.msra.mxu0 %v7617_v37  ;;  %v5084_v37 = vadd.f32 %v5083_v54, %v5044_v47 }
 0x2d6   : > { %7208 = vst.msk [vmem:[%s8068_s15 + $0x160] sm:$0xff] %vm467_vm11, %v5012_v46  ;;  %6206 = vmatmul.f32.gmra.mxu2 %v9261_v34 }
 0x2d7   : > { %6391 = vmatpush.msra.mxu0 %v7622_v41 }
 0x2d8   : > { %6237 = vmatmul.f32.gmra.mxu3 %v9275_v26 }
 0x2d9   : > { %v4988_v17 = vpop.f32.mrf.mxu0  ;;  %v5052_v29 = vpop.f32.mrf.mxu2 }
 0x2da   : > { %v4989_v21 = vadd.f32 %v4988_v17, %v4958_v13  ;;  %v5143_v22 = vpop.f32.mrf.mxu1 }
 0x2db   : > { %v5087_v55 = vpop.f32.mrf.mxu3 }
 0x2dc   : > { %v5016_v44 = vadd.f32 %v5015_v20, %v4989_v21  ;;  %6140 = vmatmul.f32.gmra.mxu0 %v9294_v14 }
 0x2dd   : > { %6291 = vmatmul.f32.vlgmr.msrb.gmra.mxu1 %v9231_v59 }
 0x2de   : > { %6548 = vmatpush.msrb.mxu1 %v7755_v48  ;;  %7209 = vst.msk [vmem:[%s8068_s15 + $0x168] sm:$0xff] %vm467_vm11, %v5016_v44  ;;  %6325 = vmatmul.f32.vlgmr.msrb.gmra.mxu2 %v9272_v6 }
 0x2df   : > { %6580 = vmatpush.msrb.mxu2 %v7728_v39 }
 0x2e0   : > { %6554 = vmatpush.msrb.mxu1 %v7775_v53  ;;  %6364 = vmatmul.f32.vlgmr.msrb.gmra.mxu3 %v9231_v59 }
 0x2e1   : > { %v5113_v41 = vpop.f32.mrf.mxu0  ;;  %v5176_v36 = vpop.f32.mrf.mxu2  ;;  %7300 = vmatpush.msk.msrb.mxu3 %vm7716_vm12, %v7463_v11  ;;  %6583 = vmatpush.msrb.mxu2 %v7757_v50  ;;  %v5088_v50 = vadd.f32 %v5087_v55, %v5052_v29 }
 0x2e2   : > { %v5114_v48 = vadd.f32 %v5113_v41, %v5084_v37  ;;  %v5149_v28 = vpop.f32.mrf.mxu1 }
 0x2e3   : > { %v5203_v4 = vpop.f32.mrf.mxu3  ;;  %7301 = vmatpush.msk.msrb.mxu3 %vm7747_vm13, %v7463_v11 }
 0x2e4   : > { %v5144_v39 = vadd.f32 %v5143_v22, %v5114_v48  ;;  %6264 = vmatmul.f32.vlgmr.msrb.gmra.mxu0 %v9231_v59 }
 0x2e5   : > { %6295 = vmatmul.f32.gmra.mxu1 %v9254_v16  ;;  %7298 = vmatpush.msk.msrb.mxu0 %vm7716_vm12, %v7463_v11 }
 0x2e6   : > { %v5177_v53 = vadd.f32 %v5176_v36, %v5144_v39  ;;  %6333 = vmatmul.f32.gmra.mxu2 %v9294_v14 }
 0x2e7   : > { %7299 = vmatpush.msk.msrb.mxu0 %vm7747_vm13, %v7463_v11 }
 0x2e8   : > { %v5204_v25 = vadd.f32 %v5203_v4, %v5177_v53  ;;  %6368 = vmatmul.f32.gmra.mxu3 %v9254_v16 }
 0x2e9   : > { %v5118_v30 = vpop.f32.mrf.mxu0  ;;  %v5180_v62 = vpop.f32.mrf.mxu2 }
 0x2ea   : > { %7216 = vst.msk [vmem:[%s8068_s15 + $0x170] sm:$0xff] %vm467_vm11, %v5204_v25  ;;  %v5119_v10 = vadd.f32 %v5118_v30, %v5088_v50  ;;  %v5339_v5 = vpop.f32.mrf.mxu1 }
 0x2eb   : > { %v5207_v43 = vpop.f32.mrf.mxu3 }
 0x2ec   : > { %v5150_v32 = vadd.f32 %v5149_v28, %v5119_v10  ;;  %6268 = vmatmul.f32.gmra.mxu0 %v9254_v16 }
 0x2ed   : > { %6424 = vmatmul.f32.vlgmr.msra.gmra.mxu1 %v9252_v27 }
 0x2ee   : > { %7302 = vmatpush.msk.msra.mxu1 %vm7716_vm12, %v7463_v11  ;;  %v5181_v23 = vadd.f32 %v5180_v62, %v5150_v32  ;;  %6457 = vmatmul.f32.vlgmr.msra.gmra.mxu2 %v9231_v59 }
 0x2ef   : > { %7306 = vmatpush.msk.msra.mxu2 %vm7766_vm14, %v7463_v11 }
 0x2f0   : > { %7303 = vmatpush.msk.msra.mxu1 %vm7747_vm13, %v7463_v11  ;;  %v5208_v7 = vadd.f32 %v5207_v43, %v5181_v23  ;;  %6484 = vmatmul.f32.vlgmr.msra.gmra.mxu3 %v9231_v59 }
 0x2f1   : > { %v5300_v9 = vpop.f32.mrf.mxu0  ;;  %v5369_v1 = vpop.f32.mrf.mxu2  ;;  %6740 = vmatpush.msra.mxu3 %v7820_v8  ;;  %7307 = vmatpush.msk.msra.mxu2 %vm7786_vm15, %v7463_v11 }
 0x2f2   : > { %7217 = vst.msk [vmem:[%s8068_s15 + $0x178] sm:$0xff] %vm467_vm11, %v5208_v7  ;;  %v5343_v35 = vpop.f32.mrf.mxu1  ;;  %v5340_v45 = vadd.f32 %v5339_v5, %v5300_v9 }
 0x2f3   : > { %v5399_v38 = vpop.f32.mrf.mxu3  ;;  %6746 = vmatpush.msra.mxu3 %v7831_v63 }
 0x2f4   : > { %6394 = vmatmul.f32.vlgmr.msra.gmra.mxu0 %v9244_v12  ;;  %v5370_v31 = vadd.f32 %v5369_v1, %v5340_v45 }
 0x2f5   : > { %6430 = vmatmul.f32.gmra.mxu1 %v9275_v26  ;;  %6643 = vmatpush.msra.mxu0 %v7738_v42 }
 0x2f6   : > { %6461 = vmatmul.f32.gmra.mxu2 %v9254_v16  ;;  %v5400_v42 = vadd.f32 %v5399_v38, %v5370_v31 }
 0x2f7   : > { %6647 = vmatpush.msra.mxu0 %v7762_v51 }
 0x2f8   : > { %6488 = vmatmul.f32.gmra.mxu3 %v9254_v16 }
 0x2f9   : > { %v5308_v8 = vpop.f32.mrf.mxu0  ;;  %v5374_v56 = vpop.f32.mrf.mxu2 }
 0x2fa   : > { %v5459_v15 = vpop.f32.mrf.mxu1  ;;  %v5344_v51 = vadd.f32 %v5343_v35, %v5308_v8 }
 0x2fb   : > { %v5405_v19 = vpop.f32.mrf.mxu3 }
 0x2fc   : > { %6399 = vmatmul.f32.gmra.mxu0 %v9261_v34  ;;  %v5375_v24 = vadd.f32 %v5374_v56, %v5344_v51 }
 0x2fd   : > { %6556 = vmatmul.f32.vlgmr.msrb.gmra.mxu1 %v9231_v59 }
 0x2fe   : > { %7308 = vmatpush.msk.msrb.mxu1 %vm7766_vm14, %v7463_v11  ;;  %6586 = vmatmul.f32.vlgmr.msrb.gmra.mxu2 %v9244_v12  ;;  %v5406_v52 = vadd.f32 %v5405_v19, %v5375_v24 }
 0x2ff   : > { %6835 = vmatpush.msrb.mxu2 %v7805_v58 }
 0x300   : > { %7309 = vmatpush.msk.msrb.mxu1 %vm7786_vm15, %v7463_v11  ;;  %6616 = vmatmul.f32.vlgmr.msrb.gmra.mxu3 %v9252_v27 }
 0x301   : > { %v5432_v63 = vpop.f32.mrf.mxu0  ;;  %v5493_v33 = vpop.f32.mrf.mxu2  ;;  %7310 = vmatpush.msk.msrb.mxu3 %vm7766_vm14, %v7463_v11  ;;  %6839 = vmatpush.msrb.mxu2 %v7816_v61 }
 0x302   : > { %v5433_v18 = vadd.f32 %v5432_v63, %v5400_v42  ;;  %v5463_v40 = vpop.f32.mrf.mxu1 }
 0x303   : > { %v5532_v58 = vpop.f32.mrf.mxu3  ;;  %7311 = vmatpush.msk.msrb.mxu3 %vm7786_vm15, %v7463_v11 }
 0x304   : > { %v5460_v47 = vadd.f32 %v5459_v15, %v5433_v18  ;;  %6517 = vmatmul.f32.vlgmr.msrb.gmra.mxu0 %v9272_v6 }
 0x305   : > { %6560 = vmatmul.f32.gmra.mxu1 %v9254_v16  ;;  %6772 = vmatpush.msrb.mxu0 %v7795_v57  ;;  %v5533_v57 = vadd.f32 %v5532_v58, %v5493_v33 }
 0x306   : > { %7240 = vst.msk [vmem:[%s8068_s15 + $0x180] sm:$0xff] %vm467_vm11, %v5460_v47  ;;  %6591 = vmatmul.f32.gmra.mxu2 %v9261_v34 }
 0x307   : > { %6775 = vmatpush.msrb.mxu0 %v7813_v60 }
 0x308   : > { %6622 = vmatmul.f32.gmra.mxu3 %v9275_v26 }
 0x309   : > { %v5436_v3 = vpop.f32.mrf.mxu0  ;;  %v5501_v11 = vpop.f32.mrf.mxu2 }
 0x30a   : > { %v5437_v61 = vadd.f32 %v5436_v3, %v5406_v52  ;;  %v5592_v49 = vpop.f32.mrf.mxu1 }
 0x30b   : > { %v5536_v20 = vpop.f32.mrf.mxu3 }
 0x30c   : > { %v5464_v54 = vadd.f32 %v5463_v40, %v5437_v61  ;;  %6525 = vmatmul.f32.gmra.mxu0 %v9294_v14  ;;  %v5537_v21 = vadd.f32 %v5536_v20, %v5501_v11 }
 0x30d   : > { %6676 = vmatmul.f32.vlgmr.msra.gmra.mxu1 %v9231_v59 }
 0x30e   : > { %7241 = vst.msk [vmem:[%s8068_s15 + $0x188] sm:$0xff] %vm467_vm11, %v5464_v54  ;;  %6709 = vmatmul.f32.vlgmr.msra.gmra.mxu2 %v9272_v6 }
 0x310   : > { %6748 = vmatmul.f32.vlgmr.msra.gmra.mxu3 %v9231_v59 }
 0x311   : > { %v5562_v60 = vpop.f32.mrf.mxu0  ;;  %v5625_v2 = vpop.f32.mrf.mxu2 }
 0x312   : > { %v5563_v46 = vadd.f32 %v5562_v60, %v5533_v57  ;;  %v5598_v0 = vpop.f32.mrf.mxu1 }
 0x313   : > { %v5652_v13 = vpop.f32.mrf.mxu3 }
 0x314   : > { %v5593_v17 = vadd.f32 %v5592_v49, %v5563_v46  ;;  %6649 = vmatmul.f32.vlgmr.msra.gmra.mxu0 %v9231_v59 }
 0x315   : > { %6680 = vmatmul.f32.gmra.mxu1 %v9254_v16 }
 0x316   : > { %v5626_v29 = vadd.f32 %v5625_v2, %v5593_v17  ;;  %6717 = vmatmul.f32.gmra.mxu2 %v9294_v14 }
 0x318   : > { %v5653_v22 = vadd.f32 %v5652_v13, %v5626_v29  ;;  %6752 = vmatmul.f32.gmra.mxu3 %v9254_v16 }
 0x319   : > { %v5567_v6 = vpop.f32.mrf.mxu0  ;;  %v5629_v55 = vpop.f32.mrf.mxu2 }
 0x31a   : > { %7248 = vst.msk [vmem:[%s8068_s15 + $0x190] sm:$0xff] %vm467_vm11, %v5653_v22  ;;  %v5568_v44 = vadd.f32 %v5567_v6, %v5537_v21  ;;  %v5724_v37 = vpop.f32.mrf.mxu1 }
 0x31b   : > { %v5656_v41 = vpop.f32.mrf.mxu3 }
 0x31c   : > { %v5599_v36 = vadd.f32 %v5598_v0, %v5568_v44  ;;  %6653 = vmatmul.f32.gmra.mxu0 %v9254_v16 }
 0x31d   : > { %6808 = vmatmul.f32.vlgmr.msrb.gmra.mxu1 %v9252_v27 }
 0x31e   : > { %v5630_v48 = vadd.f32 %v5629_v55, %v5599_v36  ;;  %6841 = vmatmul.f32.vlgmr.msrb.gmra.mxu2 %v9231_v59 }
 0x320   : > { %v5657_v14 = vadd.f32 %v5656_v41, %v5630_v48  ;;  %6868 = vmatmul.f32.vlgmr.msrb.gmra.mxu3 %v9231_v59 }
 0x321   : > { %v5685_v28 = vpop.f32.mrf.mxu0  ;;  %v5754_v4 = vpop.f32.mrf.mxu2 }
 0x322   : > { %7249 = vst.msk [vmem:[%s8068_s15 + $0x198] sm:$0xff] %vm467_vm11, %v5657_v14  ;;  %v5728_v39 = vpop.f32.mrf.mxu1  ;;  %v5725_v50 = vadd.f32 %v5724_v37, %v5685_v28 }
 0x323   : > { %v5784_v53 = vpop.f32.mrf.mxu3 }
 0x324   : > { %6778 = vmatmul.f32.vlgmr.msrb.gmra.mxu0 %v9244_v12  ;;  %v5755_v62 = vadd.f32 %v5754_v4, %v5725_v50 }
 0x325   : > { %6814 = vmatmul.f32.gmra.mxu1 %v9275_v26 }
 0x326   : > { %6845 = vmatmul.f32.gmra.mxu2 %v9254_v16  ;;  %v5785_v10 = vadd.f32 %v5784_v53, %v5755_v62 }
 0x328   : > { %6872 = vmatmul.f32.gmra.mxu3 %v9254_v16 }
 0x329   : > { %v5693_v27 = vpop.f32.mrf.mxu0  ;;  %v5759_v25 = vpop.f32.mrf.mxu2 }
 0x32a   : > { %v5844_v30 = vpop.f32.mrf.mxu1  ;;  %v5729_v5 = vadd.f32 %v5728_v39, %v5693_v27 }
 0x32b   : > { %v5790_v59 = vpop.f32.mrf.mxu3 }
 0x32c   : > { %6783 = vmatmul.f32.gmra.mxu0 %v9261_v34  ;;  %v5760_v7 = vadd.f32 %v5759_v25, %v5729_v5 }
 0x32e   : > { %v5791_v16 = vadd.f32 %v5790_v59, %v5760_v7 }
 0x331   : > { %v5817_v43 = vpop.f32.mrf.mxu0  ;;  %v5877_v12 = vpop.f32.mrf.mxu2 }
 0x332   : > { %v5818_v32 = vadd.f32 %v5817_v43, %v5785_v10  ;;  %v5848_v26 = vpop.f32.mrf.mxu1 }
 0x333   : > { %v5916_v23 = vpop.f32.mrf.mxu3 }
 0x334   : > { %v5845_v9 = vadd.f32 %v5844_v30, %v5818_v32  ;;  %v5917_v56 = vadd.f32 %v5916_v23, %v5877_v12 }
 0x336   : > { %7256 = vst.msk [vmem:[%s8068_s15 + $0x1a0] sm:$0xff] %vm467_vm11, %v5845_v9 }
 0x339   : > { %v5821_v1 = vpop.f32.mrf.mxu0  ;;  %v5885_v35 = vpop.f32.mrf.mxu2 }
 0x33a   : > { %v5822_v38 = vadd.f32 %v5821_v1, %v5791_v16  ;;  %v5976_v45 = vpop.f32.mrf.mxu1 }
 0x33b   : > { %v5920_v8 = vpop.f32.mrf.mxu3 }
 0x33c   : > { %v5849_v34 = vadd.f32 %v5848_v26, %v5822_v38  ;;  %v5921_v18 = vadd.f32 %v5920_v8, %v5885_v35 }
 0x33e   : > { %7257 = vst.msk [vmem:[%s8068_s15 + $0x1a8] sm:$0xff] %vm467_vm11, %v5849_v34 }
 0x341   : > { %v5946_v15 = vpop.f32.mrf.mxu0  ;;  %v6009_v19 = vpop.f32.mrf.mxu2 }
 0x342   : > { %v5947_v31 = vadd.f32 %v5946_v15, %v5917_v56  ;;  %v5982_v42 = vpop.f32.mrf.mxu1 }
 0x343   : > { %v6036_v51 = vpop.f32.mrf.mxu3 }
 0x344   : > { %v5977_v63 = vadd.f32 %v5976_v45, %v5947_v31 }
 0x346   : > { %v6010_v33 = vadd.f32 %v6009_v19, %v5977_v63 }
 0x348   : > { %v6037_v40 = vadd.f32 %v6036_v51, %v6010_v33 }
 0x349   : > { %v5951_v58 = vpop.f32.mrf.mxu0  ;;  %v6013_v24 = vpop.f32.mrf.mxu2 }
 0x34a   : > { %7264 = vst.msk [vmem:[%s8068_s15 + $0x1b0] sm:$0xff] %vm467_vm11, %v6037_v40  ;;  %v5952_v47 = vadd.f32 %v5951_v58, %v5921_v18  ;;  %v6172_v52 = vpop.f32.mrf.mxu1 }
 0x34b   : > { %v6040_v3 = vpop.f32.mrf.mxu3 }
 0x34c   : > { %v5983_v11 = vadd.f32 %v5982_v42, %v5952_v47 }
 0x34e   : > { %v6014_v61 = vadd.f32 %v6013_v24, %v5983_v11 }
 0x350   : > { %v6041_v49 = vadd.f32 %v6040_v3, %v6014_v61 }
 0x351   : > { %v6133_v20 = vpop.f32.mrf.mxu0  ;;  %v6202_v54 = vpop.f32.mrf.mxu2 }
 0x352   : > { %7265 = vst.msk [vmem:[%s8068_s15 + $0x1b8] sm:$0xff] %vm467_vm11, %v6041_v49  ;;  %v6176_v57 = vpop.f32.mrf.mxu1  ;;  %v6173_v2 = vadd.f32 %v6172_v52, %v6133_v20 }
 0x353   : > { %v6232_v60 = vpop.f32.mrf.mxu3 }
 0x354   : > { %v6203_v29 = vadd.f32 %v6202_v54, %v6173_v2 }
 0x356   : > { %v6233_v21 = vadd.f32 %v6232_v60, %v6203_v29 }
 0x359   : > { %v6141_v46 = vpop.f32.mrf.mxu0  ;;  %v6207_v0 = vpop.f32.mrf.mxu2 }
 0x35a   : > { %v6292_v13 = vpop.f32.mrf.mxu1  ;;  %v6177_v22 = vadd.f32 %v6176_v57, %v6141_v46 }
 0x35b   : > { %v6238_v17 = vpop.f32.mrf.mxu3 }
 0x35c   : > { %v6208_v36 = vadd.f32 %v6207_v0, %v6177_v22 }
 0x35e   : > { %v6239_v14 = vadd.f32 %v6238_v17, %v6208_v36 }
 0x361   : > { %v6265_v6 = vpop.f32.mrf.mxu0  ;;  %v6326_v55 = vpop.f32.mrf.mxu2 }
 0x362   : > { %v6266_v44 = vadd.f32 %v6265_v6, %v6233_v21  ;;  %v6296_v37 = vpop.f32.mrf.mxu1 }
 0x363   : > { %v6365_v41 = vpop.f32.mrf.mxu3 }
 0x364   : > { %v6293_v48 = vadd.f32 %v6292_v13, %v6266_v44  ;;  %v6366_v25 = vadd.f32 %v6365_v41, %v6326_v55 }
 0x366   : > { %7288 = vst.msk [vmem:[%s8068_s15 + $0x1c0] sm:$0xff] %vm467_vm11, %v6293_v48 }
 0x369   : > { %v6269_v28 = vpop.f32.mrf.mxu0  ;;  %v6334_v4 = vpop.f32.mrf.mxu2 }
 0x36a   : > { %v6270_v39 = vadd.f32 %v6269_v28, %v6239_v14  ;;  %v6425_v53 = vpop.f32.mrf.mxu1 }
 0x36b   : > { %v6369_v50 = vpop.f32.mrf.mxu3 }
 0x36c   : > { %v6297_v27 = vadd.f32 %v6296_v37, %v6270_v39  ;;  %v6370_v32 = vadd.f32 %v6369_v50, %v6334_v4 }
 0x36e   : > { %7289 = vst.msk [vmem:[%s8068_s15 + $0x1c8] sm:$0xff] %vm467_vm11, %v6297_v27 }
 0x371   : > { %v6395_v30 = vpop.f32.mrf.mxu0  ;;  %v6458_v59 = vpop.f32.mrf.mxu2 }
 0x372   : > { %v6396_v62 = vadd.f32 %v6395_v30, %v6366_v25  ;;  %v6431_v10 = vpop.f32.mrf.mxu1 }
 0x373   : > { %v6485_v5 = vpop.f32.mrf.mxu3 }
 0x374   : > { %v6426_v43 = vadd.f32 %v6425_v53, %v6396_v62 }
 0x376   : > { %v6459_v12 = vadd.f32 %v6458_v59, %v6426_v43 }
 0x378   : > { %v6486_v26 = vadd.f32 %v6485_v5, %v6459_v12 }
 0x379   : > { %v6400_v23 = vpop.f32.mrf.mxu0  ;;  %v6462_v7 = vpop.f32.mrf.mxu2 }
 0x37a   : > { %7296 = vst.msk [vmem:[%s8068_s15 + $0x1d0] sm:$0xff] %vm467_vm11, %v6486_v26  ;;  %v6401_v9 = vadd.f32 %v6400_v23, %v6370_v32  ;;  %v6557_v16 = vpop.f32.mrf.mxu1 }
 0x37b   : > { %v6489_v1 = vpop.f32.mrf.mxu3 }
 0x37c   : > { %v6432_v35 = vadd.f32 %v6431_v10, %v6401_v9 }
 0x37e   : > { %v6463_v38 = vadd.f32 %v6462_v7, %v6432_v35 }
 0x380   : > { %v6490_v45 = vadd.f32 %v6489_v1, %v6463_v38 }
 0x381   : > { %v6518_v8 = vpop.f32.mrf.mxu0  ;;  %v6587_v34 = vpop.f32.mrf.mxu2 }
 0x382   : > { %7297 = vst.msk [vmem:[%s8068_s15 + $0x1d8] sm:$0xff] %vm467_vm11, %v6490_v45  ;;  %v6561_v15 = vpop.f32.mrf.mxu1  ;;  %v6558_v19 = vadd.f32 %v6557_v16, %v6518_v8 }
 0x383   : > { %v6617_v56 = vpop.f32.mrf.mxu3 }
 0x384   : > { %v6588_v33 = vadd.f32 %v6587_v34, %v6558_v19 }
 0x386   : > { %v6618_v18 = vadd.f32 %v6617_v56, %v6588_v33 }
 0x389   : > { %v6526_v31 = vpop.f32.mrf.mxu0  ;;  %v6592_v42 = vpop.f32.mrf.mxu2 }
 0x38a   : > { %v6677_v63 = vpop.f32.mrf.mxu1  ;;  %v6562_v40 = vadd.f32 %v6561_v15, %v6526_v31 }
 0x38b   : > { %v6623_v51 = vpop.f32.mrf.mxu3 }
 0x38c   : > { %v6593_v3 = vadd.f32 %v6592_v42, %v6562_v40 }
 0x38e   : > { %v6624_v49 = vadd.f32 %v6623_v51, %v6593_v3 }
 0x391   : > { %v6650_v58 = vpop.f32.mrf.mxu0  ;;  %v6710_v24 = vpop.f32.mrf.mxu2 }
 0x392   : > { %v6651_v47 = vadd.f32 %v6650_v58, %v6618_v18  ;;  %v6681_v61 = vpop.f32.mrf.mxu1 }
 0x393   : > { %v6749_v52 = vpop.f32.mrf.mxu3 }
 0x394   : > { %v6678_v11 = vadd.f32 %v6677_v63, %v6651_v47  ;;  %v6750_v0 = vadd.f32 %v6749_v52, %v6710_v24 }
 0x396   : > { %7304 = vst.msk [vmem:[%s8068_s15 + $0x1e0] sm:$0xff] %vm467_vm11, %v6678_v11 }
 0x399   : > { %v6654_v20 = vpop.f32.mrf.mxu0  ;;  %v6718_v54 = vpop.f32.mrf.mxu2 }
 0x39a   : > { %v6655_v57 = vadd.f32 %v6654_v20, %v6624_v49  ;;  %v6809_v46 = vpop.f32.mrf.mxu1 }
 0x39b   : > { %v6753_v60 = vpop.f32.mrf.mxu3 }
 0x39c   : > { %v6682_v2 = vadd.f32 %v6681_v61, %v6655_v57  ;;  %v6754_v55 = vadd.f32 %v6753_v60, %v6718_v54 }
 0x39e   : > { %7305 = vst.msk [vmem:[%s8068_s15 + $0x1e8] sm:$0xff] %vm467_vm11, %v6682_v2 }
 0x3a1   : > { %v6779_v13 = vpop.f32.mrf.mxu0  ;;  %v6842_v17 = vpop.f32.mrf.mxu2 }
 0x3a2   : > { %v6780_v29 = vadd.f32 %v6779_v13, %v6750_v0  ;;  %v6815_v41 = vpop.f32.mrf.mxu1 }
 0x3a3   : > { %v6869_v21 = vpop.f32.mrf.mxu3 }
 0x3a4   : > { %v6810_v22 = vadd.f32 %v6809_v46, %v6780_v29 }
 0x3a6   : > { %v6843_v6 = vadd.f32 %v6842_v17, %v6810_v22 }
 0x3a8   : > { %v6870_v44 = vadd.f32 %v6869_v21, %v6843_v6 }
 0x3a9   : > { %v6784_v37 = vpop.f32.mrf.mxu0  ;;  %v6846_v48 = vpop.f32.mrf.mxu2 }
 0x3aa   : > { %7312 = vst.msk [vmem:[%s8068_s15 + $0x1f0] sm:$0xff] %vm467_vm11, %v6870_v44  ;;  %v6785_v36 = vadd.f32 %v6784_v37, %v6754_v55 }
 0x3ab   : > { %v6873_v28 = vpop.f32.mrf.mxu3 }
 0x3ac   : > { %v6816_v14 = vadd.f32 %v6815_v41, %v6785_v36 }
 0x3ae   : > { %v6847_v4 = vadd.f32 %v6846_v48, %v6816_v14 }
 0x3b0   : > { %v6874_v39 = vadd.f32 %v6873_v28, %v6847_v4 }
 0x3b2   : > { %7313 = vst.msk [vmem:[%s8068_s15 + $0x1f8] sm:$0xff] %vm467_vm11, %v6874_v39 }
 0x3b3 PF: > { %s14_s11 = sadd.s32 1, %s7458_s11   ;;  %s9476_s6 = smov %s7442_s7 }
 0x3b4   : > { %p11_p0 = scmp.ge.s32.totalorder %s14_s11, 4   ;;  %s9477_s7 = smov %s7446_s8 }
 0x3b5   : > { %s9478_s8 = smov %s7523_s18  ;;  %s9479_s9 = smov %s7454_s10 }
 0x3b6   : > { %s9480_s10 = smov %s9482_s13  ;;  %13 = sbr.rel (!%p11_p0) target bundleno = 4 (0x4), region = 72 }
 0x3bb   :  { %6913 = vsyncpa [#allocation3], 1 }
 0x3bc   :  { %6915 = vsyncpa [#allocation3 + $0x1], 1 }

</bundles_post_ra>
